<compile_context>
chip_gen: v6e
topology: v6e:2x2x1
jax: 0.10.0
libtpu: 0.0.40
codegen_flags: <defaults>
</compile_context>

<pallas_src>
import math
from functools import partial

import jax
import jax.numpy as jnp
from jax.experimental import pallas as pl
from jax.experimental.pallas import tpu as pltpu

LN_EPS = 1e-5


# ---------------------------------------------------------------------------
# Rotary-embedding table (glue, plain JAX) — mirrors make_axial_pos + __init__
# ---------------------------------------------------------------------------
def make_axial_pos(h, w):
    h_pos = jnp.linspace(-1.0, 1.0, h + 1)
    w_pos = jnp.linspace(-1.0, 1.0, w + 1)
    h_pos = (h_pos[:-1] + h_pos[1:]) / 2
    w_pos = (w_pos[:-1] + w_pos[1:]) / 2
    grid = jnp.stack(jnp.meshgrid(h_pos, w_pos, indexing="ij"), axis=-1)
    return grid.reshape(h * w, 2)


def make_theta(n_heads, head_dim):
    log_min = math.log(math.pi)
    log_max = math.log(10 * math.pi)
    freqs = jnp.exp(jnp.linspace(log_min, log_max, n_heads * head_dim // 8 + 1)[:-1])
    freqs = freqs.reshape(head_dim // 8, n_heads).T        # (n_heads, head_dim//8)
    pos = make_axial_pos(32, 32)                           # (1024, 2)
    pos = jnp.concatenate([jnp.zeros((1, 2)), pos], axis=0)          # (1025, 2)
    theta_h = pos[:, None, 0:1] * freqs                    # (1025, nh, head_dim//8)
    theta_w = pos[:, None, 1:2] * freqs
    return jnp.concatenate([theta_h, theta_w], axis=-1)    # (1025, nh, head_dim//4)


# ---------------------------------------------------------------------------
# Fused Pallas kernel
# ---------------------------------------------------------------------------
def _layernorm(x, gamma, beta):
    mean = jnp.mean(x, axis=-1, keepdims=True)
    var = jnp.mean((x - mean) ** 2, axis=-1, keepdims=True)
    return (x - mean) * jax.lax.rsqrt(var + LN_EPS) * gamma + beta


def _roll_lanes(t, shift):
    # jnp.roll semantics along the last (lane) axis, static shift (pos or neg).
    # Written as slice+concat for guaranteed lowering; entries produced at
    # positions whose sin-table value is zero are never used.
    return jnp.concatenate([t[:, -shift:], t[:, :-shift]], axis=1)


def block_kernel(x_ref, g1_ref, b1_ref, wqkv_ref, bqkv_ref, cos_ref, sina_ref,
                 sinb_ref, mask_ref, wout_ref, bout_ref, g2_ref, b2_ref,
                 wup_ref, wdown_ref, o_ref, *, n_heads, head_dim, hidden_dim):
    x = x_ref[0]                                           # (S, D) f32
    S, D = x.shape
    hd = head_dim
    d_rot = head_dim // 4

    # ------------------------------ attention ------------------------------
    xn = _layernorm(x, g1_ref[...], b1_ref[...])
    # Single 2-D projection (S,D)@(D,3D); Q columns pre-scaled by 1/sqrt(hd).
    u = jnp.dot(xn.astype(jnp.bfloat16), wqkv_ref[...],
                preferred_element_type=jnp.float32) + bqkv_ref[...]   # (S, 3D)

    # Lane-dense RoPE on the 128-lane q|k slab:
    #   y = x*cos + roll(x, +d)*sinA + roll(x, -d)*sinB
    qk = u[:, :2 * D]
    qk = (qk * cos_ref[...]
          + _roll_lanes(qk, d_rot) * sina_ref[...]
          + _roll_lanes(qk, -d_rot) * sinb_ref[...])
    qk = qk.astype(jnp.bfloat16)
    v2 = u[:, 2 * D:3 * D].astype(jnp.bfloat16)

    def split_heads(t):                                    # (S, nh*hd) -> (nh, S, hd)
        return jnp.stack([t[:, h * hd:(h + 1) * hd] for h in range(n_heads)],
                         axis=0)

    q = split_heads(qk[:, :D])
    k = split_heads(qk[:, D:])
    v = split_heads(v2)

    # head-batched bf16 matmuls, f32 accumulation; scale already folded into q
    s = jnp.einsum("hqc,hkc->hqk", q, k,
                   preferred_element_type=jnp.float32)     # (nh, S, S)
    s = s + mask_ref[...][None]                            # additive causal bias

    m = jnp.max(s, axis=-1, keepdims=True)
    p = jnp.exp(s - m)
    l = jnp.sum(p, axis=-1, keepdims=True)
    av = jnp.einsum("hqk,hkc->hqc", p.astype(jnp.bfloat16), v,
                    preferred_element_type=jnp.float32)    # (nh, S, hd)
    av = av * pl.reciprocal(l, approx=True)                # deferred normalization

    # merge heads by lane-concat, then one fused (S,D)@(D,D) out-projection
    y = jnp.concatenate([av[h] for h in range(n_heads)], axis=1)      # (S, D)
    h1 = x + jnp.dot(y.astype(jnp.bfloat16), wout_ref[...],
                     preferred_element_type=jnp.float32) + bout_ref[...]

    # ----------------------------- feedforward -----------------------------
    xn2 = _layernorm(h1, g2_ref[...], b2_ref[...])
    up = jnp.dot(xn2.astype(jnp.bfloat16), wup_ref[...],
                 preferred_element_type=jnp.float32)       # (S, 2H)
    a = up[:, :hidden_dim]
    g = up[:, hidden_dim:]
    sw = a * (g * jax.nn.sigmoid(g))                       # SwiGLU (f32)
    dn = jnp.dot(sw.astype(jnp.bfloat16), wdown_ref[...],
                 preferred_element_type=jnp.float32)       # (S, D)
    # TODO(synk): lane-dense output layout (D=64 -> masked vst) when scaling up.
    o_ref[0] = h1 + dn


# ---------------------------------------------------------------------------
# Wrapper: build RoPE tables / fold scale into Q weights, launch fused kernel
# ---------------------------------------------------------------------------
def block_forward(x, params, *, head_dim, hidden_dim):
    B, S, D = x.shape
    n_heads = D // head_dim
    hd = head_dim
    d_rot = head_dim // 4
    scale = 1.0 / math.sqrt(head_dim)

    # RoPE tables, lane-dense over the 128-lane q|k slab: (S, 2D)
    theta = make_theta(n_heads, head_dim)                  # (1025, nh, d_rot)
    th = theta[:S]                                         # (S, nh, d_rot)
    cos_r, sin_r = jnp.cos(th), jnp.sin(th)
    ones = jnp.ones((S, n_heads, hd - 2 * d_rot), jnp.float32)
    zeros_d = jnp.zeros((S, n_heads, d_rot), jnp.float32)
    zeros_r = jnp.zeros((S, n_heads, hd - 2 * d_rot), jnp.float32)
    cos_h = jnp.concatenate([cos_r, cos_r, ones], axis=-1)          # (S, nh, hd)
    sina_h = jnp.concatenate([zeros_d, sin_r, zeros_r], axis=-1)    # +x1*sin -> y2
    sinb_h = jnp.concatenate([-sin_r, zeros_d, zeros_r], axis=-1)   # -x2*sin -> y1
    cos2 = jnp.tile(cos_h.reshape(S, D), (1, 2)).astype(jnp.float32)    # (S, 2D)
    sina2 = jnp.tile(sina_h.reshape(S, D), (1, 2)).astype(jnp.float32)
    sinb2 = jnp.tile(sinb_h.reshape(S, D), (1, 2)).astype(jnp.float32)

    # QKV weights as one (D, 3D) matrix; attention scale folded into Q cols/bias
    wqkv = params["wqkv_t"]                                # (D, 3D) = [q | k | v]
    w3 = jnp.concatenate([wqkv[:, :D] * scale, wqkv[:, D:]], axis=1)
    w3 = w3.astype(jnp.bfloat16)
    bqkv = params["bqkv"][0]                               # (3D,)
    b3 = jnp.concatenate([bqkv[:D] * scale, bqkv[D:]])[None, :].astype(jnp.float32)

    # additive causal mask (0 keep / -1e30 drop)
    row = jnp.arange(S)[:, None]
    col = jnp.arange(S)[None, :]
    mask = jnp.where(row >= col, 0.0, -1e30).astype(jnp.float32)    # (S, S)

    wout = params["wout_t"].astype(jnp.bfloat16)           # (D, D)
    wup = params["wup_t"].astype(jnp.bfloat16)             # (D, 2H)
    wdown = params["wdown_t"].astype(jnp.bfloat16)         # (H, D)

    perb = lambda b: (b, 0, 0)
    c2 = lambda b: (0, 0)

    return pl.pallas_call(
        partial(block_kernel, n_heads=n_heads, head_dim=head_dim,
                hidden_dim=hidden_dim),
        out_shape=jax.ShapeDtypeStruct((B, S, D), jnp.float32),
        grid=(B,),
        in_specs=[
            pl.BlockSpec((1, S, D), perb),                 # x
            pl.BlockSpec((1, D), c2),                      # ln1 gamma
            pl.BlockSpec((1, D), c2),                      # ln1 beta
            pl.BlockSpec((D, 3 * D), c2),                  # qkv weight (Q pre-scaled)
            pl.BlockSpec((1, 3 * D), c2),                  # qkv bias
            pl.BlockSpec((S, 2 * D), c2),                  # cos  (q|k slab)
            pl.BlockSpec((S, 2 * D), c2),                  # sinA (q|k slab)
            pl.BlockSpec((S, 2 * D), c2),                  # sinB (q|k slab)
            pl.BlockSpec((S, S), c2),                      # additive causal mask
            pl.BlockSpec((D, D), c2),                      # out-proj weight
            pl.BlockSpec((1, D), c2),                      # out-proj bias
            pl.BlockSpec((1, D), c2),                      # ln2 gamma
            pl.BlockSpec((1, D), c2),                      # ln2 beta
            pl.BlockSpec((D, 2 * hidden_dim), c2),         # ff up weight
            pl.BlockSpec((hidden_dim, D), c2),             # ff down weight
        ],
        out_specs=pl.BlockSpec((1, S, D), perb),
        compiler_params=pltpu.CompilerParams(dimension_semantics=("parallel",)),
    )(x, params["ln1_g"], params["ln1_b"], w3, b3, cos2, sina2, sinb2, mask,
      wout, params["bout"], params["ln2_g"], params["ln2_b"], wup, wdown)


# ---------------------------------------------------------------------------
# Pure-JAX f32 reference (mirrors the PyTorch forward, eval mode / dropout=0)
# ---------------------------------------------------------------------------
def ref_block(x, params, *, head_dim, hidden_dim):
    B, S, D = x.shape
    n_heads = D // head_dim
    theta = make_theta(n_heads, head_dim)
    theta_s = jnp.transpose(theta[:S], (1, 0, 2))          # (n_heads, S, d_rot)
    cos, sin = jnp.cos(theta_s), jnp.sin(theta_s)
    d = cos.shape[-1]

    def ln(v, g, b):
        mean = jnp.mean(v, axis=-1, keepdims=True)
        var = jnp.mean((v - mean) ** 2, axis=-1, keepdims=True)
        return (v - mean) * jax.lax.rsqrt(var + LN_EPS) * g[0] + b[0]

    # attention
    xn = ln(x, params["ln1_g"], params["ln1_b"])
    qkv = xn @ params["wqkv_t"] + params["bqkv"][0]
    qkv = qkv.reshape(B, S, 3, n_heads, head_dim).transpose(0, 3, 2, 1, 4)
    q, k, v = qkv[:, :, 0], qkv[:, :, 1], qkv[:, :, 2]     # (B, nh, S, hd)

    def rope(t):
        t1, t2, rest = t[..., :d], t[..., d:2 * d], t[..., 2 * d:]
        c, s = cos[None], sin[None]
        return jnp.concatenate([t1 * c - t2 * s, t2 * c + t1 * s, rest], axis=-1)

    q, k = rope(q), rope(k)
    scores = jnp.einsum("bhqd,bhkd->bhqk", q, k) / math.sqrt(head_dim)
    mask = jnp.tril(jnp.ones((S, S), dtype=bool))
    scores = jnp.where(mask, scores, -jnp.inf)
    attnw = jax.nn.softmax(scores, axis=-1)
    o = jnp.einsum("bhqk,bhkd->bhqd", attnw, v)
    o = o.transpose(0, 2, 1, 3).reshape(B, S, D)
    x = x + o @ params["wout_t"] + params["bout"][0]

    # feedforward
    xn = ln(x, params["ln2_g"], params["ln2_b"])
    u = xn @ params["wup_t"]
    a, g = u[..., :hidden_dim], u[..., hidden_dim:]
    x = x + (a * (g * jax.nn.sigmoid(g))) @ params["wdown_t"]
    return x


# ---------------------------------------------------------------------------
if __name__ == "__main__":
    B, S = 2, 64
    dim, hidden_dim, head_dim = 64, 128, 16

    key = jax.random.PRNGKey(0)
    ks = jax.random.split(key, 8)
    # NOTE: the PyTorch module zero-inits out_proj and ff.down (identity block at
    # init); here we use small random params so the full compute path is exercised.
    params = {
        "ln1_g": jnp.ones((1, dim), jnp.float32),
        "ln1_b": jnp.zeros((1, dim), jnp.float32),
        "wqkv_t": 0.05 * jax.random.normal(ks[0], (dim, 3 * dim), jnp.float32),
        "bqkv": 0.05 * jax.random.normal(ks[1], (1, 3 * dim), jnp.float32),
        "wout_t": 0.05 * jax.random.normal(ks[2], (dim, dim), jnp.float32),
        "bout": 0.05 * jax.random.normal(ks[3], (1, dim), jnp.float32),
        "ln2_g": jnp.ones((1, dim), jnp.float32),
        "ln2_b": jnp.zeros((1, dim), jnp.float32),
        "wup_t": 0.05 * jax.random.normal(ks[4], (dim, 2 * hidden_dim), jnp.float32),
        "wdown_t": 0.05 * jax.random.normal(ks[5], (hidden_dim, dim), jnp.float32),
    }

    x = jax.random.normal(ks[6], (B, S, dim), jnp.float32)

    out = block_forward(x, params, head_dim=head_dim, hidden_dim=hidden_dim)
    out = jax.block_until_ready(out)

    ref = ref_block(x, params, head_dim=head_dim, hidden_dim=hidden_dim)
    assert out.shape == (B, S, dim)
    # tolerance relaxed vs f32 reference: kernel uses bf16 MXU inputs (f32 accum)
    # and approx-reciprocal softmax normalization.
    err = float(jnp.max(jnp.abs(out - ref)))
    assert jnp.allclose(out, ref, atol=2e-2, rtol=2e-2), err

    print("KERNEL_OK")
</pallas_src>

<mosaic_0001>
module attributes {stable_mosaic.version = 11 : i64} {
  func.func @block_kernel(%arg0: i32, %arg1: memref<1x64x64xf32, #tpu.memory_space<vmem>>, %arg2: memref<1x64xf32, #tpu.memory_space<vmem>>, %arg3: memref<1x64xf32, #tpu.memory_space<vmem>>, %arg4: memref<64x192xbf16, #tpu.memory_space<vmem>>, %arg5: memref<1x192xf32, #tpu.memory_space<vmem>>, %arg6: memref<64x128xf32, #tpu.memory_space<vmem>>, %arg7: memref<64x128xf32, #tpu.memory_space<vmem>>, %arg8: memref<64x128xf32, #tpu.memory_space<vmem>>, %arg9: memref<64x64xf32, #tpu.memory_space<vmem>>, %arg10: memref<64x64xbf16, #tpu.memory_space<vmem>>, %arg11: memref<1x64xf32, #tpu.memory_space<vmem>>, %arg12: memref<1x64xf32, #tpu.memory_space<vmem>>, %arg13: memref<1x64xf32, #tpu.memory_space<vmem>>, %arg14: memref<64x256xbf16, #tpu.memory_space<vmem>>, %arg15: memref<128x64xbf16, #tpu.memory_space<vmem>>, %arg16: memref<1x64x64xf32, #tpu.memory_space<vmem>>) attributes {dimension_semantics = [#tpu.dimension_semantics<parallel>], iteration_bounds = array<i64: 2>, scalar_prefetch = 0 : i64, scratch_operands = 0 : i64, tpu.core_type = #tpu.core_type<tc>, window_params = [{transform_indices = @transform_0, window_bounds = array<i64: 1, 64, 64>}, {pipeline_mode = #tpu.pipeline_mode<synchronous>, transform_indices = @transform_1, window_bounds = array<i64: 1, 64>}, {pipeline_mode = #tpu.pipeline_mode<synchronous>, transform_indices = @transform_2, window_bounds = array<i64: 1, 64>}, {pipeline_mode = #tpu.pipeline_mode<synchronous>, transform_indices = @transform_3, window_bounds = array<i64: 64, 192>}, {pipeline_mode = #tpu.pipeline_mode<synchronous>, transform_indices = @transform_4, window_bounds = array<i64: 1, 192>}, {pipeline_mode = #tpu.pipeline_mode<synchronous>, transform_indices = @transform_5, window_bounds = array<i64: 64, 128>}, {pipeline_mode = #tpu.pipeline_mode<synchronous>, transform_indices = @transform_6, window_bounds = array<i64: 64, 128>}, {pipeline_mode = #tpu.pipeline_mode<synchronous>, transform_indices = @transform_7, window_bounds = array<i64: 64, 128>}, {pipeline_mode = #tpu.pipeline_mode<synchronous>, transform_indices = @transform_8, window_bounds = array<i64: 64, 64>}, {pipeline_mode = #tpu.pipeline_mode<synchronous>, transform_indices = @transform_9, window_bounds = array<i64: 64, 64>}, {pipeline_mode = #tpu.pipeline_mode<synchronous>, transform_indices = @transform_10, window_bounds = array<i64: 1, 64>}, {pipeline_mode = #tpu.pipeline_mode<synchronous>, transform_indices = @transform_11, window_bounds = array<i64: 1, 64>}, {pipeline_mode = #tpu.pipeline_mode<synchronous>, transform_indices = @transform_12, window_bounds = array<i64: 1, 64>}, {pipeline_mode = #tpu.pipeline_mode<synchronous>, transform_indices = @transform_13, window_bounds = array<i64: 64, 256>}, {pipeline_mode = #tpu.pipeline_mode<synchronous>, transform_indices = @transform_14, window_bounds = array<i64: 128, 64>}, {transform_indices = @transform_15, window_bounds = array<i64: 1, 64, 64>}]} {
    %c0 = arith.constant 0 : index
    %c0_0 = arith.constant 0 : index
    %c0_1 = arith.constant 0 : index
    %0 = vector.load %arg1[%c0, %c0_0, %c0_1] : memref<1x64x64xf32, #tpu.memory_space<vmem>>, vector<1x64x64xf32>
    %1 = vector.shape_cast %0 : vector<1x64x64xf32> to vector<64x64xf32>
    %c0_2 = arith.constant 0 : index
    %c0_3 = arith.constant 0 : index
    %2 = vector.load %arg2[%c0_2, %c0_3] : memref<1x64xf32, #tpu.memory_space<vmem>>, vector<1x64xf32>
    %c0_4 = arith.constant 0 : index
    %c0_5 = arith.constant 0 : index
    %3 = vector.load %arg3[%c0_4, %c0_5] : memref<1x64xf32, #tpu.memory_space<vmem>>, vector<1x64xf32>
    %cst = arith.constant dense<0.000000e+00> : vector<64xf32>
    %4 = vector.multi_reduction <add>, %1, %cst [1] : vector<64x64xf32> to vector<64xf32>
    %5 = vector.shape_cast %4 : vector<64xf32> to vector<64x1xf32>
    %cst_6 = arith.constant 6.400000e+01 : f32
    %6 = vector.broadcast %cst_6 : f32 to vector<64x1xf32>
    %7 = arith.divf %5, %6 : vector<64x1xf32>
    %8 = vector.broadcast %7 : vector<64x1xf32> to vector<64x64xf32>
    %9 = arith.subf %1, %8 : vector<64x64xf32>
    %10 = arith.mulf %9, %9 : vector<64x64xf32>
    %cst_7 = arith.constant dense<0.000000e+00> : vector<64xf32>
    %11 = vector.multi_reduction <add>, %10, %cst_7 [1] : vector<64x64xf32> to vector<64xf32>
    %12 = vector.shape_cast %11 : vector<64xf32> to vector<64x1xf32>
    %cst_8 = arith.constant 6.400000e+01 : f32
    %13 = vector.broadcast %cst_8 : f32 to vector<64x1xf32>
    %14 = arith.divf %12, %13 : vector<64x1xf32>
    %15 = vector.broadcast %7 : vector<64x1xf32> to vector<64x64xf32>
    %16 = arith.subf %1, %15 : vector<64x64xf32>
    %cst_9 = arith.constant 9.99999974E-6 : f32
    %17 = vector.broadcast %cst_9 : f32 to vector<64x1xf32>
    %18 = arith.addf %14, %17 : vector<64x1xf32>
    %19 = math.rsqrt %18 : vector<64x1xf32>
    %20 = vector.broadcast %19 : vector<64x1xf32> to vector<64x64xf32>
    %21 = arith.mulf %16, %20 : vector<64x64xf32>
    %22 = vector.broadcast %2 : vector<1x64xf32> to vector<64x64xf32>
    %23 = arith.mulf %21, %22 : vector<64x64xf32>
    %24 = vector.broadcast %3 : vector<1x64xf32> to vector<64x64xf32>
    %25 = arith.addf %23, %24 : vector<64x64xf32>
    %26 = arith.truncf %25 : vector<64x64xf32> to vector<64x64xbf16>
    %c0_10 = arith.constant 0 : index
    %c0_11 = arith.constant 0 : index
    %27 = vector.load %arg4[%c0_10, %c0_11] : memref<64x192xbf16, #tpu.memory_space<vmem>>, vector<64x192xbf16>
    %cst_12 = arith.constant dense<0.000000e+00> : vector<64x192xf32>
    %28 = tpu.matmul %26, %27, %cst_12 {dimension_numbers = #tpu.dot_dimension_numbers<[1], [0], [0], [1], [0, 0, 1, 1], [], []>} : vector<64x64xbf16>, vector<64x192xbf16>, vector<64x192xf32> -> vector<64x192xf32>
    %c0_13 = arith.constant 0 : index
    %c0_14 = arith.constant 0 : index
    %29 = vector.load %arg5[%c0_13, %c0_14] : memref<1x192xf32, #tpu.memory_space<vmem>>, vector<1x192xf32>
    %30 = vector.broadcast %29 : vector<1x192xf32> to vector<64x192xf32>
    %31 = arith.addf %28, %30 : vector<64x192xf32>
    %32 = vector.extract_strided_slice %31 {offsets = [0, 0], sizes = [64, 128], strides = [1, 1]} : vector<64x192xf32> to vector<64x128xf32>
    %c0_15 = arith.constant 0 : index
    %c0_16 = arith.constant 0 : index
    %33 = vector.load %arg6[%c0_15, %c0_16] : memref<64x128xf32, #tpu.memory_space<vmem>>, vector<64x128xf32>
    %34 = arith.mulf %32, %33 : vector<64x128xf32>
    %35 = vector.extract_strided_slice %32 {offsets = [0, 124], sizes = [64, 4], strides = [1, 1]} : vector<64x128xf32> to vector<64x4xf32>
    %36 = vector.extract_strided_slice %32 {offsets = [0, 0], sizes = [64, 124], strides = [1, 1]} : vector<64x128xf32> to vector<64x124xf32>
    %37 = tpu.concatenate %35, %36 in 1 : vector<64x4xf32>, vector<64x124xf32> -> vector<64x128xf32>
    %c0_17 = arith.constant 0 : index
    %c0_18 = arith.constant 0 : index
    %38 = vector.load %arg7[%c0_17, %c0_18] : memref<64x128xf32, #tpu.memory_space<vmem>>, vector<64x128xf32>
    %39 = arith.mulf %37, %38 : vector<64x128xf32>
    %40 = arith.addf %34, %39 : vector<64x128xf32>
    %41 = vector.extract_strided_slice %32 {offsets = [0, 4], sizes = [64, 124], strides = [1, 1]} : vector<64x128xf32> to vector<64x124xf32>
    %42 = vector.extract_strided_slice %32 {offsets = [0, 0], sizes = [64, 4], strides = [1, 1]} : vector<64x128xf32> to vector<64x4xf32>
    %43 = tpu.concatenate %41, %42 in 1 : vector<64x124xf32>, vector<64x4xf32> -> vector<64x128xf32>
    %c0_19 = arith.constant 0 : index
    %c0_20 = arith.constant 0 : index
    %44 = vector.load %arg8[%c0_19, %c0_20] : memref<64x128xf32, #tpu.memory_space<vmem>>, vector<64x128xf32>
    %45 = arith.mulf %43, %44 : vector<64x128xf32>
    %46 = arith.addf %40, %45 : vector<64x128xf32>
    %47 = arith.truncf %46 : vector<64x128xf32> to vector<64x128xbf16>
    %48 = vector.extract_strided_slice %31 {offsets = [0, 128], sizes = [64, 64], strides = [1, 1]} : vector<64x192xf32> to vector<64x64xf32>
    %49 = arith.truncf %48 : vector<64x64xf32> to vector<64x64xbf16>
    %50 = vector.extract_strided_slice %47 {offsets = [0, 0], sizes = [64, 64], strides = [1, 1]} : vector<64x128xbf16> to vector<64x64xbf16>
    %51 = vector.extract_strided_slice %50 {offsets = [0, 0], sizes = [64, 16], strides = [1, 1]} : vector<64x64xbf16> to vector<64x16xbf16>
    %52 = vector.extract_strided_slice %50 {offsets = [0, 16], sizes = [64, 16], strides = [1, 1]} : vector<64x64xbf16> to vector<64x16xbf16>
    %53 = vector.extract_strided_slice %50 {offsets = [0, 32], sizes = [64, 16], strides = [1, 1]} : vector<64x64xbf16> to vector<64x16xbf16>
    %54 = vector.extract_strided_slice %50 {offsets = [0, 48], sizes = [64, 16], strides = [1, 1]} : vector<64x64xbf16> to vector<64x16xbf16>
    %55 = vector.shape_cast %51 : vector<64x16xbf16> to vector<1x64x16xbf16>
    %56 = vector.shape_cast %52 : vector<64x16xbf16> to vector<1x64x16xbf16>
    %57 = vector.shape_cast %53 : vector<64x16xbf16> to vector<1x64x16xbf16>
    %58 = vector.shape_cast %54 : vector<64x16xbf16> to vector<1x64x16xbf16>
    %59 = tpu.concatenate %55, %56, %57, %58 in 0 : vector<1x64x16xbf16>, vector<1x64x16xbf16>, vector<1x64x16xbf16>, vector<1x64x16xbf16> -> vector<4x64x16xbf16>
    %60 = vector.extract_strided_slice %47 {offsets = [0, 64], sizes = [64, 64], strides = [1, 1]} : vector<64x128xbf16> to vector<64x64xbf16>
    %61 = vector.extract_strided_slice %60 {offsets = [0, 0], sizes = [64, 16], strides = [1, 1]} : vector<64x64xbf16> to vector<64x16xbf16>
    %62 = vector.extract_strided_slice %60 {offsets = [0, 16], sizes = [64, 16], strides = [1, 1]} : vector<64x64xbf16> to vector<64x16xbf16>
    %63 = vector.extract_strided_slice %60 {offsets = [0, 32], sizes = [64, 16], strides = [1, 1]} : vector<64x64xbf16> to vector<64x16xbf16>
    %64 = vector.extract_strided_slice %60 {offsets = [0, 48], sizes = [64, 16], strides = [1, 1]} : vector<64x64xbf16> to vector<64x16xbf16>
    %65 = vector.shape_cast %61 : vector<64x16xbf16> to vector<1x64x16xbf16>
    %66 = vector.shape_cast %62 : vector<64x16xbf16> to vector<1x64x16xbf16>
    %67 = vector.shape_cast %63 : vector<64x16xbf16> to vector<1x64x16xbf16>
    %68 = vector.shape_cast %64 : vector<64x16xbf16> to vector<1x64x16xbf16>
    %69 = tpu.concatenate %65, %66, %67, %68 in 0 : vector<1x64x16xbf16>, vector<1x64x16xbf16>, vector<1x64x16xbf16>, vector<1x64x16xbf16> -> vector<4x64x16xbf16>
    %70 = vector.extract_strided_slice %49 {offsets = [0, 0], sizes = [64, 16], strides = [1, 1]} : vector<64x64xbf16> to vector<64x16xbf16>
    %71 = vector.extract_strided_slice %49 {offsets = [0, 16], sizes = [64, 16], strides = [1, 1]} : vector<64x64xbf16> to vector<64x16xbf16>
    %72 = vector.extract_strided_slice %49 {offsets = [0, 32], sizes = [64, 16], strides = [1, 1]} : vector<64x64xbf16> to vector<64x16xbf16>
    %73 = vector.extract_strided_slice %49 {offsets = [0, 48], sizes = [64, 16], strides = [1, 1]} : vector<64x64xbf16> to vector<64x16xbf16>
    %74 = vector.shape_cast %70 : vector<64x16xbf16> to vector<1x64x16xbf16>
    %75 = vector.shape_cast %71 : vector<64x16xbf16> to vector<1x64x16xbf16>
    %76 = vector.shape_cast %72 : vector<64x16xbf16> to vector<1x64x16xbf16>
    %77 = vector.shape_cast %73 : vector<64x16xbf16> to vector<1x64x16xbf16>
    %78 = tpu.concatenate %74, %75, %76, %77 in 0 : vector<1x64x16xbf16>, vector<1x64x16xbf16>, vector<1x64x16xbf16>, vector<1x64x16xbf16> -> vector<4x64x16xbf16>
    "tpu.trace_start"() <{level = 10 : i32, message = "hqc,hkc->hqk"}> : () -> ()
    %cst_21 = arith.constant dense<0.000000e+00> : vector<4x64x64xf32>
    %79 = tpu.matmul %59, %69, %cst_21 {dimension_numbers = #tpu.dot_dimension_numbers<[2], [2], [1], [1], [0, 0, 0, 1, 1, 1], [0], [0]>} : vector<4x64x16xbf16>, vector<4x64x16xbf16>, vector<4x64x64xf32> -> vector<4x64x64xf32>
    "tpu.trace_stop"() : () -> ()
    %c0_22 = arith.constant 0 : index
    %c0_23 = arith.constant 0 : index
    %80 = vector.load %arg9[%c0_22, %c0_23] : memref<64x64xf32, #tpu.memory_space<vmem>>, vector<64x64xf32>
    %81 = vector.shape_cast %80 : vector<64x64xf32> to vector<1x64x64xf32>
    %82 = vector.broadcast %81 : vector<1x64x64xf32> to vector<4x64x64xf32>
    %83 = arith.addf %79, %82 : vector<4x64x64xf32>
    %cst_24 = arith.constant dense<0xFF800000> : vector<4x64xf32>
    %84 = vector.multi_reduction <maximumf>, %83, %cst_24 [2] : vector<4x64x64xf32> to vector<4x64xf32>
    %85 = vector.shape_cast %84 : vector<4x64xf32> to vector<4x64x1xf32>
    %86 = vector.broadcast %85 : vector<4x64x1xf32> to vector<4x64x64xf32>
    %87 = arith.subf %83, %86 : vector<4x64x64xf32>
    %88 = math.exp %87 : vector<4x64x64xf32>
    %cst_25 = arith.constant dense<0.000000e+00> : vector<4x64xf32>
    %89 = vector.multi_reduction <add>, %88, %cst_25 [2] : vector<4x64x64xf32> to vector<4x64xf32>
    %90 = vector.shape_cast %89 : vector<4x64xf32> to vector<4x64x1xf32>
    %91 = arith.truncf %88 : vector<4x64x64xf32> to vector<4x64x64xbf16>
    "tpu.trace_start"() <{level = 10 : i32, message = "hqk,hkc->hqc"}> : () -> ()
    %cst_26 = arith.constant dense<0.000000e+00> : vector<4x64x16xf32>
    %92 = tpu.matmul %91, %78, %cst_26 {dimension_numbers = #tpu.dot_dimension_numbers<[2], [1], [1], [2], [0, 0, 0, 1, 1, 2], [0], [0]>} : vector<4x64x64xbf16>, vector<4x64x16xbf16>, vector<4x64x16xf32> -> vector<4x64x16xf32>
    "tpu.trace_stop"() : () -> ()
    %93 = tpu.reciprocal %90 {approx = true} : vector<4x64x1xf32> -> vector<4x64x1xf32>
    %94 = vector.broadcast %93 : vector<4x64x1xf32> to vector<4x64x16xf32>
    %95 = arith.mulf %92, %94 : vector<4x64x16xf32>
    %96 = vector.extract_strided_slice %95 {offsets = [0, 0, 0], sizes = [1, 64, 16], strides = [1, 1, 1]} : vector<4x64x16xf32> to vector<1x64x16xf32>
    %97 = vector.shape_cast %96 : vector<1x64x16xf32> to vector<64x16xf32>
    %98 = vector.extract_strided_slice %95 {offsets = [1, 0, 0], sizes = [1, 64, 16], strides = [1, 1, 1]} : vector<4x64x16xf32> to vector<1x64x16xf32>
    %99 = vector.shape_cast %98 : vector<1x64x16xf32> to vector<64x16xf32>
    %100 = vector.extract_strided_slice %95 {offsets = [2, 0, 0], sizes = [1, 64, 16], strides = [1, 1, 1]} : vector<4x64x16xf32> to vector<1x64x16xf32>
    %101 = vector.shape_cast %100 : vector<1x64x16xf32> to vector<64x16xf32>
    %102 = vector.extract_strided_slice %95 {offsets = [3, 0, 0], sizes = [1, 64, 16], strides = [1, 1, 1]} : vector<4x64x16xf32> to vector<1x64x16xf32>
    %103 = vector.shape_cast %102 : vector<1x64x16xf32> to vector<64x16xf32>
    %104 = tpu.concatenate %97, %99, %101, %103 in 1 : vector<64x16xf32>, vector<64x16xf32>, vector<64x16xf32>, vector<64x16xf32> -> vector<64x64xf32>
    %105 = arith.truncf %104 : vector<64x64xf32> to vector<64x64xbf16>
    %c0_27 = arith.constant 0 : index
    %c0_28 = arith.constant 0 : index
    %106 = vector.load %arg10[%c0_27, %c0_28] : memref<64x64xbf16, #tpu.memory_space<vmem>>, vector<64x64xbf16>
    %cst_29 = arith.constant dense<0.000000e+00> : vector<64x64xf32>
    %107 = tpu.matmul %105, %106, %cst_29 {dimension_numbers = #tpu.dot_dimension_numbers<[1], [0], [0], [1], [0, 0, 1, 1], [], []>} : vector<64x64xbf16>, vector<64x64xbf16>, vector<64x64xf32> -> vector<64x64xf32>
    %108 = arith.addf %1, %107 : vector<64x64xf32>
    %c0_30 = arith.constant 0 : index
    %c0_31 = arith.constant 0 : index
    %109 = vector.load %arg11[%c0_30, %c0_31] : memref<1x64xf32, #tpu.memory_space<vmem>>, vector<1x64xf32>
    %110 = vector.broadcast %109 : vector<1x64xf32> to vector<64x64xf32>
    %111 = arith.addf %108, %110 : vector<64x64xf32>
    %c0_32 = arith.constant 0 : index
    %c0_33 = arith.constant 0 : index
    %112 = vector.load %arg12[%c0_32, %c0_33] : memref<1x64xf32, #tpu.memory_space<vmem>>, vector<1x64xf32>
    %c0_34 = arith.constant 0 : index
    %c0_35 = arith.constant 0 : index
    %113 = vector.load %arg13[%c0_34, %c0_35] : memref<1x64xf32, #tpu.memory_space<vmem>>, vector<1x64xf32>
    %cst_36 = arith.constant dense<0.000000e+00> : vector<64xf32>
    %114 = vector.multi_reduction <add>, %111, %cst_36 [1] : vector<64x64xf32> to vector<64xf32>
    %115 = vector.shape_cast %114 : vector<64xf32> to vector<64x1xf32>
    %cst_37 = arith.constant 6.400000e+01 : f32
    %116 = vector.broadcast %cst_37 : f32 to vector<64x1xf32>
    %117 = arith.divf %115, %116 : vector<64x1xf32>
    %118 = vector.broadcast %117 : vector<64x1xf32> to vector<64x64xf32>
    %119 = arith.subf %111, %118 : vector<64x64xf32>
    %120 = arith.mulf %119, %119 : vector<64x64xf32>
    %cst_38 = arith.constant dense<0.000000e+00> : vector<64xf32>
    %121 = vector.multi_reduction <add>, %120, %cst_38 [1] : vector<64x64xf32> to vector<64xf32>
    %122 = vector.shape_cast %121 : vector<64xf32> to vector<64x1xf32>
    %cst_39 = arith.constant 6.400000e+01 : f32
    %123 = vector.broadcast %cst_39 : f32 to vector<64x1xf32>
    %124 = arith.divf %122, %123 : vector<64x1xf32>
    %125 = vector.broadcast %117 : vector<64x1xf32> to vector<64x64xf32>
    %126 = arith.subf %111, %125 : vector<64x64xf32>
    %cst_40 = arith.constant 9.99999974E-6 : f32
    %127 = vector.broadcast %cst_40 : f32 to vector<64x1xf32>
    %128 = arith.addf %124, %127 : vector<64x1xf32>
    %129 = math.rsqrt %128 : vector<64x1xf32>
    %130 = vector.broadcast %129 : vector<64x1xf32> to vector<64x64xf32>
    %131 = arith.mulf %126, %130 : vector<64x64xf32>
    %132 = vector.broadcast %112 : vector<1x64xf32> to vector<64x64xf32>
    %133 = arith.mulf %131, %132 : vector<64x64xf32>
    %134 = vector.broadcast %113 : vector<1x64xf32> to vector<64x64xf32>
    %135 = arith.addf %133, %134 : vector<64x64xf32>
    %136 = arith.truncf %135 : vector<64x64xf32> to vector<64x64xbf16>
    %c0_41 = arith.constant 0 : index
    %c0_42 = arith.constant 0 : index
    %137 = vector.load %arg14[%c0_41, %c0_42] : memref<64x256xbf16, #tpu.memory_space<vmem>>, vector<64x256xbf16>
    %cst_43 = arith.constant dense<0.000000e+00> : vector<64x256xf32>
    %138 = tpu.matmul %136, %137, %cst_43 {dimension_numbers = #tpu.dot_dimension_numbers<[1], [0], [0], [1], [0, 0, 1, 1], [], []>} : vector<64x64xbf16>, vector<64x256xbf16>, vector<64x256xf32> -> vector<64x256xf32>
    %139 = vector.extract_strided_slice %138 {offsets = [0, 0], sizes = [64, 128], strides = [1, 1]} : vector<64x256xf32> to vector<64x128xf32>
    %140 = vector.extract_strided_slice %138 {offsets = [0, 128], sizes = [64, 128], strides = [1, 1]} : vector<64x256xf32> to vector<64x128xf32>
    %141 = arith.negf %140 : vector<64x128xf32>
    %142 = math.exp %141 : vector<64x128xf32>
    %cst_44 = arith.constant 1.000000e+00 : f32
    %143 = vector.broadcast %cst_44 : f32 to vector<64x128xf32>
    %144 = arith.addf %143, %142 : vector<64x128xf32>
    %145 = arith.divf %143, %144 : vector<64x128xf32>
    %146 = arith.mulf %140, %145 : vector<64x128xf32>
    %147 = arith.mulf %139, %146 : vector<64x128xf32>
    %148 = arith.truncf %147 : vector<64x128xf32> to vector<64x128xbf16>
    %c0_45 = arith.constant 0 : index
    %c0_46 = arith.constant 0 : index
    %149 = vector.load %arg15[%c0_45, %c0_46] : memref<128x64xbf16, #tpu.memory_space<vmem>>, vector<128x64xbf16>
    %cst_47 = arith.constant dense<0.000000e+00> : vector<64x64xf32>
    %150 = tpu.matmul %148, %149, %cst_47 {dimension_numbers = #tpu.dot_dimension_numbers<[1], [0], [0], [1], [0, 0, 1, 1], [], []>} : vector<64x128xbf16>, vector<128x64xbf16>, vector<64x64xf32> -> vector<64x64xf32>
    %151 = arith.addf %111, %150 : vector<64x64xf32>
    %c0_48 = arith.constant 0 : index
    %c0_49 = arith.constant 0 : index
    %c0_50 = arith.constant 0 : index
    %152 = vector.load %arg16[%c0_48, %c0_49, %c0_50] : memref<1x64x64xf32, #tpu.memory_space<vmem>>, vector<1x64x64xf32>
    %153 = vector.shape_cast %152 : vector<1x64x64xf32> to vector<64x64xf32>
    %154 = vector.shape_cast %151 : vector<64x64xf32> to vector<1x64x64xf32>
    tpu.vector_store %arg16[%c0_48, %c0_49, %c0_50], %154 {strides = array<i32>} : memref<1x64x64xf32, #tpu.memory_space<vmem>>, vector<1x64x64xf32>,
    return
  }
  func.func @transform_0(%arg0: i32) -> (i32, i32, i32) {
    %c0_i32 = arith.constant 0 : i32
    %c0_i32_0 = arith.constant 0 : i32
    %c0_i32_1 = arith.constant 0 : i32
    return %arg0, %c0_i32, %c0_i32_0 : i32, i32, i32
  }
  func.func @transform_1(%arg0: i32) -> (i32, i32) {
    %c0_i32 = arith.constant 0 : i32
    %c0_i32_0 = arith.constant 0 : i32
    %c0_i32_1 = arith.constant 0 : i32
    return %c0_i32, %c0_i32_0 : i32, i32
  }
  func.func @transform_2(%arg0: i32) -> (i32, i32) {
    %c0_i32 = arith.constant 0 : i32
    %c0_i32_0 = arith.constant 0 : i32
    %c0_i32_1 = arith.constant 0 : i32
    return %c0_i32, %c0_i32_0 : i32, i32
  }
  func.func @transform_3(%arg0: i32) -> (i32, i32) {
    %c0_i32 = arith.constant 0 : i32
    %c0_i32_0 = arith.constant 0 : i32
    %c0_i32_1 = arith.constant 0 : i32
    return %c0_i32, %c0_i32_0 : i32, i32
  }
  func.func @transform_4(%arg0: i32) -> (i32, i32) {
    %c0_i32 = arith.constant 0 : i32
    %c0_i32_0 = arith.constant 0 : i32
    %c0_i32_1 = arith.constant 0 : i32
    return %c0_i32, %c0_i32_0 : i32, i32
  }
  func.func @transform_5(%arg0: i32) -> (i32, i32) {
    %c0_i32 = arith.constant 0 : i32
    %c0_i32_0 = arith.constant 0 : i32
    %c0_i32_1 = arith.constant 0 : i32
    return %c0_i32, %c0_i32_0 : i32, i32
  }
  func.func @transform_6(%arg0: i32) -> (i32, i32) {
    %c0_i32 = arith.constant 0 : i32
    %c0_i32_0 = arith.constant 0 : i32
    %c0_i32_1 = arith.constant 0 : i32
    return %c0_i32, %c0_i32_0 : i32, i32
  }
  func.func @transform_7(%arg0: i32) -> (i32, i32) {
    %c0_i32 = arith.constant 0 : i32
    %c0_i32_0 = arith.constant 0 : i32
    %c0_i32_1 = arith.constant 0 : i32
    return %c0_i32, %c0_i32_0 : i32, i32
  }
  func.func @transform_8(%arg0: i32) -> (i32, i32) {
    %c0_i32 = arith.constant 0 : i32
    %c0_i32_0 = arith.constant 0 : i32
    %c0_i32_1 = arith.constant 0 : i32
    return %c0_i32, %c0_i32_0 : i32, i32
  }
  func.func @transform_9(%arg0: i32) -> (i32, i32) {
    %c0_i32 = arith.constant 0 : i32
    %c0_i32_0 = arith.constant 0 : i32
    %c0_i32_1 = arith.constant 0 : i32
    return %c0_i32, %c0_i32_0 : i32, i32
  }
  func.func @transform_10(%arg0: i32) -> (i32, i32) {
    %c0_i32 = arith.constant 0 : i32
    %c0_i32_0 = arith.constant 0 : i32
    %c0_i32_1 = arith.constant 0 : i32
    return %c0_i32, %c0_i32_0 : i32, i32
  }
  func.func @transform_11(%arg0: i32) -> (i32, i32) {
    %c0_i32 = arith.constant 0 : i32
    %c0_i32_0 = arith.constant 0 : i32
    %c0_i32_1 = arith.constant 0 : i32
    return %c0_i32, %c0_i32_0 : i32, i32
  }
  func.func @transform_12(%arg0: i32) -> (i32, i32) {
    %c0_i32 = arith.constant 0 : i32
    %c0_i32_0 = arith.constant 0 : i32
    %c0_i32_1 = arith.constant 0 : i32
    return %c0_i32, %c0_i32_0 : i32, i32
  }
  func.func @transform_13(%arg0: i32) -> (i32, i32) {
    %c0_i32 = arith.constant 0 : i32
    %c0_i32_0 = arith.constant 0 : i32
    %c0_i32_1 = arith.constant 0 : i32
    return %c0_i32, %c0_i32_0 : i32, i32
  }
  func.func @transform_14(%arg0: i32) -> (i32, i32) {
    %c0_i32 = arith.constant 0 : i32
    %c0_i32_0 = arith.constant 0 : i32
    %c0_i32_1 = arith.constant 0 : i32
    return %c0_i32, %c0_i32_0 : i32, i32
  }
  func.func @transform_15(%arg0: i32) -> (i32, i32, i32) {
    %c0_i32 = arith.constant 0 : i32
    %c0_i32_0 = arith.constant 0 : i32
    %c0_i32_1 = arith.constant 0 : i32
    return %arg0, %c0_i32, %c0_i32_0 : i32, i32, i32
  }
}

</mosaic_0001>

<bundles_post_ra>
// kernel: tpu_custom_call.1
= control target key start
LH: loop header
LB: loop body
LE: loop exit
PB: predicated region body
PF: predicated region fallthrough
CT: control target
= control target key end

     0   :  { %s5277_s0 = inlined_call_operand.hbm [shape: f32[2,64,64], index: 0, kind: input, shape index: {}]   ;;  %s5278_s1 = inlined_call_operand.vmem [shape: f32[1,64], index: 1, kind: input, shape index: {}]   ;;  %s5279_s2 = inlined_call_operand.vmem [shape: f32[1,64], index: 2, kind: input, shape index: {}]   ;;  %s5280_s3 = inlined_call_operand.vmem [shape: bf16[64,192], index: 3, kind: input, shape index: {}]   ;;  %s5281_s4 = inlined_call_operand.vmem [shape: f32[1,192], index: 4, kind: input, shape index: {}]   ;;  %s5282_s5 = inlined_call_operand.hbm [shape: f32[64,128], index: 5, kind: input, shape index: {}]   ;;  %s5283_s6 = inlined_call_operand.hbm [shape: f32[64,128], index: 6, kind: input, shape index: {}]   ;;  %s5284_s7 = inlined_call_operand.hbm [shape: f32[64,128], index: 7, kind: input, shape index: {}]   ;;  %s5285_s8 = inlined_call_operand.hbm [shape: f32[64,64], index: 8, kind: input, shape index: {}]   ;;  %s5286_s9 = inlined_call_operand.vmem [shape: bf16[64,64], index: 9, kind: input, shape index: {}]   ;;  %s5287_s10 = inlined_call_operand.vmem [shape: f32[1,64], index: 10, kind: input, shape index: {}]   ;;  %s5288_s11 = inlined_call_operand.vmem [shape: f32[1,64], index: 11, kind: input, shape index: {}]   ;;  %s5289_s12 = inlined_call_operand.vmem [shape: f32[1,64], index: 12, kind: input, shape index: {}]   ;;  %s5290_s13 = inlined_call_operand.hbm [shape: bf16[64,256], index: 13, kind: input, shape index: {}]   ;;  %s5291_s14 = inlined_call_operand.vmem [shape: bf16[128,64], index: 14, kind: input, shape index: {}]   ;;  %s5292_s15 = inlined_call_operand.hbm [shape: f32[2,64,64], index: 15, kind: output, shape index: {}]  }
   0x1   :  { %5302 = sst [smem:[#allocation21_spill]] %s5282_s5 }
   0x2   :  { %5303 = sst [smem:[#allocation22_spill]] %s5283_s6 }
   0x3   :  { %5304 = sst [smem:[#allocation23_spill]] %s5284_s7 }
   0x4   :  { %5305 = sst [smem:[#allocation24_spill]] %s5285_s8 }
   0x5   :  { %5306 = sst [smem:[#allocation25_spill]] %s5290_s13 }
   0x6   :  { %5307 = sst [smem:[#allocation26_spill]] %s5291_s14 }
   0x7   :  { %5308 = sst [smem:[#allocation27_spill]] %s5292_s15 }
   0x8   :  { %20 = vsyncpa [#allocation3], 0 }
   0x9   :  { %22 = vsyncpa [#allocation3 + $0x1], 0 }
   0xa   :  { %23 = vsyncpa [#allocation6], 0 }
   0xb   :  { %24 = vsyncpa [#allocation9], 0 }
   0xc   :  { %25 = vsyncpa [#allocation12], 0 }
   0xd   :  { %26 = vsyncpa [#allocation4], 0 }
   0xe   :  { %28 = vsyncpa [#allocation4 + $0x1], 0  ;;  %s4149_s18 = smov 0   ;;  %s4151_s19 = smov 0  }
   0xf   :  { %s4153_s20 = smov 0   ;;  %s4155_s21 = smov 0  }
  0x10 LB: > { %5309 = sst [smem:[#allocation19_spill]] %s4042_s20  ;;  %s4048_s22 = smov [#allocation5]   ;;  %s4046_s21 = sphi %s4155_s21, %s5342_s21   ;;  %s4042_s20 = sphi %s4153_s20, %s5339_s20   ;;  %s4038_s19 = sphi %s4151_s19, %s5341_s19   ;;  %s4034_s18 = sphi %s4149_s18, %s5340_s18  }
  0x11   : > { %s409_s23 = sshll.u32 %s4048_s22, 4  ;;  %s4170_s24 = sadd.s32 4294967295, %s4046_s21   ;;  %s410_s23 = int_to_ptr.vmem [resolvable:$true] %s409_s23 }
  0x12   : > { %p3027_p0 = scmp.ge.s32.totalorder %s4046_s21, 1  ;;  %p5297_p1 = scmp.eq.s32.totalorder %s4170_s24, 0 }
  0x13   : > { %p385_p2 = scmp.lt.s32.totalorder %s4046_s21, 3  ;;  %s4049_s26 = smov [#allocation8]  }
  0x14   : > { %s435_s27 = sshll.u32 %s4049_s26, 4  ;;  %s4050_s29 = smov [#allocation7]   ;;  %s4188_s27 = int_to_ptr.vmem [resolvable:$true] %s435_s27 }
  0x15   : > { %p4175_p3 = pnand %p3027_p0, %p385_p2  ;;  %s422_s30 = sshll.u32 %s4050_s29, 4  ;;  %s4190_s30 = int_to_ptr.vmem [resolvable:$true] %s422_s30 }
  0x16   : > { %s3823_s17 = scalar_lea.vmem %s410_s23, 1024  ;;  %p3831_p11 = scmp.lt.s32.totalorder %s410_s23, %s410_s23 }
  0x17   : > { %s5310_s25 = scalar_select %p4175_p3, 1, 0 }
  0x18   : > { %p3429_p5 = pneg %p4175_p3  ;;  %p3824_p8 = scmp.ne.s32.totalorder %s410_s23, %s3823_s17 }
  0x19   : > { %p3832_p12 = scmp.lt.s32.totalorder %s3823_s17, %s3823_s17 }
  0x1a   : > { %p4184_p6 = pnand %p3429_p5, %p5297_p1 }
  0x1b   : > { %p3833_p13 = por %p3832_p12, %p3831_p11 }
  0x1c   : > { %p4194_p7 = pneg %p4184_p6 }
  0x1e   : > { %p3826_p9 = pnand %p3824_p8, %p4194_p7 }
  0x20   : > { %p3827_p10 = pneg %p3826_p9 }
  0x22   : > { %p3834_p0 = pnand %p3833_p13, %p3827_p10 }
  0x24   : > { %3837 = shalt.err (!%p3834_p0)
}
  0x25   : > { %s5295_s22 = smov 128   ;;  %s5296_s26 = smov 8  }
  0x26   : > { %s5313_s5 = sld [smem:[#allocation21_spill]]  ;;  %s3849_s14 = scalar_lea.vmem %s4188_s27, 1024 }
  0x27   : > { %p3850_p2 = scmp.ne.s32.totalorder %s4188_s27, %s3849_s14  ;;  %p3857_p9 = scmp.lt.s32.totalorder %s4188_s27, %s4188_s27 }
  0x28   : > { %p3858_p10 = scmp.lt.s32.totalorder %s3849_s14, %s3849_s14 }
  0x29   : > { %p3852_p5 = pnand %p3850_p2, %p4194_p7 }
  0x2a   : > { %p3859_p11 = por %p3858_p10, %p3857_p9 }
  0x2b   : > { %p3853_p8 = pneg %p3852_p5 }
  0x2c   : > { %3432 = dma.hbm_to_vmem [thread:$0]  (!%p4184_p6), %s5313_s5, 1024, %s410_s23, [#allocation6], %s5295_s22, %s5295_s22, %s5296_s26  }
  0x2d   : > { %p3860_p12 = pnand %p3859_p11, %p3853_p8 }
  0x2f   : > { %3863 = shalt.err (!%p3860_p12)
}
  0x30   : > { %s5314_s7 = sld [smem:[#allocation23_spill]]  ;;  %s3875_s23 = scalar_lea.vmem %s4190_s30, 1024 }
  0x31   : > { %p3876_p13 = scmp.ne.s32.totalorder %s4190_s30, %s3875_s23  ;;  %p3883_p5 = scmp.lt.s32.totalorder %s4190_s30, %s4190_s30 }
  0x32   : > { %p3884_p8 = scmp.lt.s32.totalorder %s3875_s23, %s3875_s23 }
  0x33   : > { %p3878_p0 = pnand %p3876_p13, %p4194_p7 }
  0x34   : > { %p3885_p9 = por %p3884_p8, %p3883_p5 }
  0x35   : > { %p3879_p2 = pneg %p3878_p0 }
  0x36   : > { %3438 = dma.hbm_to_vmem [thread:$0]  (!%p4184_p6), %s5314_s7, 1024, %s4188_s27, [#allocation9], %s5295_s22, %s5295_s22, %s5296_s26  }
  0x37   : > { %p3886_p10 = pnand %p3885_p9, %p3879_p2 }
  0x39   : > { %3889 = shalt.err (!%p3886_p10)
}
  0x3a   : > { %s5315_s6 = sld [smem:[#allocation22_spill]]  ;;  %s4053_s27 = smov [#allocation10]  }
  0x3b   : > { %s448_s17 = sshll.u32 %s4053_s27, 4  ;;  %s4054_s15 = smov [#allocation11]   ;;  %s449_s17 = int_to_ptr.vmem [resolvable:$true] %s448_s17 }
  0x3c   : > { %s473_s5 = sshll.u32 %s4054_s15, 4  ;;  %s3901_s23 = scalar_lea.vmem %s449_s17, 1024  ;;  %s474_s5 = int_to_ptr.vmem [resolvable:$true] %s473_s5 }
  0x3d   : > { %p3902_p11 = scmp.ne.s32.totalorder %s449_s17, %s3901_s23  ;;  %p3909_p0 = scmp.lt.s32.totalorder %s449_s17, %s449_s17 }
  0x3e   : > { %p3910_p2 = scmp.lt.s32.totalorder %s3901_s23, %s3901_s23 }
  0x3f   : > { %p3904_p12 = pnand %p3902_p11, %p4194_p7 }
  0x40   : > { %3435 = dma.hbm_to_vmem [thread:$0]  (!%p4184_p6), %s5315_s6, 1024, %s4190_s30, [#allocation6], %s5295_s22, %s5295_s22, %s5296_s26  }
  0x41   : > { %p3905_p13 = pneg %p3904_p12  ;;  %p3911_p5 = por %p3910_p2, %p3909_p0 }
  0x43   : > { %p3912_p8 = pnand %p3911_p5, %p3905_p13 }
  0x45   : > { %3915 = shalt.err (!%p3912_p8)
}
  0x46   : > { %s5316_s8 = sld [smem:[#allocation24_spill]]  ;;  %s3927_s29 = scalar_lea.vmem %s474_s5, 1024 }
  0x47   : > { %p3928_p9 = scmp.ne.s32.totalorder %s474_s5, %s3927_s29  ;;  %p3935_p12 = scmp.lt.s32.totalorder %s474_s5, %s474_s5 }
  0x48   : > { %p3936_p0 = scmp.lt.s32.totalorder %s3927_s29, %s3927_s29 }
  0x49   : > { %p3930_p10 = pnand %p3928_p9, %p4194_p7 }
  0x4a   : > { %p3937_p13 = por %p3936_p0, %p3935_p12 }
  0x4b   : > { %p3931_p11 = pneg %p3930_p10 }
  0x4c   : > { %3441 = dma.hbm_to_vmem [thread:$0]  (!%p4184_p6), %s5316_s8, 1024, %s449_s17, [#allocation9], %s5295_s22, %s5295_s22, %s5296_s26  }
  0x4d   : > { %p3938_p2 = pnand %p3937_p13, %p3931_p11 }
  0x4f   : > { %3941 = shalt.err (!%p3938_p2)
}
  0x50   : > { %s5317_s13 = sld [smem:[#allocation25_spill]]  ;;  %s3026_s28 = sadd.s32 4294967294, %s4046_s21  }
  0x51   : > { %s4260_s16 = sadd.s32 1, %s4046_s21   ;;  %s41_s17 = sadd.s32 1, %s4042_s20 }
  0x52   : > { %s38_s23 = ssub.s32 %s4046_s21, %s4260_s16  ;;  %p48_p7 = scmp.ne.s32.totalorder %s4042_s20, %s4038_s19 }
  0x53   : > { %p39_p5 = scmp.eq.s32.totalorder %s38_s23, 0  ;;  %p49_p8 = scmp.eq.s32.totalorder %s4046_s21, 0 }
  0x54   : > { %p54_p9 = scmp.ne.s32.totalorder %s4038_s19, %s4034_s18  ;;  %p372_p10 = scmp.eq.s32.totalorder %s4170_s24, 1 }
  0x55   : > { %s4272_s30 = scalar_select %p39_p5, %s4042_s20, %s41_s17  }
  0x56   : > { %3444 = dma.hbm_to_vmem [thread:$0]  (!%p4184_p6), %s5317_s13, 1024, %s474_s5, [#allocation12], %s5295_s22, %s5295_s22, %s5296_s26  }
  0x57   : > { %5318 = sst [smem:[#allocation20_spill]] %s4272_s30  ;;  %p50_p11 = por %p49_p8, %p48_p7 }
  0x58   : > { %p4276_p12 = por %p5297_p1, %p54_p9  ;;  %p4280_p6 = por %p372_p10, %p48_p7 }
  0x59   : > { %p378_p0 = scmp.eq.s32.totalorder %s3026_s28, 1  ;;  %p3458_p13 = scmp.lt.s32.totalorder %s4046_s21, 2 }
  0x5a   : > { %s5319_s14 = scalar_select %p4276_p12, 1, 0 }
  0x5b   : > { %s5320_s5 = scalar_select %p4280_p6, 1, 0 }
  0x5c   : > { %s490_s29 = sand.u32 1, %s4042_s20   ;;  %p4286_p2 = por %p378_p0, %p54_p9 }
  0x5d   : > { %s3034_s15 = sshll.u32 %s490_s29, 6  ;;  %s3135_s17 = sshll.u32 %s4046_s21, 10 }
  0x5e   : > { %s5321_s27 = scalar_select %p4286_p2, 1, 0 }
  0x5f   : > { %s4294_s26 = scalar_lea.hbm %s5277_s0, %s3135_s17  ;;  %s494_s6 = scalar_lea.vmem [#allocation2], %s3034_s15 }
  0x60   : > { %s501_s7 = sshll.u32 %s494_s6, 4  ;;  %p4296_p7 = pnand %p3458_p13, %p50_p11  ;;  %s4300_s7 = int_to_ptr.vmem [resolvable:$true] %s501_s7 }
  0x61   : > { %s4302_s8 = scalar_lea.sflag [#allocation3], %s490_s29  ;;  %s3942_s13 = scalar_lea.hbm %s4294_s26, 1024 }
  0x62   : > { %p3943_p5 = scmp.ne.s32.totalorder %s4294_s26, %s3942_s13  ;;  %p3944_p8 = pneg %p4296_p7 }
  0x63   : > { %s3947_s15 = scalar_lea.hbm %s5277_s0, 2048  ;;  %p3948_p11 = scmp.lt.s32.totalorder %s4294_s26, %s5277_s0 }
  0x64   : > { %p3945_p9 = pnand %p3944_p8, %p3943_p5  ;;  %p3949_p0 = scmp.lt.s32.totalorder %s3947_s15, %s3942_s13 }
  0x66   : > { %p3946_p10 = pneg %p3945_p9  ;;  %p3950_p13 = por %p3949_p0, %p3948_p11 }
  0x68   : > { %p3951_p4 = pnand %p3950_p13, %p3946_p10 }
  0x6a   : > { %3954 = shalt.err (!%p3951_p4)
}
  0x6b   : > { %s3955_s29 = scalar_lea.vmem %s4300_s7, 1024  ;;  %s4055_s30 = smov [#allocation2]  }
  0x6c   : > { %p3956_p1 = scmp.ne.s32.totalorder %s4300_s7, %s3955_s29  ;;  %s3960_s20 = sshll.u32 %s4055_s30, 4  ;;  %s3961_s20 = int_to_ptr.vmem [resolvable:$false] %s3960_s20 }
  0x6d   : > { %s3962_s22 = scalar_lea.vmem %s3961_s20, 2048  ;;  %p3963_p9 = scmp.lt.s32.totalorder %s4300_s7, %s3961_s20 }
  0x6e   : > { %p3958_p2 = pnand %p3956_p1, %p3944_p8  ;;  %p3964_p6 = scmp.lt.s32.totalorder %s3962_s22, %s3955_s29 }
  0x70   : > { %p3959_p5 = pneg %p3958_p2  ;;  %p3965_p12 = por %p3964_p6, %p3963_p9 }
  0x72   : > { %p3966_p3 = pnand %p3965_p12, %p3959_p5 }
  0x74   : > { %3969 = shalt.err (!%p3966_p3)
}
  0x75   : > { %s5323_s13 = smov 8   ;;  %s5324_s17 = smov 128  }
  0x76   : > { %3448 = dma.hbm_to_vmem [thread:$0]  (!%p4296_p7), %s4294_s26, 1024, %s4300_s7, %s4302_s8, %s5324_s17, %s5324_s17, %s5323_s13  }
  0x77   : > { %p5325_p1 = scmp.ne.s32.totalorder %s5310_s25, 0 }
  0x78   : > { %s4329_s30 = sand.u32 (!%p5325_p1), 1, %s4038_s19   ;;  %p5326_p3 = scmp.ne.s32.totalorder (!%p5325_p1), %s5319_s14, 0 }
  0x79   : > { %513 = sbr.rel (%p5325_p1) target bundleno = 2795 (0xaeb), region = 80  ;;  %s3038_s20 = sshll.u32 (!%p5325_p1), %s4329_s30, 6 }
  0x7a   : > { %s516_s15 = scalar_lea.sflag (!%p5325_p1), [#allocation3], %s4329_s30  ;;  %s4335_s28 = scalar_lea.vmem (!%p5325_p1), [#allocation2], %s3038_s20 }
  0x7e   : > { %4013 = dma.done.wait (%p5326_p3), %s516_s15, 1024  }
  0x7f   : > { %4015 = vsyncadd (%p5326_p3), %s516_s15, 4294966272  ;;  %p5327_p4 = scmp.eq.s32.totalorder %s4170_s24, 0 }
  0x81   : > { %4017 = dma.done.wait (%p5327_p4), [#allocation6], 2048   ;;  %p5328_p12 = pmov %p5327_p4 }
  0x82   : > { %p5329_p6 = pmov %p5327_p4 }
  0x83   : > { %4019 = vsyncadd (%p5328_p12), [#allocation6], 4294965248 }
  0x84   : > { %4021 = dma.done.wait (%p5329_p6), [#allocation9], 2048   ;;  %p5330_p2 = pmov %p5327_p4 }
  0x86   : > { %4023 = vsyncadd (%p5330_p2), [#allocation9], 4294965248  ;;  %p5331_p7 = pmov %p5330_p2 }
  0x87   : > { %p5332_p8 = pmov %p5330_p2 }
  0x88   : > { %4025 = dma.done.wait (%p5331_p7), [#allocation12], 1024  }
  0x89   : > { %4027 = vsyncadd (%p5332_p8), [#allocation12], 4294966272  ;;  %vm597_vm0 = vcmask 523264   ;;  %v587_v0 = vld [vmem:[%s4335_s28] sm:$0xff]  ;;  %v589_v1 = vld [vmem:[%s4335_s28 + $0x10] sm:$0xff]  ;;  %v4056_v63 = vmov 0  }
  0x8a   : > { %v588_v2 = vld [vmem:[%s4335_s28 + $0x8] sm:$0xff]  ;;  %v598_v3 = vsel %vm597_vm0, %v587_v0, 0.0  ;;  %v604_v4 = vsel %vm597_vm0, %v589_v1, 0.0  ;;  %v590_v5 = vld [vmem:[%s4335_s28 + $0x18] sm:$0xff]  ;;  %v591_v6 = vld [vmem:[%s4335_s28 + $0x20] sm:$0xff]  ;;  %839 = vmatprep.mubr.bf16.mxu0 %v4056_v63  ;;  %s4057_s17 = smov 124  }
  0x8b   : > { %599 = vadd.xlane.f32.xlu0 %v598_v3  ;;  %605 = vadd.xlane.f32.xlu1 %v604_v4  ;;  %v592_v7 = vld [vmem:[%s4335_s28 + $0x28] sm:$0xff]  ;;  %v601_v8 = vsel %vm597_vm0, %v588_v2, 0.0  ;;  %v607_v9 = vsel %vm597_vm0, %v590_v5, 0.0  ;;  %v610_v10 = vsel %vm597_vm0, %v591_v6, 0.0  ;;  %v593_v12 = vld [vmem:[%s4335_s28 + $0x30] sm:$0xff]  ;;  %v594_v13 = vld [vmem:[%s4335_s28 + $0x38] sm:$0xff] }
  0x8c   : > { %v613_v11 = vsel %vm597_vm0, %v592_v7, 0.0  ;;  %v616_v14 = vsel %vm597_vm0, %v593_v12, 0.0  ;;  %v619_v15 = vsel %vm597_vm0, %v594_v13, 0.0  ;;  %v3576_v56 = vld [vmem:[%s5280_s3 + $0x34] ss:$8 sps:$4 sm:$0xff]   ;;  %s4058_s15 = smov 4  }
  0x8d   : > { %v3578_v57 = vld [vmem:[%s5280_s3 + $0x30] ss:$8 sps:$4 sm:$0xff]   ;;  %815 = vmatprep.subr.bf16.mxu0 %v3576_v56  ;;  %v3579_v58 = vld [vmem:[%s5280_s3 + $0x24] ss:$8 sps:$4 sm:$0xff]   ;;  %v3581_v59 = vld [vmem:[%s5280_s3 + $0x20] ss:$8 sps:$4 sm:$0xff]  }
  0x8e   : > { %816 = vmatpush1.bf16.msra.mxu0 %v3578_v57  ;;  %v3582_v60 = vld [vmem:[%s5280_s3 + $0x14] ss:$8 sps:$4 sm:$0xff]   ;;  %v3584_v61 = vld [vmem:[%s5280_s3 + $0x10] ss:$8 sps:$4 sm:$0xff]   ;;  %v3585_v62 = vld [vmem:[%s5280_s3 + $0x4] ss:$8 sps:$4 sm:$0xff]  }
  0x8f   : > { %602 = vadd.xlane.f32.xlu0 %v601_v8  ;;  %608 = vadd.xlane.f32.xlu1 %v607_v9  ;;  %s4059_s7 = smov 112   ;;  %s4060_s8 = smov 96   ;;  %vm1092_vm1 = vcmask 130048   ;;  %vm2253_vm2 = vcmask 261120   ;;  %vm2262_vm3 = vcmask 392192  }
  0x90   : > { %817 = vmatprep.subr.bf16.mxu0 %v3579_v58  ;;  %s4061_s25 = smov 80   ;;  %s4062_s26 = smov 64  }
  0x91   : > { %s4063_s14 = smov 16   ;;  %p5335_p11 = scmp.ne.s32.totalorder %s5320_s5, 0 }
  0x92   : > { %818 = vmatpush1.bf16.msra.mxu0 %v3581_v59  ;;  %s4066_s29 = smov [#allocation13]  }
  0x93   : > { %611 = vadd.xlane.f32.xlu0 %v610_v10  ;;  %614 = vadd.xlane.f32.xlu1 %v613_v11  ;;  %s3974_s22 = sshll.u32 %s4066_s29, 4  ;;  %s3975_s22 = int_to_ptr.vmem [resolvable:$false] %s3974_s22 }
  0x94   : > { %819 = vmatprep.subr.bf16.mxu0 %v3582_v60  ;;  %s3976_s13 = scalar_lea.vmem %s3975_s22, 2048 }
  0x96   : > { %820 = vmatpush1.bf16.msra.mxu0 %v3584_v61 }
  0x97   : > { %617 = vadd.xlane.f32.xlu0 %v616_v14  ;;  %620 = vadd.xlane.f32.xlu1 %v619_v15 }
  0x98   : > { %821 = vmatprep.subr.bf16.mxu0 %v3585_v62 }
 0x114   : > { %v600_v16 = vpop.xlane.xlu0 %599  ;;  %v606_v17 = vpop.xlane.xlu1 %605 }
 0x115   : > { %v623_v18 = vmul.f32 0.015625, %v600_v16  ;;  %v625_v19 = vmul.f32 0.015625, %v606_v17 }
 0x117   : > { %v4369_v20 = vsub.f32 %v587_v0, %v623_v18  ;;  %v4371_v21 = vsub.f32 %v589_v1, %v625_v19  ;;  %v3587_v0 = vld [vmem:[%s5280_s3] ss:$8 sps:$4 sm:$0xff]  }
 0x118   : > { %v603_v22 = vpop.xlane.xlu0 %602  ;;  %v609_v23 = vpop.xlane.xlu1 %608  ;;  %822 = vmatpush1.bf16.msra.mxu0 %v3587_v0 }
 0x119   : > { %v624_v24 = vmul.f32 0.015625, %v603_v22  ;;  %v626_v25 = vmul.f32 0.015625, %v609_v23  ;;  %v639_v26 = vmul.f32 %v4369_v20, %v4369_v20  ;;  %v641_v27 = vmul.f32 %v4371_v21, %v4371_v21 }
 0x11b   : > { %v4377_v28 = vsub.f32 %v588_v2, %v624_v24  ;;  %v4379_v29 = vsub.f32 %v590_v5, %v626_v25  ;;  %v647_v30 = vsel %vm597_vm0, %v639_v26, 0.0  ;;  %v653_v33 = vsel %vm597_vm0, %v641_v27, 0.0  ;;  %v3045_v27 = vld [vmem:[%s5278_s1] ss:$0 sm:$0xff] }
 0x11c   : > { %648 = vadd.xlane.f32.xlu0 %v647_v30  ;;  %v612_v31 = vpop.xlane.xlu0 %611  ;;  %v615_v32 = vpop.xlane.xlu1 %614 }
 0x11d   : > { %v627_v34 = vmul.f32 0.015625, %v612_v31  ;;  %v628_v35 = vmul.f32 0.015625, %v615_v32  ;;  %v640_v36 = vmul.f32 %v4377_v28, %v4377_v28  ;;  %v642_v37 = vmul.f32 %v4379_v29, %v4379_v29 }
 0x11f   : > { %v4387_v38 = vsub.f32 %v591_v6, %v627_v34  ;;  %v4389_v39 = vsub.f32 %v592_v7, %v628_v35  ;;  %v650_v40 = vsel %vm597_vm0, %v640_v36, 0.0  ;;  %v656_v43 = vsel %vm597_vm0, %v642_v37, 0.0  ;;  %v3046_v36 = vld [vmem:[%s5279_s2] ss:$0 sm:$0xff] }
 0x120   : > { %654 = vadd.xlane.f32.xlu0 %v653_v33  ;;  %651 = vadd.xlane.f32.xlu1 %v650_v40  ;;  %v618_v41 = vpop.xlane.xlu0 %617  ;;  %v621_v42 = vpop.xlane.xlu1 %620 }
 0x121   : > { %v629_v44 = vmul.f32 0.015625, %v618_v41  ;;  %v630_v45 = vmul.f32 0.015625, %v621_v42  ;;  %v643_v46 = vmul.f32 %v4387_v38, %v4387_v38  ;;  %v644_v47 = vmul.f32 %v4389_v39, %v4389_v39 }
 0x123   : > { %v4397_v48 = vsub.f32 %v593_v12, %v629_v44  ;;  %v4399_v49 = vsub.f32 %v594_v13, %v630_v45  ;;  %v659_v50 = vsel %vm597_vm0, %v643_v46, 0.0  ;;  %v662_v51 = vsel %vm597_vm0, %v644_v47, 0.0 }
 0x124   : > { %657 = vadd.xlane.f32.xlu1 %v656_v43  ;;  %660 = vadd.xlane.f32.xlu0 %v659_v50 }
 0x125   : > { %v645_v52 = vmul.f32 %v4397_v48, %v4397_v48  ;;  %v646_v53 = vmul.f32 %v4399_v49, %v4399_v49 }
 0x127   : > { %v665_v54 = vsel %vm597_vm0, %v645_v52, 0.0  ;;  %v668_v55 = vsel %vm597_vm0, %v646_v53, 0.0 }
 0x128   : > { %663 = vadd.xlane.f32.xlu1 %v662_v51  ;;  %666 = vadd.xlane.f32.xlu0 %v665_v54 }
 0x12c   : > { %669 = vadd.xlane.f32.xlu1 %v668_v55 }
 0x1a5   : > { %v649_v1 = vpop.xlane.xlu0 %648 }
 0x1a6   : > { %v671_v2 = vmul.f32 0.015625, %v649_v1 }
 0x1a8   : > { %v679_v3 = vadd.f32 1e-05, %v671_v2  ;;  %v745_v2 = vlaneseq }
 0x1a9   : > { %v652_v4 = vpop.xlane.xlu1 %651  ;;  %v655_v5 = vpop.xlane.xlu0 %654 }
 0x1aa   : > { %3612 = vrsqrt.f32 %v679_v3  ;;  %v672_v6 = vmul.f32 0.015625, %v652_v4  ;;  %v673_v7 = vmul.f32 0.015625, %v655_v5  ;;  %v746_v3 = vshrl.u32 %v745_v2, 7  ;;  %v884_v2 = vld [vmem:[#allocation5 + $0x20] sm:$0xff] }
 0x1ac   : > { %v680_v8 = vadd.f32 1e-05, %v672_v6  ;;  %v681_v9 = vadd.f32 1e-05, %v673_v7  ;;  %v751_v4 = vsub.s32 1, %v746_v3 }
 0x1ad   : > { %v658_v10 = vpop.xlane.xlu1 %657  ;;  %v661_v11 = vpop.xlane.xlu0 %660 }
 0x1ae   : > { %3614 = vrsqrt.f32 %v680_v8  ;;  %v674_v12 = vmul.f32 0.015625, %v658_v10  ;;  %v675_v14 = vmul.f32 0.015625, %v661_v11 }
 0x1af   : > { %3616 = vrsqrt.f32 %v681_v9 }
 0x1b0   : > { %v682_v13 = vadd.f32 1e-05, %v674_v12  ;;  %v683_v17 = vadd.f32 1e-05, %v675_v14 }
 0x1b1   : > { %v664_v15 = vpop.xlane.xlu1 %663  ;;  %v667_v19 = vpop.xlane.xlu0 %666 }
 0x1b2   : > { %3618 = vrsqrt.f32 %v682_v13  ;;  %v676_v16 = vmul.f32 0.015625, %v664_v15  ;;  %v677_v25 = vmul.f32 0.015625, %v667_v19 }
 0x1b4   : > { %v684_v18 = vadd.f32 1e-05, %v676_v16  ;;  %v685_v32 = vadd.f32 1e-05, %v677_v25 }
 0x1b5   : > { %v670_v22 = vpop.xlane.xlu1 %669 }
 0x1b6   : > { %3620 = vrsqrt.f32 %v684_v18  ;;  %v678_v23 = vmul.f32 0.015625, %v670_v22 }
 0x1b7   : > { %v3613_v24 = vpop.eup %3612  ;;  %3622 = vrsqrt.f32 %v683_v17 }
 0x1b8   : > { %v695_v26 = vmul.f32 %v3613_v24, %v4369_v20  ;;  %v686_v30 = vadd.f32 1e-05, %v678_v23  ;;  %v747_v23 = vsub.s32 0, %v746_v3  ;;  %v885_v3 = vld [vmem:[#allocation5 + $0x28] sm:$0xff] }
 0x1ba   : > { %v709_v34 = vmul.f32 %v3045_v27, %v695_v26  ;;  %3624 = vrsqrt.f32 %v686_v30 }
 0x1bb   : > { %v3615_v31 = vpop.eup %3614  ;;  %3626 = vrsqrt.f32 %v685_v32 }
 0x1bc   : > { %v696_v33 = vmul.f32 %v3615_v31, %v4377_v28  ;;  %v3617_v35 = vpop.eup %3616  ;;  %v723_v20 = vadd.f32 %v3046_v36, %v709_v34 }
 0x1bd   : > { %v697_v42 = vmul.f32 %v3617_v35, %v4371_v21 }
 0x1be   : > { %v710_v37 = vmul.f32 %v3045_v27, %v696_v33 }
 0x1bf   : > { %v3619_v40 = vpop.eup %3618  ;;  %v711_v28 = vmul.f32 %v3045_v27, %v697_v42 }
 0x1c0   : > { %v724_v41 = vadd.f32 %v3046_v36, %v710_v37  ;;  %v698_v43 = vmul.f32 %v3619_v40, %v4379_v29 }
 0x1c1   : > { %v725_v52 = vadd.f32 %v3046_v36, %v711_v28  ;;  %v886_v28 = vld [vmem:[#allocation5 + $0x30] sm:$0xff] }
 0x1c2   : > { %v731_v44 = vpack.c.bf16 %v724_v41, %v723_v20  ;;  %v712_v45 = vmul.f32 %v3045_v27, %v698_v43 }
 0x1c3   : > { %v3621_v46 = vpop.eup %3620 }
 0x1c4   : > { %3055 = vmatmul.mubr.msk.bf16.vlgmr.msra.gmra.mxu0 %vm597_vm0, %v731_v44  ;;  %v3623_v47 = vpop.eup %3622  ;;  %v726_v50 = vadd.f32 %v3046_v36, %v712_v45  ;;  %v700_v51 = vmul.f32 %v3621_v46, %v4389_v39  ;;  %v934_v45 = vld [vmem:[#allocation7 + $0x30] sm:$0xff] }
 0x1c5   : > { %849 = vmatprep.mubr.bf16.mxu0 %v4056_v63  ;;  %v699_v53 = vmul.f32 %v3623_v47, %v4387_v38  ;;  %v935_v47 = vld [vmem:[#allocation7 + $0x38] sm:$0xff] }
 0x1c6   : > { %v732_v54 = vpack.c.bf16 %v726_v50, %v725_v52  ;;  %v714_v55 = vmul.f32 %v3045_v27, %v700_v51  ;;  %v887_v51 = vld [vmem:[#allocation5 + $0x38] sm:$0xff] }
 0x1c7   : > { %v3625_v21 = vpop.eup %3624  ;;  %v713_v29 = vmul.f32 %v3045_v27, %v699_v53 }
 0x1c8   : > { %v3627_v56 = vpop.eup %3626  ;;  %v728_v57 = vadd.f32 %v3046_v36, %v714_v55  ;;  %v702_v58 = vmul.f32 %v3625_v21, %v4399_v49  ;;  %v982_v21 = vld [vmem:[#allocation8 + $0x30] sm:$0xff] }
 0x1c9   : > { %v727_v59 = vadd.f32 %v3046_v36, %v713_v29  ;;  %v701_v60 = vmul.f32 %v3627_v56, %v4397_v48  ;;  %v743_v48 = vld [vmem:[%s5281_s4] sm:$0x3]  ;;  %v983_v56 = vld [vmem:[#allocation8 + $0x38] sm:$0xff] }
 0x1ca   : > { %v716_v39 = vmul.f32 %v3045_v27, %v702_v58  ;;  %v4458_v6 = vrot.slane %v743_v48, %v751_v4  ;;  %v748_v26 = vrot.slane %v743_v48, %v747_v23  ;;  %v980_v4 = vld [vmem:[#allocation8 + $0x20] sm:$0xff]  ;;  %v931_v23 = vld [vmem:[#allocation7 + $0x18] sm:$0xff] }
 0x1cb   : > { %v733_v61 = vpack.c.bf16 %v728_v57, %v727_v59  ;;  %v715_v38 = vmul.f32 %v3045_v27, %v701_v60 }
 0x1cc   : > { %3056 = vmatmul.mubr.msk.bf16.gmra.mxu0 %vm597_vm0, %v732_v54  ;;  %v730_v62 = vadd.f32 %v3046_v36, %v716_v39 }
 0x1cd   : > { %859 = vmatprep.mubr.bf16.mxu0 %v4056_v63  ;;  %v729_v0 = vadd.f32 %v3046_v36, %v715_v38  ;;  %v932_v38 = vld [vmem:[#allocation7 + $0x20] sm:$0xff] }
 0x1cf   : > { %v734_v1 = vpack.c.bf16 %v730_v62, %v729_v0  ;;  %v933_v62 = vld [vmem:[#allocation7 + $0x28] sm:$0xff] }
 0x1d4   : > { %3057 = vmatmul.mubr.msk.bf16.gmra.mxu0 %vm597_vm0, %v733_v61 }
 0x1d5   : > { %869 = vmatprep.mubr.bf16.mxu0 %v4056_v63 }
 0x1dc   : > { %3058 = vmatmul.mubr.msk.bf16.gmra.mxu0 %vm597_vm0, %v734_v1 }
 0x284   : > { %v841_v5 = vpop.f32.mrf.mxu0 }
 0x285   : > { %v4478_v41 = vadd.f32 %v841_v5, %v748_v26 }
 0x286   : > { %v843_v49 = vpop.f32.mrf.mxu0 }
 0x287   : > { %v844_v9 = vadd.f32 %v843_v49, %v4458_v6 }
 0x288   : > { %v845_v7 = vpop.f32.mrf.mxu0 }
 0x289   : > { %v4486_v43 = vadd.f32 %v845_v7, %v748_v26 }
 0x28a   : > { %v847_v8 = vpop.f32.mrf.mxu0 }
 0x28b   : > { %v848_v10 = vadd.f32 %v847_v8, %v4458_v6 }
 0x28c   : > { %v851_v11 = vpop.f32.mrf.mxu0 }
 0x28d   : > { %v4462_v12 = vpack.c.bf16 %v848_v10, %v844_v9  ;;  %v4474_v40 = vadd.f32 %v851_v11, %v748_v26  ;;  %v981_v9 = vld [vmem:[#allocation8 + $0x28] sm:$0xff] }
 0x28e   : > { %v853_v13 = vpop.f32.mrf.mxu0 }
 0x28f   : > { %v854_v16 = vadd.f32 %v853_v13, %v4458_v6 }
 0x290   : > { %v855_v14 = vpop.f32.mrf.mxu0 }
 0x291   : > { %v4480_v42 = vadd.f32 %v855_v14, %v748_v26 }
 0x292   : > { %v857_v15 = vpop.f32.mrf.mxu0 }
 0x293   : > { %v858_v17 = vadd.f32 %v857_v15, %v4458_v6 }
 0x294   : > { %v861_v18 = vpop.f32.mrf.mxu0 }
 0x295   : > { %v4466_v19 = vpack.c.bf16 %v858_v17, %v854_v16  ;;  %v862_v36 = vadd.f32 %v861_v18, %v748_v26 }
 0x296   : > { %v863_v22 = vpop.f32.mrf.mxu0 }
 0x297   : > { %v864_v27 = vadd.f32 %v863_v22, %v4458_v6  ;;  %v892_v10 = vmul.f32 %v884_v2, %v862_v36  ;;  %v930_v22 = vld [vmem:[#allocation7 + $0x10] sm:$0xff] }
 0x298   : > { %v865_v24 = vpop.f32.mrf.mxu0 }
 0x299   : > { %v866_v20 = vadd.f32 %v865_v24, %v748_v26 }
 0x29a   : > { %v867_v25 = vpop.f32.mrf.mxu0 }
 0x29b   : > { %v868_v30 = vadd.f32 %v867_v25, %v4458_v6  ;;  %v893_v11 = vmul.f32 %v885_v3, %v866_v20 }
 0x29c   : > { %v871_v31 = vpop.f32.mrf.mxu0 }
 0x29d   : > { %v4470_v32 = vpack.c.bf16 %v868_v30, %v864_v27  ;;  %v872_v33 = vadd.f32 %v871_v31, %v748_v26  ;;  %v883_v27 = vld [vmem:[#allocation5 + $0x18] sm:$0xff]  ;;  %v978_v30 = vld [vmem:[#allocation8 + $0x10] sm:$0xff] }
 0x29e   : > { %v4472_v34 = vpop.f32.mrf.mxu0 }
 0x29f   : > { %964 = vrot.lane.b32.xlu1 %v872_v33, %s4057_s17  ;;  %916 = vrot.lane.b32.xlu0 %v872_v33, %s4058_s15  ;;  %v894_v54 = vmul.f32 %v886_v28, %v872_v33 }
 0x2a0   : > { %v875_v35 = vpop.f32.mrf.mxu0 }
 0x2a1   : > { %v876_v37 = vadd.f32 %v875_v35, %v748_v26  ;;  %v882_v26 = vld [vmem:[#allocation5 + $0x10] sm:$0xff] }
 0x2a3   : > { %918 = vrot.lane.b32.xlu1 %v876_v37, %s4058_s15  ;;  %912 = vrot.lane.b32.xlu0 %v862_v36, %s4058_s15  ;;  %v895_v29 = vmul.f32 %v887_v51, %v876_v37 }
 0x2a7   : > { %966 = vrot.lane.b32.xlu1 %v876_v37, %s4057_s17  ;;  %960 = vrot.lane.b32.xlu0 %v862_v36, %s4057_s17 }
 0x2ab   : > { %914 = vrot.lane.b32.xlu1 %v866_v20, %s4058_s15  ;;  %908 = vrot.lane.b32.xlu0 %v4474_v40, %s4058_s15 }
 0x2af   : > { %962 = vrot.lane.b32.xlu1 %v866_v20, %s4057_s17  ;;  %956 = vrot.lane.b32.xlu0 %v4474_v40, %s4057_s17  ;;  %v979_v20 = vld [vmem:[#allocation8 + $0x18] sm:$0xff] }
 0x2b3   : > { %910 = vrot.lane.b32.xlu1 %v4480_v42, %s4058_s15  ;;  %904 = vrot.lane.b32.xlu0 %v4478_v41, %s4058_s15 }
 0x2b7   : > { %958 = vrot.lane.b32.xlu1 %v4480_v42, %s4057_s17  ;;  %952 = vrot.lane.b32.xlu0 %v4478_v41, %s4057_s17 }
 0x2bb   : > { %906 = vrot.lane.b32.xlu1 %v4486_v43, %s4058_s15  ;;  %s4064_s15 = smov 32  }
 0x2bf   : > { %954 = vrot.lane.b32.xlu1 %v4486_v43, %s4057_s17  ;;  %s5333_s17 = sld [smem:[#allocation26_spill]] }
 0x311   : > { %v965_v44 = vpop.permute.xlu1 %964  ;;  %v917_v46 = vpop.permute.xlu0 %916 }
 0x312   : > { %v942_v50 = vmul.f32 %v934_v45, %v917_v46  ;;  %v990_v60 = vmul.f32 %v982_v21, %v965_v44  ;;  %v890_v44 = vmul.f32 %v882_v26, %v4474_v40  ;;  %v891_v45 = vmul.f32 %v883_v27, %v4480_v42  ;;  %v880_v21 = vld [vmem:[#allocation5] sm:$0xff] }
 0x314   : > { %v950_v57 = vadd.f32 %v942_v50, %v894_v54 }
 0x315   : > { %v919_v52 = vpop.permute.xlu1 %918  ;;  %v913_v53 = vpop.permute.xlu0 %912 }
 0x316   : > { %v943_v55 = vmul.f32 %v935_v47, %v919_v52  ;;  %v998_v0 = vadd.f32 %v990_v60, %v950_v57  ;;  %v940_v49 = vmul.f32 %v932_v38, %v913_v53  ;;  %v928_v52 = vld [vmem:[#allocation7] sm:$0xff]  ;;  %v929_v53 = vld [vmem:[#allocation7 + $0x8] sm:$0xff] }
 0x317   : > { %v977_v60 = vld [vmem:[#allocation8 + $0x8] sm:$0xff] }
 0x318   : > { %v951_v61 = vadd.f32 %v943_v55, %v895_v29  ;;  %v948_v16 = vadd.f32 %v940_v49, %v892_v10  ;;  %v976_v29 = vld [vmem:[#allocation8] sm:$0xff] }
 0x319   : > { %v967_v58 = vpop.permute.xlu1 %966  ;;  %v961_v59 = vpop.permute.xlu0 %960 }
 0x31a   : > { %v991_v39 = vmul.f32 %v983_v56, %v967_v58  ;;  %v988_v13 = vmul.f32 %v980_v4, %v961_v59  ;;  %v881_v56 = vld [vmem:[#allocation5 + $0x8] sm:$0xff] }
 0x31c   : > { %v999_v1 = vadd.f32 %v991_v39, %v951_v61  ;;  %v996_v24 = vadd.f32 %v988_v13, %v948_v16  ;;  %v888_v61 = vmul.f32 %v880_v21, %v4478_v41  ;;  %v889_v39 = vmul.f32 %v881_v56, %v4486_v43 }
 0x31d   : > { %v915_v5 = vpop.permute.xlu1 %914  ;;  %v909_v48 = vpop.permute.xlu0 %908 }
 0x31e   : > { %v4490_v7 = vpack.c.bf16 %v999_v1, %v998_v0  ;;  %v941_v8 = vmul.f32 %v933_v62, %v915_v5  ;;  %v938_v33 = vmul.f32 %v930_v22, %v909_v48 }
 0x320   : > { %1018 = vrot.lane.b32.xlu0 %v4490_v7, %s4059_s7  ;;  %v949_v17 = vadd.f32 %v941_v8, %v893_v11  ;;  %v946_v47 = vadd.f32 %v938_v33, %v890_v44  ;;  %v877_v11 = vpop.f32.mrf.mxu0 }
 0x321   : > { %v963_v14 = vpop.permute.xlu1 %962  ;;  %v957_v15 = vpop.permute.xlu0 %956 }
 0x322   : > { %v989_v18 = vmul.f32 %v981_v9, %v963_v14  ;;  %v986_v46 = vmul.f32 %v978_v30, %v957_v15  ;;  %v878_v14 = vadd.f32 %v877_v11, %v4458_v6 }
 0x324   : > { %v997_v25 = vadd.f32 %v989_v18, %v949_v17  ;;  %v994_v54 = vadd.f32 %v986_v46, %v946_v47  ;;  %v874_v17 = vadd.f32 %v4472_v34, %v4458_v6 }
 0x325   : > { %v911_v31 = vpop.permute.xlu1 %910  ;;  %v905_v37 = vpop.permute.xlu0 %904 }
 0x326   : > { %v4494_v35 = vpack.c.bf16 %v997_v25, %v996_v24  ;;  %v939_v36 = vmul.f32 %v931_v23, %v911_v31  ;;  %v936_v40 = vmul.f32 %v928_v52, %v905_v37  ;;  %v4567_v18 = vpack.c.bf16 %v878_v14, %v874_v17 }
 0x328   : > { %1016 = vrot.lane.b32.xlu1 %v4494_v35, %s4059_s7  ;;  %v947_v50 = vadd.f32 %v939_v36, %v891_v45  ;;  %v944_v0 = vadd.f32 %v936_v40, %v888_v61 }
 0x329   : > { %v959_v28 = vpop.permute.xlu1 %958  ;;  %v953_v57 = vpop.permute.xlu0 %952 }
 0x32a   : > { %v987_v51 = vmul.f32 %v979_v20, %v959_v28  ;;  %v984_v38 = vmul.f32 %v976_v29, %v953_v57 }
 0x32c   : > { %v995_v55 = vadd.f32 %v987_v51, %v947_v50  ;;  %v992_v3 = vadd.f32 %v984_v38, %v944_v0  ;;  %v4670_v38 = vld [vmem:[#allocation10 + $0x10] sm:$0xff]  ;;  %v4672_v0 = vld [vmem:[#allocation10] sm:$0xff] }
 0x32d   : > { %v907_v58 = vpop.permute.xlu1 %906 }
 0x32e   : > { %v4500_v59 = vpack.c.bf16 %v995_v55, %v994_v54  ;;  %v937_v42 = vmul.f32 %v929_v53, %v907_v58 }
 0x330   : > { %1014 = vrot.lane.b32.xlu0 %v4500_v59, %s4059_s7  ;;  %v945_v1 = vadd.f32 %v937_v42, %v889_v39 }
 0x331   : > { %v955_v62 = vpop.permute.xlu1 %954 }
 0x332   : > { %v985_v2 = vmul.f32 %v977_v60, %v955_v62 }
 0x334   : > { %v993_v4 = vadd.f32 %v985_v2, %v945_v1  ;;  %1026 = vrot.lane.b32.xlu0 %v4490_v7, %s4060_s8 }
 0x336   : > { %v1000_v5 = vpack.c.bf16 %v993_v4, %v992_v3 }
 0x338   : > { %1012 = vrot.lane.b32.xlu1 %v1000_v5, %s4059_s7  ;;  %3229 = vmatprep.mubr.msk.bf16.mxu1 %vm1092_vm1, %v1000_v5 }
 0x339   : > { %1024 = vrot.lane.b32.xlu0 %v4494_v35, %s4060_s8 }
 0x33c   : > { %1034 = vrot.lane.b32.xlu1 %v4490_v7, %s4061_s25 }
 0x33d   : > { %1022 = vrot.lane.b32.xlu0 %v4500_v59, %s4060_s8 }
 0x340   : > { %1032 = vrot.lane.b32.xlu1 %v4494_v35, %s4061_s25 }
 0x341   : > { %1020 = vrot.lane.b32.xlu0 %v1000_v5, %s4060_s8 }
 0x344   : > { %1030 = vrot.lane.b32.xlu1 %v4500_v59, %s4061_s25 }
 0x345   : > { %1090 = vrot.lane.b32.xlu0 %v4490_v7, %s4062_s26 }
 0x348   : > { %1028 = vrot.lane.b32.xlu1 %v1000_v5, %s4061_s25 }
 0x349   : > { %1088 = vrot.lane.b32.xlu0 %v4494_v35, %s4062_s26 }
 0x34d   : > { %1086 = vrot.lane.b32.xlu0 %v4500_v59, %s4062_s26 }
 0x351   : > { %1084 = vrot.lane.b32.xlu0 %v1000_v5, %s4062_s26  ;;  %v4682_v5 = vld [vmem:[#allocation10 + $0x18] sm:$0xff] }
 0x392   : > { %v4529_v41 = vpop.permute.xlu0 %1018 }
 0x393   : > { %1188 = vrot.lane.b32.xlu1 %v4529_v41, %s4062_s26 }
 0x39a   : > { %v4533_v43 = vpop.permute.xlu1 %1016 }
 0x39b   : > { %1186 = vrot.lane.b32.xlu1 %v4533_v43, %s4062_s26 }
 0x3a2   : > { %v4537_v48 = vpop.permute.xlu0 %1014 }
 0x3a3   : > { %1184 = vrot.lane.b32.xlu1 %v4537_v48, %s4062_s26 }
 0x3a6   : > { %v4541_v49 = vpop.permute.xlu0 %1026 }
 0x3a7   : > { %1285 = vrot.lane.b32.xlu0 %v4541_v49, %s4062_s26 }
 0x3aa   : > { %v1013_v8 = vpop.permute.xlu1 %1012 }
 0x3ab   : > { %v4545_v9 = vpop.permute.xlu0 %1024  ;;  %3245 = vmatprep.mubr.msk.bf16.mxu0 %vm1092_vm1, %v1013_v8  ;;  %1182 = vrot.lane.b32.xlu1 %v1013_v8, %s4062_s26 }
 0x3ac   : > { %1283 = vrot.lane.b32.xlu0 %v4545_v9, %s4062_s26 }
 0x3ae   : > { %v4551_v10 = vpop.permute.xlu1 %1034 }
 0x3af   : > { %v4553_v13 = vpop.permute.xlu0 %1022  ;;  %1382 = vrot.lane.b32.xlu1 %v4551_v10, %s4062_s26 }
 0x3b0   : > { %1281 = vrot.lane.b32.xlu0 %v4553_v13, %s4062_s26 }
 0x3b2   : > { %v4560_v15 = vpop.permute.xlu1 %1032 }
 0x3b3   : > { %v1021_v16 = vpop.permute.xlu0 %1020  ;;  %1380 = vrot.lane.b32.xlu1 %v4560_v15, %s4062_s26 }
 0x3b4   : > { %1279 = vrot.lane.b32.xlu0 %v1021_v16, %s4062_s26 }
 0x3b6   : > { %v4569_v22 = vpop.permute.xlu1 %1030 }
 0x3b7   : > { %v1091_v23 = vpop.permute.xlu0 %1090  ;;  %1378 = vrot.lane.b32.xlu1 %v4569_v22, %s4062_s26 }
 0x3b8   : > { %1046 = vrot.lane.b32.xlu0 %v4567_v18, %s4059_s7  ;;  %3389 = vmatprep.subr.msk.bf16.mxu1 %vm1092_vm1, %v1091_v23  ;;  %v1115_v24 = vsel %vm1092_vm1, %v1091_v23, 0  ;;  %v4707_v23 = vld [vmem:[#allocation10 + $0x28] sm:$0xff] }
 0x3b9   : > { %3222 = vmatpush3.bf16.xpose.msra.mxu1 %v1115_v24 }
 0x3ba   : > { %v4577_v25 = vpop.permute.xlu1 %1028 }
 0x3bb   : > { %v1089_v6 = vpop.permute.xlu0 %1088  ;;  %1376 = vrot.lane.b32.xlu1 %v4577_v25, %s4062_s26 }
 0x3bc   : > { %1042 = vrot.lane.b32.xlu0 %v4466_v19, %s4059_s7  ;;  %3390 = vmatprep.subr.msk.bf16.mxu1 %vm1092_vm1, %v1089_v6  ;;  %v1112_v34 = vsel %vm1092_vm1, %v1089_v6, 0 }
 0x3bf   : > { %1044 = vrot.lane.b32.xlu1 %v4470_v32, %s4059_s7  ;;  %v1087_v26 = vpop.permute.xlu0 %1086 }
 0x3c0   : > { %1058 = vrot.lane.b32.xlu0 %v4567_v18, %s4060_s8  ;;  %v1109_v27 = vsel %vm1092_vm1, %v1087_v26, 0 }
 0x3c1   : > { %3224 = vmatpush3.bf16.xpose.msra.mxu1 %v1112_v34 }
 0x3c2   : > { %3391 = vmatprep.subr.msk.bf16.mxu1 %vm1092_vm1, %v1087_v26 }
 0x3c3   : > { %1040 = vrot.lane.b32.xlu1 %v4462_v12, %s4059_s7  ;;  %v1085_v30 = vpop.permute.xlu0 %1084 }
 0x3c4   : > { %1070 = vrot.lane.b32.xlu0 %v4567_v18, %s4061_s25  ;;  %v1106_v31 = vsel %vm1092_vm1, %v1085_v30, 0 }
 0x3c7   : > { %1056 = vrot.lane.b32.xlu1 %v4470_v32, %s4060_s8 }
 0x3c9   : > { %3226 = vmatpush3.bf16.xpose.msra.mxu1 %v1109_v27 }
 0x3ca   : > { %3392 = vmatprep.subr.msk.bf16.mxu1 %vm1092_vm1, %v1085_v30 }
 0x3cb   : > { %1068 = vrot.lane.b32.xlu1 %v4470_v32, %s4061_s25 }
 0x3cf   : > { %1054 = vrot.lane.b32.xlu1 %v4466_v19, %s4060_s8 }
 0x3d1   : > { %3228 = vmatpush3.bf16.xpose.msra.mxu1 %v1106_v31 }
 0x3d3   : > { %1066 = vrot.lane.b32.xlu1 %v4466_v19, %s4061_s25 }
 0x3d8   : > { %3230 = vmatmul.mubr.msk.bf16.vlgmr.msra.gmra.mxu1 %vm1092_vm1, %v4500_v59 }
 0x3d9   : > { %3233 = vmatprep.mubr.msk.bf16.mxu1 %vm1092_vm1, %v4494_v35 }
 0x3e0   : > { %3234 = vmatmul.mubr.msk.bf16.gmra.mxu1 %vm1092_vm1, %v4490_v7 }
 0x3e1   : > { %3261 = vmatprep.mubr.msk.bf16.mxu1 %vm1092_vm1, %v1021_v16 }
 0x405   : > { %v1189_v33 = vpop.permute.xlu1 %1188 }
 0x406   : > { %3393 = vmatprep.subr.msk.bf16.mxu0 %vm1092_vm1, %v1189_v33  ;;  %v1212_v36 = vsel %vm1092_vm1, %v1189_v33, 0 }
 0x407   : > { %3238 = vmatpush3.bf16.xpose.msra.mxu0 %v1212_v36 }
 0x40d   : > { %v1187_v37 = vpop.permute.xlu1 %1186 }
 0x40e   : > { %3394 = vmatprep.subr.msk.bf16.mxu0 %vm1092_vm1, %v1187_v37  ;;  %v1209_v20 = vsel %vm1092_vm1, %v1187_v37, 0 }
 0x40f   : > { %3240 = vmatpush3.bf16.xpose.msra.mxu0 %v1209_v20 }
 0x415   : > { %v1185_v44 = vpop.permute.xlu1 %1184 }
 0x416   : > { %3395 = vmatprep.subr.msk.bf16.mxu0 %vm1092_vm1, %v1185_v44  ;;  %v1206_v35 = vsel %vm1092_vm1, %v1185_v44, 0 }
 0x417   : > { %3242 = vmatpush3.bf16.xpose.msra.mxu0 %v1206_v35 }
 0x419   : > { %v1286_v7 = vpop.permute.xlu0 %1285 }
 0x41a   : > { %3397 = vmatprep.subr.msk.bf16.mxu1 %vm1092_vm1, %v1286_v7  ;;  %v1309_v45 = vsel %vm1092_vm1, %v1286_v7, 0 }
 0x41b   : > { %3254 = vmatpush3.bf16.xpose.msra.mxu1 %v1309_v45 }
 0x41d   : > { %v1183_v46 = vpop.permute.xlu1 %1182 }
 0x41e   : > { %v1284_v28 = vpop.permute.xlu0 %1283  ;;  %3396 = vmatprep.subr.msk.bf16.mxu0 %vm1092_vm1, %v1183_v46  ;;  %v1203_v47 = vsel %vm1092_vm1, %v1183_v46, 0 }
 0x41f   : > { %3398 = vmatprep.subr.msk.bf16.mxu1 %vm1092_vm1, %v1284_v28  ;;  %3244 = vmatpush3.bf16.xpose.msra.mxu0 %v1203_v47  ;;  %v1306_v51 = vsel %vm1092_vm1, %v1284_v28, 0 }
 0x421   : > { %v1383_v50 = vpop.permute.xlu1 %1382 }
 0x422   : > { %3401 = vmatprep.subr.msk.bf16.mxu0 %vm1092_vm1, %v1383_v50  ;;  %v1282_v52 = vpop.permute.xlu0 %1281  ;;  %v1406_v53 = vsel %vm1092_vm1, %v1383_v50, 0 }
 0x423   : > { %3256 = vmatpush3.bf16.xpose.msra.mxu1 %v1306_v51  ;;  %v1303_v55 = vsel %vm1092_vm1, %v1282_v52, 0 }
 0x424   : > { %3399 = vmatprep.subr.msk.bf16.mxu1 %vm1092_vm1, %v1282_v52 }
 0x425   : > { %v1381_v54 = vpop.permute.xlu1 %1380 }
 0x426   : > { %3246 = vmatmul.mubr.msk.bf16.vlgmr.msra.gmra.mxu0 %vm1092_vm1, %v4537_v48  ;;  %v1280_v21 = vpop.permute.xlu0 %1279  ;;  %v1403_v56 = vsel %vm1092_vm1, %v1381_v54, 0 }
 0x427   : > { %3249 = vmatprep.mubr.msk.bf16.mxu0 %vm1092_vm1, %v4533_v43  ;;  %3270 = vmatpush3.bf16.xpose.msra.mxu0 %v1406_v53  ;;  %v1300_v57 = vsel %vm1092_vm1, %v1280_v21, 0  ;;  %v4684_v43 = vld [vmem:[#allocation10 + $0x8] sm:$0xff] }
 0x428   : > { %3402 = vmatprep.subr.msk.bf16.mxu0 %vm1092_vm1, %v1381_v54 }
 0x429   : > { %v1379_v29 = vpop.permute.xlu1 %1378 }
 0x42a   : > { %v1400_v58 = vsel %vm1092_vm1, %v1379_v29, 0  ;;  %v1047_v59 = vpop.permute.xlu0 %1046 }
 0x42b   : > { %3258 = vmatpush3.bf16.xpose.msra.mxu1 %v1303_v55 }
 0x42c   : > { %3400 = vmatprep.subr.msk.bf16.mxu1 %vm1092_vm1, %v1280_v21 }
 0x42d   : > { %v1377_v40 = vpop.permute.xlu1 %1376 }
 0x42e   : > { %3250 = vmatmul.mubr.msk.bf16.gmra.mxu0 %vm1092_vm1, %v4529_v41  ;;  %v1397_v42 = vsel %vm1092_vm1, %v1377_v40, 0  ;;  %v1043_v60 = vpop.permute.xlu0 %1042 }
 0x42f   : > { %3272 = vmatpush3.bf16.xpose.msra.mxu0 %v1403_v56  ;;  %3277 = vmatprep.mubr.msk.bf16.mxu0 %vm1092_vm1, %v4577_v25 }
 0x430   : > { %3403 = vmatprep.subr.msk.bf16.mxu0 %vm1092_vm1, %v1379_v29 }
 0x432   : > { %v4659_v61 = vpop.permute.xlu0 %1058 }
 0x433   : > { %3260 = vmatpush3.bf16.xpose.msra.mxu1 %v1300_v57 }
 0x434   : > { %3285 = vmatprep.subr.bf16.mxu1 %v4567_v18 }
 0x436   : > { %v4667_v39 = vpop.permute.xlu0 %1070 }
 0x437   : > { %3274 = vmatpush3.bf16.xpose.msra.mxu0 %v1400_v58 }
 0x438   : > { %3404 = vmatprep.subr.msk.bf16.mxu0 %vm1092_vm1, %v1377_v40 }
 0x43a   : > { %3262 = vmatmul.mubr.msk.bf16.vlgmr.msra.gmra.mxu1 %vm1092_vm1, %v4553_v13 }
 0x43b   : > { %3265 = vmatprep.mubr.msk.bf16.mxu1 %vm1092_vm1, %v4545_v9  ;;  %3286 = vmatpush3.bf16.msra.mxu1 %v4567_v18  ;;  %v4705_v18 = vld [vmem:[#allocation10 + $0x20] sm:$0xff] }
 0x43c   : > { %3287 = vmatprep.subr.bf16.mxu1 %v4470_v32 }
 0x43f   : > { %3276 = vmatpush3.bf16.xpose.msra.mxu0 %v1397_v42  ;;  %3288 = vmatpush3.bf16.msra.mxu1 %v4470_v32  ;;  %v1045_v32 = vpop.permute.xlu1 %1044 }
 0x440   : > { %3289 = vmatprep.subr.bf16.mxu1 %v4466_v19  ;;  %3301 = vmatprep.subr.bf16.mxu0 %v1047_v59 }
 0x442   : > { %3266 = vmatmul.mubr.msk.bf16.gmra.mxu1 %vm1092_vm1, %v4541_v49 }
 0x443   : > { %3290 = vmatpush3.bf16.msra.mxu1 %v4466_v19  ;;  %v1041_v19 = vpop.permute.xlu1 %1040 }
 0x444   : > { %3291 = vmatprep.subr.bf16.mxu1 %v4462_v12 }
 0x446   : > { %3278 = vmatmul.mubr.msk.bf16.vlgmr.msra.gmra.mxu0 %vm1092_vm1, %v4569_v22 }
 0x447   : > { %3281 = vmatprep.mubr.msk.bf16.mxu0 %vm1092_vm1, %v4560_v15  ;;  %3292 = vmatpush3.bf16.msra.mxu1 %v4462_v12  ;;  %v4698_v15 = vld [vmem:[#allocation10 + $0x38] sm:$0xff] }
 0x448   : > { %3302 = vmatpush3.bf16.msra.mxu0 %v1047_v59  ;;  %3317 = vmatprep.subr.bf16.mxu1 %v4659_v61 }
 0x449   : > { %3303 = vmatprep.subr.bf16.mxu0 %v1045_v32 }
 0x44c   : > { %3304 = vmatpush3.bf16.msra.mxu0 %v1045_v32 }
 0x44d   : > { %3305 = vmatprep.subr.bf16.mxu0 %v1043_v60 }
 0x44e   : > { %3282 = vmatmul.mubr.msk.bf16.gmra.mxu0 %vm1092_vm1, %v4551_v10  ;;  %v4694_v10 = vld [vmem:[#allocation10 + $0x30] sm:$0xff] }
 0x450   : > { %3306 = vmatpush3.bf16.msra.mxu0 %v1043_v60 }
 0x451   : > { %3307 = vmatprep.subr.bf16.mxu0 %v1041_v19 }
 0x454   : > { %3308 = vmatpush3.bf16.msra.mxu0 %v1041_v19 }
 0x455   : > { %3333 = vmatprep.subr.bf16.mxu0 %v4667_v39 }
 0x498   : > { %v3231_v62 = vpop.f32.mrf.mxu1 }
 0x499   : > { %v4675_v1 = vadd.f32 %v3231_v62, %v4670_v38 }
 0x49a   : > { %v1151_v2 = vpop.f32.mrf.mxu1 }
 0x49b   : > { %v4678_v3 = vadd.f32 %v1151_v2, %v4672_v0  ;;  %v1479_v4 = vsel %vm597_vm0, %v4675_v1, -inf }
 0x49c   : > { %1480 = vmax.xlane.f32.xlu0 %v1479_v4  ;;  %v3232_v41 = vpop.f32.mrf.mxu1 }
 0x49d   : > { %v4687_v49 = vadd.f32 %v3232_v41, %v4682_v5  ;;  %v1473_v9 = vsel %vm597_vm0, %v4678_v3, -inf }
 0x49e   : > { %v1154_v48 = vpop.f32.mrf.mxu1 }
 0x49f   : > { %v4690_v8 = vadd.f32 %v1154_v48, %v4684_v43  ;;  %v1482_v17 = vsel %vm597_vm0, %v4687_v49, -inf }
 0x4a0   : > { %v3235_v11 = vpop.f32.mrf.mxu1  ;;  %1474 = vmax.xlane.f32.xlu0 %v1473_v9 }
 0x4a1   : > { %v1476_v13 = vsel %vm597_vm0, %v4690_v8, -inf  ;;  %v4701_v16 = vadd.f32 %v3235_v11, %v4694_v10 }
 0x4a2   : > { %v1167_v14 = vpop.f32.mrf.mxu1  ;;  %1477 = vmax.xlane.f32.xlu1 %v1476_v13 }
 0x4a3   : > { %v4713_v6 = vadd.f32 %v1167_v14, %v4705_v18  ;;  %v1491_v27 = vsel %vm597_vm0, %v4701_v16, -inf }
 0x4a4   : > { %v3236_v22 = vpop.f32.mrf.mxu1  ;;  %1483 = vmax.xlane.f32.xlu0 %v1482_v17 }
 0x4a5   : > { %v4710_v24 = vadd.f32 %v3236_v22, %v4698_v15  ;;  %v1485_v31 = vsel %vm597_vm0, %v4713_v6, -inf }
 0x4a6   : > { %v1170_v25 = vpop.f32.mrf.mxu1 }
 0x4a7   : > { %v4716_v34 = vadd.f32 %v1170_v25, %v4707_v23  ;;  %v1494_v26 = vsel %vm597_vm0, %v4710_v24, -inf }
 0x4a8   : > { %1495 = vmax.xlane.f32.xlu1 %v1494_v26  ;;  %1492 = vmax.xlane.f32.xlu0 %v1491_v27 }
 0x4a9   : > { %v1488_v30 = vsel %vm597_vm0, %v4716_v34, -inf }
 0x4ac   : > { %1489 = vmax.xlane.f32.xlu1 %v1488_v30  ;;  %1486 = vmax.xlane.f32.xlu0 %v1485_v31 }
 0x4e6   : > { %v3247_v33 = vpop.f32.mrf.mxu0 }
 0x4e7   : > { %v4727_v36 = vadd.f32 %v3247_v33, %v4670_v38 }
 0x4e8   : > { %v1248_v37 = vpop.f32.mrf.mxu0 }
 0x4e9   : > { %v1503_v20 = vsel %vm597_vm0, %v4727_v36, -inf  ;;  %v4740_v52 = vadd.f32 %v1248_v37, %v4672_v0 }
 0x4ea   : > { %v3248_v44 = vpop.f32.mrf.mxu0  ;;  %1504 = vmax.xlane.f32.xlu0 %v1503_v20 }
 0x4eb   : > { %v4732_v35 = vadd.f32 %v3248_v44, %v4682_v5  ;;  %v1497_v57 = vsel %vm597_vm0, %v4740_v52, -inf }
 0x4ec   : > { %v1251_v45 = vpop.f32.mrf.mxu0 }
 0x4ed   : > { %v1506_v7 = vsel %vm597_vm0, %v4732_v35, -inf  ;;  %v4748_v56 = vadd.f32 %v1251_v45, %v4684_v43 }
 0x4ee   : > { %1507 = vmax.xlane.f32.xlu1 %v1506_v7  ;;  %v3251_v46 = vpop.f32.mrf.mxu0 }
 0x4ef   : > { %v4758_v42 = vadd.f32 %v3251_v46, %v4694_v10  ;;  %v1500_v32 = vsel %vm597_vm0, %v4748_v56, -inf  ;;  %v4797_v46 = vpop.permute.xlu1 %1056 }
 0x4f0   : > { %v1264_v50 = vpop.f32.mrf.mxu0 }
 0x4f1   : > { %v4768_v41 = vadd.f32 %v1264_v50, %v4705_v18  ;;  %v1515_v11 = vsel %vm597_vm0, %v4758_v42, -inf }
 0x4f2   : > { %v3252_v21 = vpop.f32.mrf.mxu0 }
 0x4f3   : > { %v4778_v22 = vadd.f32 %v3252_v21, %v4698_v15  ;;  %v1509_v27 = vsel %vm597_vm0, %v4768_v41, -inf }
 0x4f4   : > { %v1267_v59 = vpop.f32.mrf.mxu0 }
 0x4f5   : > { %v1518_v44 = vsel %vm597_vm0, %v4778_v22, -inf }
 0x4fa   : > { %v3263_v28 = vpop.f32.mrf.mxu1 }
 0x4fb   : > { %v4737_v47 = vadd.f32 %v3263_v28, %v4670_v38  ;;  %v4800_v28 = vadd.f32 %v1267_v59, %v4707_v23 }
 0x4fc   : > { %v1345_v51 = vpop.f32.mrf.mxu1 }
 0x4fd   : > { %v1527_v53 = vsel %vm597_vm0, %v4737_v47, -inf  ;;  %v4751_v29 = vadd.f32 %v1345_v51, %v4672_v0  ;;  %v1512_v21 = vsel %vm597_vm0, %v4800_v28, -inf }
 0x4fe   : > { %1528 = vmax.xlane.f32.xlu0 %v1527_v53  ;;  %v3264_v54 = vpop.f32.mrf.mxu1 }
 0x4ff   : > { %v4745_v55 = vadd.f32 %v3264_v54, %v4682_v5  ;;  %v1521_v19 = vsel %vm597_vm0, %v4751_v29, -inf }
 0x500   : > { %v1348_v40 = vpop.f32.mrf.mxu1 }
 0x501   : > { %v1530_v58 = vsel %vm597_vm0, %v4745_v55, -inf  ;;  %v4761_v60 = vadd.f32 %v1348_v40, %v4684_v43 }
 0x502   : > { %1498 = vmax.xlane.f32.xlu0 %v1497_v57  ;;  %1531 = vmax.xlane.f32.xlu1 %v1530_v58  ;;  %v3267_v62 = vpop.f32.mrf.mxu1 }
 0x503   : > { %v4771_v48 = vadd.f32 %v3267_v62, %v4694_v10  ;;  %v1524_v9 = vsel %vm597_vm0, %v4761_v60, -inf }
 0x504   : > { %v1361_v13 = vpop.f32.mrf.mxu1 }
 0x505   : > { %v4781_v25 = vadd.f32 %v1361_v13, %v4705_v18  ;;  %v1539_v26 = vsel %vm597_vm0, %v4771_v48, -inf }
 0x506   : > { %v3279_v2 = vpop.f32.mrf.mxu0  ;;  %1501 = vmax.xlane.f32.xlu1 %v1500_v32  ;;  %1522 = vmax.xlane.f32.xlu0 %v1521_v19  ;;  %v3268_v30 = vpop.f32.mrf.mxu1 }
 0x507   : > { %v4788_v37 = vadd.f32 %v3268_v30, %v4698_v15  ;;  %v1533_v7 = vsel %vm597_vm0, %v4781_v25, -inf  ;;  %v4819_v58 = vadd.f32 %v3279_v2, %v4670_v38 }
 0x508   : > { %v1442_v4 = vpop.f32.mrf.mxu0  ;;  %v1364_v53 = vpop.f32.mrf.mxu1 }
 0x509   : > { %v4791_v20 = vadd.f32 %v1442_v4, %v4672_v0  ;;  %v1542_v0 = vsel %vm597_vm0, %v4788_v37, -inf  ;;  %v4810_v54 = vadd.f32 %v1364_v53, %v4707_v23  ;;  %v1551_v19 = vsel %vm597_vm0, %v4819_v58, -inf }
 0x50a   : > { %v3280_v14 = vpop.f32.mrf.mxu0  ;;  %1525 = vmax.xlane.f32.xlu1 %v1524_v9  ;;  %1516 = vmax.xlane.f32.xlu0 %v1515_v11 }
 0x50b   : > { %v1545_v51 = vsel %vm597_vm0, %v4791_v20, -inf  ;;  %v1536_v40 = vsel %vm597_vm0, %v4810_v54, -inf  ;;  %v4826_v32 = vadd.f32 %v3280_v14, %v4682_v5 }
 0x50c   : > { %v1445_v17 = vpop.f32.mrf.mxu0 }
 0x50d   : > { %v4831_v62 = vadd.f32 %v1445_v17, %v4684_v43  ;;  %v1554_v38 = vsel %vm597_vm0, %v4826_v32, -inf }
 0x50e   : > { %v3283_v31 = vpop.f32.mrf.mxu0  ;;  %1540 = vmax.xlane.f32.xlu1 %v1539_v26  ;;  %1510 = vmax.xlane.f32.xlu0 %v1509_v27 }
 0x50f   : > { %v4838_v9 = vadd.f32 %v3283_v31, %v4694_v10  ;;  %v1548_v13 = vsel %vm597_vm0, %v4831_v62, -inf }
 0x510   : > { %v1458_v33 = vpop.f32.mrf.mxu0 }
 0x511   : > { %v4846_v27 = vadd.f32 %v1458_v33, %v4705_v18  ;;  %v1563_v10 = vsel %vm597_vm0, %v4838_v9, -inf }
 0x512   : > { %v3284_v45 = vpop.f32.mrf.mxu0  ;;  %1519 = vmax.xlane.f32.xlu1 %v1518_v44  ;;  %1534 = vmax.xlane.f32.xlu0 %v1533_v7 }
 0x513   : > { %v4803_v50 = vadd.f32 %v3284_v45, %v4698_v15  ;;  %v4816_v15 = vpop.permute.xlu1 %1068  ;;  %v1557_v45 = vsel %vm597_vm0, %v4846_v27, -inf }
 0x515   : > { %v1566_v57 = vsel %vm597_vm0, %v4803_v50, -inf }
 0x516   : > { %1543 = vmax.xlane.f32.xlu1 %v1542_v0  ;;  %1546 = vmax.xlane.f32.xlu0 %v1545_v51 }
 0x517   : > { %v4823_v59 = vpop.permute.xlu1 %1054 }
 0x51a   : > { %1513 = vmax.xlane.f32.xlu1 %v1512_v21  ;;  %1567 = vmax.xlane.f32.xlu0 %v1566_v57 }
 0x51b   : > { %v4835_v2 = vpop.permute.xlu1 %1066 }
 0x51e   : > { %1537 = vmax.xlane.f32.xlu1 %v1536_v40 }
 0x522   : > { %1552 = vmax.xlane.f32.xlu1 %v1551_v19 }
 0x525   : > { %v1481_v4 = vpop.xlane.xlu0 %1480 }
 0x526   : > { %1555 = vmax.xlane.f32.xlu1 %v1554_v38  ;;  %v1571_v5 = vsub.f32 %v4675_v1, %v1481_v4  ;;  %v1461_v1 = vpop.f32.mrf.mxu0 }
 0x528   : > { %v1605_v30 = vmul.f32 1.442695, %v1571_v5 }
 0x529   : > { %v1475_v11 = vpop.xlane.xlu0 %1474 }
 0x52a   : > { %v1569_v14 = vsub.f32 %v4678_v3, %v1475_v11  ;;  %1549 = vmax.xlane.f32.xlu1 %v1548_v13 }
 0x52b   : > { %v1478_v43 = vpop.xlane.xlu1 %1477 }
 0x52c   : > { %v1601_v17 = vmul.f32 1.442695, %v1569_v14  ;;  %v1570_v26 = vsub.f32 %v4690_v8, %v1478_v43  ;;  %v4854_v8 = vadd.f32 %v1461_v1, %v4707_v23 }
 0x52d   : > { %v1484_v44 = vpop.xlane.xlu0 %1483 }
 0x52e   : > { %v1603_v31 = vmul.f32 1.442695, %v1570_v26  ;;  %v1572_v7 = vsub.f32 %v4687_v49, %v1484_v44  ;;  %1564 = vmax.xlane.f32.xlu1 %v1563_v10  ;;  %3628 = vpow2.f32 %v1601_v17  ;;  %v1560_v23 = vsel %vm597_vm0, %v4854_v8, -inf }
 0x530   : > { %3630 = vpow2.f32 %v1603_v31  ;;  %v1607_v3 = vmul.f32 1.442695, %v1572_v7  ;;  %1052 = vrot.lane.b32.xlu0 %v4462_v12, %s4060_s8  ;;  %s585_s8 = scalar_lea.vmem [#allocation13], %s3038_s20  ;;  %s3136_s20 = sshll.u32 %s4170_s24, 10 }
 0x531   : > { %3632 = vpow2.f32 %v1605_v30  ;;  %v1496_v18 = vpop.xlane.xlu1 %1495  ;;  %v1493_v33 = vpop.xlane.xlu0 %1492  ;;  %s2892_s24 = scalar_lea.sflag [#allocation4], %s4329_s30 }
 0x532   : > { %3634 = vpow2.f32 %v1607_v3  ;;  %v1576_v0 = vsub.f32 %v4710_v24, %v1496_v18  ;;  %v1575_v49 = vsub.f32 %v4701_v16, %v1493_v33  ;;  %1558 = vmax.xlane.f32.xlu1 %v1557_v45 }
 0x534   : > { %v1615_v51 = vmul.f32 1.442695, %v1576_v0  ;;  %v1613_v53 = vmul.f32 1.442695, %v1575_v49 }
 0x535   : > { %v1490_v21 = vpop.xlane.xlu1 %1489  ;;  %v1487_v57 = vpop.xlane.xlu0 %1486 }
 0x536   : > { %v1574_v40 = vsub.f32 %v4716_v34, %v1490_v21  ;;  %v1573_v19 = vsub.f32 %v4713_v6, %v1487_v57  ;;  %1561 = vmax.xlane.f32.xlu1 %v1560_v23  ;;  %3636 = vpow2.f32 %v1615_v51 }
 0x537   : > { %3638 = vpow2.f32 %v1613_v53 }
 0x538   : > { %v1611_v4 = vmul.f32 1.442695, %v1574_v40  ;;  %v1609_v38 = vmul.f32 1.442695, %v1573_v19 }
 0x53a   : > { %3640 = vpow2.f32 %v1611_v4 }
 0x53b   : > { %3642 = vpow2.f32 %v1609_v38  ;;  %v4864_v16 = vpop.eup %3628 }
 0x53d   : > { %v4866_v24 = vpop.eup %3630 }
 0x53e   : > { %v4868_v5 = vpop.eup %3632  ;;  %v1761_v11 = vpack.c.bf16 %v4866_v24, %v4864_v16 }
 0x53f   : > { %v4872_v13 = vpop.eup %3634 }
 0x540   : > { %v1762_v6 = vpack.c.bf16 %v4872_v13, %v4868_v5  ;;  %3293 = vmatprep.mubr.msk.bf16.mxu1 %vm597_vm0, %v1761_v11 }
 0x542   : > { %3294 = vmatmul.mubr.msk.bf16.vlgmr.msra.gmra.mxu1 %vm597_vm0, %v1762_v6 }
 0x543   : > { %3318 = vmatpush3.bf16.msra.mxu1 %v4659_v61  ;;  %v4880_v34 = vpop.eup %3636 }
 0x544   : > { %3319 = vmatprep.subr.bf16.mxu1 %v4797_v46  ;;  %v4882_v14 = vpop.eup %3638 }
 0x545   : > { %v1764_v26 = vpack.c.bf16 %v4880_v34, %v4882_v14 }
 0x547   : > { %v4884_v43 = vpop.eup %3640  ;;  %3320 = vmatpush3.bf16.msra.mxu1 %v4797_v46  ;;  %1064 = vrot.lane.b32.xlu1 %v4462_v12, %s4061_s25  ;;  %s4065_s25 = smov 48  }
 0x548   : > { %v4889_v17 = vpop.eup %3642  ;;  %3321 = vmatprep.subr.bf16.mxu1 %v4823_v59 }
 0x549   : > { %v1763_v61 = vpack.c.bf16 %v4884_v43, %v4889_v17 }
 0x54b   : > { %3297 = vmatprep.mubr.msk.bf16.mxu1 %vm597_vm0, %v1763_v61  ;;  %3322 = vmatpush3.bf16.msra.mxu1 %v4823_v59 }
 0x54c   : > { %3298 = vmatmul.mubr.msk.bf16.gmra.mxu1 %vm597_vm0, %v1764_v26 }
 0x573   : > { %v1505_v46 = vpop.xlane.xlu0 %1504 }
 0x574   : > { %v1579_v30 = vsub.f32 %v4727_v36, %v1505_v46 }
 0x576   : > { %v1621_v12 = vmul.f32 1.442695, %v1579_v30 }
 0x577   : > { %v1508_v1 = vpop.xlane.xlu1 %1507 }
 0x578   : > { %3644 = vpow2.f32 %v1621_v12  ;;  %v1580_v59 = vsub.f32 %v4732_v35, %v1508_v1 }
 0x57a   : > { %v1623_v0 = vmul.f32 1.442695, %v1580_v59 }
 0x585   : > { %v4900_v44 = vpop.eup %3644 }
 0x586   : > { %v1695_v10 = vsel %vm597_vm0, %v4900_v44, 0.0 }
 0x587   : > { %1696 = vadd.xlane.f32.xlu1 %v1695_v10  ;;  %v1529_v31 = vpop.xlane.xlu0 %1528 }
 0x588   : > { %v1587_v7 = vsub.f32 %v4737_v47, %v1529_v31 }
 0x58a   : > { %v1637_v3 = vmul.f32 1.442695, %v1587_v7 }
 0x58b   : > { %v1532_v18 = vpop.xlane.xlu1 %1531  ;;  %v1499_v33 = vpop.xlane.xlu0 %1498 }
 0x58c   : > { %3646 = vpow2.f32 %v1637_v3  ;;  %v1577_v36 = vsub.f32 %v4740_v52, %v1499_v33  ;;  %v1588_v47 = vsub.f32 %v4745_v55, %v1532_v18 }
 0x58e   : > { %v1617_v45 = vmul.f32 1.442695, %v1577_v36  ;;  %v1639_v4 = vmul.f32 1.442695, %v1588_v47 }
 0x58f   : > { %v1502_v49 = vpop.xlane.xlu1 %1501  ;;  %v1523_v51 = vpop.xlane.xlu0 %1522 }
 0x590   : > { %v1578_v53 = vsub.f32 %v4748_v56, %v1502_v49  ;;  %v1585_v21 = vsub.f32 %v4751_v29, %v1523_v51  ;;  %3648 = vpow2.f32 %v1617_v45 }
 0x591   : > { %3650 = vpow2.f32 %v1623_v0 }
 0x592   : > { %v1619_v57 = vmul.f32 1.442695, %v1578_v53  ;;  %v1633_v23 = vmul.f32 1.442695, %v1585_v21 }
 0x593   : > { %v1526_v35 = vpop.xlane.xlu1 %1525  ;;  %v1517_v40 = vpop.xlane.xlu0 %1516 }
 0x594   : > { %3652 = vpow2.f32 %v1619_v57  ;;  %v1586_v19 = vsub.f32 %v4761_v60, %v1526_v35  ;;  %v1583_v31 = vsub.f32 %v4758_v42, %v1517_v40 }
 0x595   : > { %3654 = vpow2.f32 %v1633_v23 }
 0x596   : > { %v1635_v52 = vmul.f32 1.442695, %v1586_v19 }
 0x597   : > { %v1541_v38 = vpop.xlane.xlu1 %1540  ;;  %v1511_v11 = vpop.xlane.xlu0 %1510 }
 0x598   : > { %3656 = vpow2.f32 %v1635_v52  ;;  %v1581_v56 = vsub.f32 %v4768_v41, %v1511_v11  ;;  %v1591_v53 = vsub.f32 %v4771_v48, %v1541_v38 }
 0x599   : > { %v4912_v29 = vpop.eup %3646  ;;  %3658 = vpow2.f32 %v1639_v4 }
 0x59a   : > { %v1625_v6 = vmul.f32 1.442695, %v1581_v56  ;;  %v1719_v61 = vsel %vm597_vm0, %v4912_v29, 0.0  ;;  %v1645_v48 = vmul.f32 1.442695, %v1591_v53 }
 0x59b   : > { %v1520_v55 = vpop.xlane.xlu1 %1519  ;;  %1720 = vadd.xlane.f32.xlu0 %v1719_v61  ;;  %v1535_v26 = vpop.xlane.xlu0 %1534 }
 0x59c   : > { %3660 = vpow2.f32 %v1625_v6  ;;  %v1584_v46 = vsub.f32 %v4778_v22, %v1520_v55  ;;  %v1589_v3 = vsub.f32 %v4781_v25, %v1535_v26  ;;  %v1629_v25 = vmul.f32 1.442695, %v1583_v31 }
 0x59d   : > { %v3649_v60 = vpop.eup %3648 }
 0x59e   : > { %v1689_v12 = vsel %vm597_vm0, %v3649_v60, 0.0  ;;  %v3651_v1 = vpop.eup %3650  ;;  %v1631_v36 = vmul.f32 1.442695, %v1584_v46 }
 0x59f   : > { %v1544_v30 = vpop.xlane.xlu1 %1543  ;;  %v1547_v10 = vpop.xlane.xlu0 %1546  ;;  %1690 = vadd.xlane.f32.xlu1 %v1689_v12  ;;  %v1766_v33 = vpack.c.bf16 %v3651_v1, %v4900_v44  ;;  %v1641_v44 = vmul.f32 1.442695, %v1589_v3 }
 0x5a0   : > { %v1592_v22 = vsub.f32 %v4788_v37, %v1544_v30  ;;  %3662 = vpow2.f32 %v1631_v36  ;;  %v1593_v19 = vsub.f32 %v4791_v20, %v1547_v10 }
 0x5a1   : > { %v3653_v41 = vpop.eup %3652 }
 0x5a2   : > { %v3655_v7 = vpop.eup %3654  ;;  %v1692_v59 = vsel %vm597_vm0, %v3653_v41, 0.0  ;;  %v1765_v18 = vpack.c.bf16 %v3653_v41, %v3649_v60  ;;  %v1647_v57 = vmul.f32 1.442695, %v1592_v22  ;;  %v1649_v20 = vmul.f32 1.442695, %v1593_v19 }
 0x5a3   : > { %v1514_v45 = vpop.xlane.xlu1 %1513  ;;  %1693 = vadd.xlane.f32.xlu0 %v1692_v59  ;;  %v1713_v0 = vsel %vm597_vm0, %v3655_v7, 0.0  ;;  %v4924_v49 = vpop.xlane.xlu0 %1567 }
 0x5a4   : > { %v1582_v51 = vsub.f32 %v4800_v28, %v1514_v45  ;;  %1714 = vadd.xlane.f32.xlu1 %v1713_v0  ;;  %3309 = vmatprep.mubr.msk.bf16.mxu0 %vm597_vm0, %v1765_v18  ;;  %v1698_v28 = vsel %vm597_vm0, %v3651_v1, 0.0  ;;  %v1600_v45 = vsub.f32 %v4803_v50, %v4924_v49 }
 0x5a5   : > { %v3657_v42 = vpop.eup %3656  ;;  %3310 = vmatmul.mubr.msk.bf16.vlgmr.msra.gmra.mxu0 %vm597_vm0, %v1766_v33 }
 0x5a6   : > { %v1627_v21 = vmul.f32 1.442695, %v1582_v51  ;;  %3334 = vmatpush3.bf16.msra.mxu0 %v4667_v39  ;;  %v1769_v37 = vpack.c.bf16 %v3657_v42, %v3655_v7  ;;  %v3659_v35 = vpop.eup %3658  ;;  %v1716_v6 = vsel %vm597_vm0, %v3657_v42, 0.0 }
 0x5a7   : > { %3335 = vmatprep.subr.bf16.mxu0 %v4816_v15  ;;  %v1538_v23 = vpop.xlane.xlu1 %1537  ;;  %v1053_v47 = vpop.permute.xlu0 %1052  ;;  %v1770_v4 = vpack.c.bf16 %v3659_v35, %v4912_v29  ;;  %v1722_v38 = vsel %vm597_vm0, %v3659_v35, 0.0 }
 0x5a8   : > { %3664 = vpow2.f32 %v1627_v21  ;;  %v1590_v40 = vsub.f32 %v4810_v54, %v1538_v23  ;;  %1699 = vadd.xlane.f32.xlu1 %v1698_v28  ;;  %3323 = vmatprep.subr.bf16.mxu1 %v1053_v47  ;;  %v1663_v21 = vmul.f32 1.442695, %v1600_v45 }
 0x5a9   : > { %3666 = vpow2.f32 %v1629_v25  ;;  %3325 = vmatprep.mubr.msk.bf16.mxu1 %vm597_vm0, %v1769_v37  ;;  %3324 = vmatpush3.bf16.msra.mxu1 %v1053_v47  ;;  %v3661_v39 = vpop.eup %3660 }
 0x5aa   : > { %3668 = vpow2.f32 %v1641_v44  ;;  %v1643_v52 = vmul.f32 1.442695, %v1590_v40  ;;  %3336 = vmatpush3.bf16.msra.mxu0 %v4816_v15  ;;  %v1701_v11 = vsel %vm597_vm0, %v3661_v39, 0.0 }
 0x5ab   : > { %3670 = vpow2.f32 %v1647_v57  ;;  %3337 = vmatprep.subr.bf16.mxu0 %v4835_v2  ;;  %v1553_v54 = vpop.xlane.xlu1 %1552  ;;  %1702 = vadd.xlane.f32.xlu0 %v1701_v11 }
 0x5ac   : > { %3672 = vpow2.f32 %v1643_v52  ;;  %v1595_v56 = vsub.f32 %v4819_v58, %v1553_v54  ;;  %1723 = vadd.xlane.f32.xlu1 %v1722_v38  ;;  %3326 = vmatmul.mubr.msk.bf16.vlgmr.msra.gmra.mxu1 %vm597_vm0, %v1770_v4 }
 0x5ad   : > { %3674 = vpow2.f32 %v1645_v48  ;;  %v3663_v58 = vpop.eup %3662 }
 0x5ae   : > { %v1653_v15 = vmul.f32 1.442695, %v1595_v56  ;;  %3338 = vmatpush3.bf16.msra.mxu0 %v4835_v2  ;;  %v1710_v35 = vsel %vm597_vm0, %v3663_v58, 0.0 }
 0x5af   : > { %v1556_v29 = vpop.xlane.xlu1 %1555 }
 0x5b0   : > { %3676 = vpow2.f32 %v1653_v15  ;;  %v1596_v61 = vsub.f32 %v4826_v32, %v1556_v29  ;;  %1717 = vadd.xlane.f32.xlu1 %v1716_v6  ;;  %v1665_v6 = vsel %vm597_vm0, %v4864_v16, 0.0  ;;  %v1683_v16 = vsel %vm597_vm0, %v4882_v14, 0.0 }
 0x5b1   : > { %3678 = vpow2.f32 %v1649_v20 }
 0x5b2   : > { %v1655_v55 = vmul.f32 1.442695, %v1596_v61 }
 0x5b3   : > { %v1550_v26 = vpop.xlane.xlu1 %1549 }
 0x5b4   : > { %3680 = vpow2.f32 %v1655_v55  ;;  %v1594_v60 = vsub.f32 %v4831_v62, %v1550_v26  ;;  %v1671_v55 = vsel %vm597_vm0, %v4868_v5, 0.0  ;;  %v1668_v26 = vsel %vm597_vm0, %v4866_v24, 0.0 }
 0x5b5   : > { %v3665_v46 = vpop.eup %3664  ;;  %v1686_v24 = vsel %vm597_vm0, %v4880_v34, 0.0 }
 0x5b6   : > { %v3667_v30 = vpop.eup %3666  ;;  %v1651_v12 = vmul.f32 1.442695, %v1594_v60  ;;  %v1704_v10 = vsel %vm597_vm0, %v3665_v46, 0.0  ;;  %v1767_v2 = vpack.c.bf16 %v3665_v46, %v3661_v39  ;;  %v1674_v60 = vsel %vm597_vm0, %v4872_v13, 0.0 }
 0x5b7   : > { %v3669_v1 = vpop.eup %3668  ;;  %v1565_v41 = vpop.xlane.xlu1 %1564  ;;  %1705 = vadd.xlane.f32.xlu1 %v1704_v10  ;;  %v1768_v31 = vpack.c.bf16 %v3663_v58, %v3667_v30  ;;  %v1677_v58 = vsel %vm597_vm0, %v4889_v17, 0.0  ;;  %v1680_v46 = vsel %vm597_vm0, %v4884_v43, 0.0 }
 0x5b8   : > { %v3671_v7 = vpop.eup %3670  ;;  %3682 = vpow2.f32 %v1651_v12  ;;  %3313 = vmatprep.mubr.msk.bf16.mxu0 %vm597_vm0, %v1767_v2  ;;  %v1599_v62 = vsub.f32 %v4838_v9, %v1565_v41  ;;  %v1725_v40 = vsel %vm597_vm0, %v3669_v1, 0.0 }
 0x5b9   : > { %v3673_v32 = vpop.eup %3672  ;;  %3314 = vmatmul.mubr.msk.bf16.gmra.mxu0 %vm597_vm0, %v1768_v31  ;;  %v1734_v38 = vsel %vm597_vm0, %v3671_v7, 0.0 }
 0x5ba   : > { %v3675_v3 = vpop.eup %3674  ;;  %v1771_v59 = vpack.c.bf16 %v3673_v32, %v3669_v1  ;;  %v1661_v25 = vmul.f32 1.442695, %v1599_v62  ;;  %v1728_v48 = vsel %vm597_vm0, %v3673_v32, 0.0 }
 0x5bb   : > { %v1559_v18 = vpop.xlane.xlu1 %1558  ;;  %v1772_v33 = vpack.c.bf16 %v3671_v7, %v3675_v3  ;;  %v1731_v39 = vsel %vm597_vm0, %v3675_v3, 0.0 }
 0x5bc   : > { %v1597_v36 = vsub.f32 %v4846_v27, %v1559_v18  ;;  %3329 = vmatprep.mubr.msk.bf16.mxu1 %vm597_vm0, %v1771_v59 }
 0x5bd   : > { %v3677_v22 = vpop.eup %3676  ;;  %3330 = vmatmul.mubr.msk.bf16.gmra.mxu1 %vm597_vm0, %v1772_v33 }
 0x5be   : > { %v1657_v0 = vmul.f32 1.442695, %v1597_v36  ;;  %v1743_v51 = vsel %vm597_vm0, %v3677_v22, 0.0  ;;  %v3679_v42 = vpop.eup %3678 }
 0x5bf   : > { %v1562_v53 = vpop.xlane.xlu1 %1561  ;;  %1744 = vadd.xlane.f32.xlu0 %v1743_v51  ;;  %v1737_v57 = vsel %vm597_vm0, %v3679_v42, 0.0 }
 0x5c0   : > { %v1598_v9 = vsub.f32 %v4854_v8, %v1562_v53  ;;  %3684 = vpow2.f32 %v1657_v0  ;;  %v1707_v8 = vsel %vm597_vm0, %v3667_v30, 0.0 }
 0x5c1   : > { %v3681_v44 = vpop.eup %3680  ;;  %3686 = vpow2.f32 %v1661_v25 }
 0x5c2   : > { %v1659_v27 = vmul.f32 1.442695, %v1598_v9  ;;  %v1746_v37 = vsel %vm597_vm0, %v3681_v44, 0.0  ;;  %v1774_v47 = vpack.c.bf16 %v3681_v44, %v3677_v22 }
 0x5c3   : > { %v1065_v50 = vpop.permute.xlu1 %1064  ;;  %1747 = vadd.xlane.f32.xlu1 %v1746_v37  ;;  %1738 = vadd.xlane.f32.xlu0 %v1737_v57  ;;  %v3588_v57 = vld [vmem:[%s5286_s9 + $0x18] sm:$0xff]  }
 0x5c4   : > { %3688 = vpow2.f32 %v1659_v27  ;;  %3339 = vmatprep.subr.bf16.mxu0 %v1065_v50  ;;  %3349 = vmatprep.subr.bf16.mxu1 %v3588_v57 }
 0x5c5   : > { %v3683_v49 = vpop.eup %3682  ;;  %3690 = vpow2.f32 %v1663_v21  ;;  %3340 = vmatpush3.bf16.msra.mxu0 %v1065_v50  ;;  %v3589_v50 = vld [vmem:[%s5286_s9 + $0x10] sm:$0xff]   ;;  %3350 = vmatpush3.bf16.msra.mxu1 %v3588_v57 }
 0x5c6   : > { %v1740_v23 = vsel %vm597_vm0, %v3683_v49, 0.0  ;;  %v1773_v28 = vpack.c.bf16 %v3683_v49, %v3679_v42  ;;  %3351 = vmatprep.subr.bf16.mxu1 %v3589_v50 }
 0x5c7   : > { %1741 = vadd.xlane.f32.xlu1 %v1740_v23  ;;  %1708 = vadd.xlane.f32.xlu0 %v1707_v8 }
 0x5c8   : > { %3341 = vmatprep.mubr.msk.bf16.mxu0 %vm597_vm0, %v1773_v28 }
 0x5c9   : > { %3342 = vmatmul.mubr.msk.bf16.vlgmr.msra.gmra.mxu0 %vm597_vm0, %v1774_v47  ;;  %3352 = vmatpush3.bf16.msra.mxu1 %v3589_v50 }
 0x5cb   : > { %1711 = vadd.xlane.f32.xlu1 %v1710_v35  ;;  %1726 = vadd.xlane.f32.xlu0 %v1725_v40 }
 0x5cd   : > { %v3685_v19 = vpop.eup %3684 }
 0x5ce   : > { %v3687_v52 = vpop.eup %3686  ;;  %v1749_v11 = vsel %vm597_vm0, %v3685_v19, 0.0 }
 0x5cf   : > { %1729 = vadd.xlane.f32.xlu1 %v1728_v48  ;;  %1732 = vadd.xlane.f32.xlu0 %v1731_v39  ;;  %v1755_v29 = vsel %vm597_vm0, %v3687_v52, 0.0 }
 0x5d1   : > { %v3689_v4 = vpop.eup %3688 }
 0x5d2   : > { %v3691_v54 = vpop.eup %3690  ;;  %v1775_v56 = vpack.c.bf16 %v3689_v4, %v3685_v19  ;;  %v1752_v15 = vsel %vm597_vm0, %v3689_v4, 0.0  ;;  %v3590_v4 = vld [vmem:[%s5286_s9 + $0x8] sm:$0xff]  }
 0x5d3   : > { %1735 = vadd.xlane.f32.xlu1 %v1734_v38  ;;  %1750 = vadd.xlane.f32.xlu0 %v1749_v11  ;;  %v1776_v20 = vpack.c.bf16 %v3691_v54, %v3687_v52  ;;  %v1758_v61 = vsel %vm597_vm0, %v3691_v54, 0.0 }
 0x5d4   : > { %3345 = vmatprep.mubr.msk.bf16.mxu0 %vm597_vm0, %v1775_v56  ;;  %3353 = vmatprep.subr.bf16.mxu1 %v3590_v4 }
 0x5d5   : > { %3346 = vmatmul.mubr.msk.bf16.gmra.mxu0 %vm597_vm0, %v1776_v20  ;;  %3354 = vmatpush3.bf16.msra.mxu1 %v3590_v4 }
 0x5d6   : > { %2637 = vmatprep.mubr.bf16.mxu0 %v4056_v63 }
 0x5d7   : > { %1753 = vadd.xlane.f32.xlu1 %v1752_v15  ;;  %1756 = vadd.xlane.f32.xlu0 %v1755_v29 }
 0x5db   : > { %1666 = vadd.xlane.f32.xlu0 %v1665_v6  ;;  %1759 = vadd.xlane.f32.xlu1 %v1758_v61 }
 0x5df   : > { %1672 = vadd.xlane.f32.xlu0 %v1671_v55  ;;  %1669 = vadd.xlane.f32.xlu1 %v1668_v26 }
 0x5e3   : > { %1678 = vadd.xlane.f32.xlu0 %v1677_v58  ;;  %1675 = vadd.xlane.f32.xlu1 %v1674_v60 }
 0x5e7   : > { %1684 = vadd.xlane.f32.xlu0 %v1683_v16  ;;  %1681 = vadd.xlane.f32.xlu1 %v1680_v46 }
 0x5eb   : > { %1687 = vadd.xlane.f32.xlu1 %v1686_v24 }
 0x602   : > { %v4992_v12 = vpop.f32.mrf.mxu1 }
 0x604   : > { %v4994_v10 = vpop.f32.mrf.mxu1 }
 0x606   : > { %v4996_v1 = vpop.f32.mrf.mxu1 }
 0x608   : > { %v4998_v41 = vpop.f32.mrf.mxu1 }
 0x60c   : > { %v5000_v34 = vpop.f32.mrf.mxu1 }
 0x60e   : > { %v5006_v3 = vpop.f32.mrf.mxu1 }
 0x610   : > { %v1697_v5 = vpop.xlane.xlu1 %1696  ;;  %v5008_v33 = vpop.f32.mrf.mxu1 }
 0x611   : > { %3692 = vrcp.f32 %v1697_v5 }
 0x612   : > { %v5010_v9 = vpop.f32.mrf.mxu1 }
 0x61e   : > { %v3693_v22 = vpop.eup %3692 }
 0x624   : > { %v1721_v14 = vpop.xlane.xlu0 %1720 }
 0x628   : > { %v1691_v30 = vpop.xlane.xlu1 %1690 }
 0x62c   : > { %v1694_v43 = vpop.xlane.xlu0 %1693 }
 0x62d   : > { %v1715_v17 = vpop.xlane.xlu1 %1714 }
 0x631   : > { %v1700_v13 = vpop.xlane.xlu1 %1699 }
 0x632   : > { %3694 = vrcp.f32 %v1700_v13 }
 0x633   : > { %3696 = vrcp.f32 %v1721_v14 }
 0x634   : > { %v5002_v7 = vpop.xlane.xlu0 %1702  ;;  %3698 = vrcp.f32 %v1694_v43  ;;  %v3591_v43 = vld [vmem:[%s5286_s9] sm:$0xff]  }
 0x635   : > { %v1724_v2 = vpop.xlane.xlu1 %1723  ;;  %3355 = vmatprep.subr.bf16.mxu1 %v3591_v43 }
 0x636   : > { %3700 = vrcp.f32 %v1724_v2  ;;  %3356 = vmatpush3.bf16.msra.mxu1 %v3591_v43 }
 0x637   : > { %3702 = vrcp.f32 %v1715_v17 }
 0x639   : > { %v1718_v31 = vpop.xlane.xlu1 %1717 }
 0x63a   : > { %3704 = vrcp.f32 %v1718_v31 }
 0x63b   : > { %3706 = vrcp.f32 %v1691_v30 }
 0x63f   : > { %v3695_v45 = vpop.eup %3694 }
 0x640   : > { %v5004_v32 = vpop.xlane.xlu1 %1705  ;;  %v3697_v27 = vpop.eup %3696 }
 0x641   : > { %v3699_v49 = vpop.eup %3698 }
 0x643   : > { %v3701_v28 = vpop.eup %3700 }
 0x644   : > { %v3703_v40 = vpop.eup %3702 }
 0x647   : > { %v3705_v19 = vpop.eup %3704 }
 0x648   : > { %v1745_v59 = vpop.xlane.xlu0 %1744  ;;  %v3707_v20 = vpop.eup %3706 }
 0x649   : > { %3708 = vrcp.f32 %v1745_v59 }
 0x64c   : > { %v1748_v62 = vpop.xlane.xlu1 %1747  ;;  %v1739_v51 = vpop.xlane.xlu0 %1738 }
 0x64d   : > { %3710 = vrcp.f32 %v1748_v62 }
 0x64e   : > { %3712 = vrcp.f32 %v1739_v51 }
 0x650   : > { %v1742_v42 = vpop.xlane.xlu1 %1741  ;;  %v1709_v23 = vpop.xlane.xlu0 %1708 }
 0x651   : > { %3714 = vrcp.f32 %v1742_v42 }
 0x654   : > { %v1712_v8 = vpop.xlane.xlu1 %1711  ;;  %v1727_v15 = vpop.xlane.xlu0 %1726 }
 0x655   : > { %3716 = vrcp.f32 %v1712_v8 }
 0x656   : > { %3718 = vrcp.f32 %v5004_v32  ;;  %v3709_v31 = vpop.eup %3708 }
 0x657   : > { %3720 = vrcp.f32 %v1709_v23 }
 0x658   : > { %v1730_v61 = vpop.xlane.xlu1 %1729  ;;  %v1733_v58 = vpop.xlane.xlu0 %1732  ;;  %3722 = vrcp.f32 %v5002_v7 }
 0x65a   : > { %v3711_v62 = vpop.eup %3710 }
 0x65b   : > { %v3713_v7 = vpop.eup %3712 }
 0x65c   : > { %v1736_v60 = vpop.xlane.xlu1 %1735  ;;  %v1751_v46 = vpop.xlane.xlu0 %1750 }
 0x65d   : > { %3724 = vrcp.f32 %v1736_v60 }
 0x65e   : > { %3726 = vrcp.f32 %v1730_v61 }
 0x65f   : > { %3728 = vrcp.f32 %v1733_v58 }
 0x660   : > { %v1754_v24 = vpop.xlane.xlu1 %1753  ;;  %v1757_v13 = vpop.xlane.xlu0 %1756  ;;  %3730 = vrcp.f32 %v1727_v15 }
 0x661   : > { %3732 = vrcp.f32 %v1757_v13 }
 0x664   : > { %v1760_v2 = vpop.xlane.xlu1 %1759 }
 0x665   : > { %v3311_v18 = vpop.f32.mrf.mxu0  ;;  %3734 = vrcp.f32 %v1760_v2 }
 0x666   : > { %v2127_v25 = vmul.f32 %v3693_v22, %v3311_v18  ;;  %3736 = vrcp.f32 %v1751_v46 }
 0x667   : > { %v1900_v36 = vpop.f32.mrf.mxu0  ;;  %3738 = vrcp.f32 %v1754_v24 }
 0x668   : > { %v2125_v29 = vmul.f32 %v3707_v20, %v1900_v36  ;;  %v3715_v36 = vpop.eup %3714  ;;  %v1670_v13 = vpop.xlane.xlu1 %1669 }
 0x669   : > { %v3312_v0 = vpop.f32.mrf.mxu0 }
 0x66a   : > { %v2128_v53 = vmul.f32 %v3695_v45, %v3312_v0  ;;  %v3717_v0 = vpop.eup %3716 }
 0x66b   : > { %v1903_v47 = vpop.f32.mrf.mxu0 }
 0x66c   : > { %v3516_v44 = vpack.i.bf16 %v2128_v53, %v2127_v25  ;;  %v3327_v21 = vpop.f32.mrf.mxu1  ;;  %v2126_v54 = vmul.f32 %v3699_v49, %v1903_v47  ;;  %v3719_v25 = vpop.eup %3718 }
 0x66d   : > { %v2135_v48 = vmul.f32 %v3697_v27, %v3327_v21 }
 0x66e   : > { %3517 = vrot.lane.b32.xlu1 %v3516_v44, %s4063_s14  ;;  %v1977_v37 = vpop.f32.mrf.mxu1  ;;  %v3526_v55 = vpack.i.bf16 %v2126_v54, %v2125_v29 }
 0x66f   : > { %v2133_v38 = vmul.f32 %v3703_v40, %v1977_v37  ;;  %v3721_v37 = vpop.eup %3720 }
 0x670   : > { %v3328_v35 = vpop.f32.mrf.mxu1  ;;  %v3723_v57 = vpop.eup %3722 }
 0x671   : > { %v2136_v39 = vmul.f32 %v3701_v28, %v3328_v35  ;;  %v3725_v8 = vpop.eup %3724 }
 0x672   : > { %v1980_v52 = vpop.f32.mrf.mxu1  ;;  %v3727_v47 = vpop.eup %3726 }
 0x673   : > { %v3521_v11 = vpack.i.bf16 %v2136_v39, %v2135_v48  ;;  %v2134_v56 = vmul.f32 %v3705_v19, %v1980_v52  ;;  %v3729_v39 = vpop.eup %3728 }
 0x675   : > { %v3531_v6 = vpack.i.bf16 %v2134_v56, %v2133_v38  ;;  %3522 = vrot.lane.b32.xlu0 %v3521_v11, %s4064_s15  ;;  %v3731_v38 = vpop.eup %3730 }
 0x676   : > { %v3733_v56 = vpop.eup %3732 }
 0x677   : > { %3532 = vrot.lane.b32.xlu1 %v3531_v6, %s4064_s15  ;;  %v3735_v29 = vpop.eup %3734 }
 0x678   : > { %v3737_v61 = vpop.eup %3736 }
 0x679   : > { %3527 = vrot.lane.b32.xlu0 %v3526_v55, %s4063_s14  ;;  %v3315_v26 = vpop.f32.mrf.mxu0  ;;  %v3739_v60 = vpop.eup %3738 }
 0x67a   : > { %v2131_v50 = vmul.f32 %v3721_v37, %v3315_v26 }
 0x67b   : > { %v1916_v16 = vpop.f32.mrf.mxu0 }
 0x67c   : > { %v2129_v35 = vmul.f32 %v3723_v57, %v1916_v16 }
 0x67d   : > { %v3316_v5 = vpop.f32.mrf.mxu0  ;;  %v3331_v30 = vpop.f32.mrf.mxu1 }
 0x67e   : > { %v2132_v53 = vmul.f32 %v3717_v0, %v3316_v5  ;;  %v2139_v52 = vmul.f32 %v3729_v39, %v3331_v30 }
 0x67f   : > { %v1919_v17 = vpop.f32.mrf.mxu0  ;;  %v1993_v32 = vpop.f32.mrf.mxu1 }
 0x680   : > { %v2130_v49 = vmul.f32 %v3719_v25, %v1919_v17  ;;  %v3551_v40 = vpack.i.bf16 %v2132_v53, %v2131_v50  ;;  %v2137_v20 = vmul.f32 %v3731_v38, %v1993_v32  ;;  %v1667_v17 = vpop.xlane.xlu0 %1666 }
 0x681   : > { %v3332_v51 = vpop.f32.mrf.mxu1  ;;  %3740 = vrcp.f32 %v1667_v17 }
 0x682   : > { %v2140_v48 = vmul.f32 %v3725_v8, %v3332_v51  ;;  %v3546_v4 = vpack.i.bf16 %v2130_v49, %v2129_v35  ;;  %3742 = vrcp.f32 %v1670_v13 }
 0x683   : > { %v1996_v28 = vpop.f32.mrf.mxu1 }
 0x684   : > { %v2138_v54 = vmul.f32 %v3727_v47, %v1996_v28  ;;  %v3561_v15 = vpack.i.bf16 %v2140_v48, %v2139_v52  ;;  %v1673_v2 = vpop.xlane.xlu0 %1672 }
 0x685   : > { %3744 = vrcp.f32 %v1673_v2 }
 0x686   : > { %v3556_v55 = vpack.i.bf16 %v2138_v54, %v2137_v20 }
 0x688   : > { %v1679_v43 = vpop.xlane.xlu0 %1678 }
 0x689   : > { %v3343_v14 = vpop.f32.mrf.mxu0 }
 0x68a   : > { %v2143_v22 = vmul.f32 %v3709_v31, %v3343_v14  ;;  %v1676_v14 = vpop.xlane.xlu1 %1675 }
 0x68b   : > { %v2054_v59 = vpop.f32.mrf.mxu0  ;;  %3746 = vrcp.f32 %v1676_v14 }
 0x68c   : > { %v2141_v44 = vmul.f32 %v3713_v7, %v2054_v59  ;;  %v1685_v32 = vpop.xlane.xlu0 %1684  ;;  %3748 = vrcp.f32 %v1679_v43 }
 0x68d   : > { %v3344_v18 = vpop.f32.mrf.mxu0 }
 0x68e   : > { %v2144_v45 = vmul.f32 %v3711_v62, %v3344_v18  ;;  %v1682_v31 = vpop.xlane.xlu1 %1681  ;;  %v3741_v7 = vpop.eup %3740 }
 0x68f   : > { %v2057_v42 = vpop.f32.mrf.mxu0  ;;  %3750 = vrcp.f32 %v1682_v31  ;;  %v2117_v37 = vmul.f32 %v3741_v7, %v4994_v10 }
 0x690   : > { %v3541_v21 = vpack.i.bf16 %v2144_v45, %v2143_v22  ;;  %v2142_v27 = vmul.f32 %v3715_v36, %v2057_v42  ;;  %v3743_v22 = vpop.eup %3742  ;;  %3752 = vrcp.f32 %v1685_v32 }
 0x691   : > { %v2118_v57 = vmul.f32 %v3743_v22, %v4998_v41 }
 0x692   : > { %v3536_v23 = vpack.i.bf16 %v2142_v27, %v2141_v44  ;;  %3542 = vrot.lane.b32.xlu0 %v3541_v21, %s4065_s25  ;;  %v1688_v62 = vpop.xlane.xlu1 %1687  ;;  %v3745_v45 = vpop.eup %3744 }
 0x693   : > { %3754 = vrcp.f32 %v1688_v62  ;;  %v2119_v49 = vmul.f32 %v3745_v45, %v4992_v12 }
 0x694   : > { %3537 = vrot.lane.b32.xlu1 %v3536_v23, %s4065_s25 }
 0x695   : > { %v3347_v19 = vpop.f32.mrf.mxu0 }
 0x696   : > { %3552 = vrot.lane.b32.xlu0 %v3551_v40, %s4063_s14  ;;  %v2147_v26 = vmul.f32 %v3733_v56, %v3347_v19 }
 0x697   : > { %v2070_v11 = vpop.f32.mrf.mxu0 }
 0x698   : > { %3547 = vrot.lane.b32.xlu1 %v3546_v4, %s4063_s14  ;;  %v2145_v46 = vmul.f32 %v3737_v61, %v2070_v11  ;;  %v3747_v0 = vpop.eup %3746 }
 0x699   : > { %v3348_v6 = vpop.f32.mrf.mxu0  ;;  %v2120_v50 = vmul.f32 %v3747_v0, %v4996_v1 }
 0x69a   : > { %v2148_v58 = vmul.f32 %v3735_v29, %v3348_v6  ;;  %3562 = vrot.lane.b32.xlu0 %v3561_v15, %s4064_s15  ;;  %v3749_v29 = vpop.eup %3748 }
 0x69b   : > { %v2073_v16 = vpop.f32.mrf.mxu0  ;;  %v2121_v2 = vmul.f32 %v3749_v29, %v5006_v3  ;;  %v3808_v29 = vld [vmem:[%s4335_s28 + $0x30] sm:$0xff] }
 0x69c   : > { %v3571_v24 = vpack.i.bf16 %v2148_v58, %v2147_v26  ;;  %v2146_v5 = vmul.f32 %v3739_v60, %v2073_v16  ;;  %3557 = vrot.lane.b32.xlu1 %v3556_v55, %s4064_s15  ;;  %v3751_v55 = vpop.eup %3750 }
 0x69d   : > { %v3753_v58 = vpop.eup %3752  ;;  %v2122_v13 = vmul.f32 %v3751_v55, %v5010_v9 }
 0x69e   : > { %v3566_v30 = vpack.i.bf16 %v2146_v5, %v2145_v46  ;;  %3572 = vrot.lane.b32.xlu0 %v3571_v24, %s4065_s25  ;;  %v2123_v31 = vmul.f32 %v3753_v58, %v5000_v34 }
 0x6a0   : > { %3567 = vrot.lane.b32.xlu1 %v3566_v30, %s4065_s25  ;;  %v3755_v16 = vpop.eup %3754  ;;  %s2905_s25 = sshll.u32 %s585_s8, 4  ;;  %s5231_s25 = int_to_ptr.vmem [resolvable:$true] %s2905_s25 }
 0x6a1   : > { %v2124_v32 = vmul.f32 %v3755_v16, %v5008_v33  ;;  %s3970_s23 = scalar_lea.vmem %s5231_s25, 1024  ;;  %p3977_p5 = scmp.lt.s32.totalorder %s5231_s25, %s3975_s22 }
 0x6a2   : > { %p3971_p10 = scmp.ne.s32.totalorder %s5231_s25, %s3970_s23  ;;  %p3978_p9 = scmp.lt.s32.totalorder %s3976_s13, %s3970_s23 }
 0x6a4   : > { %p3972_p0 = pnand %p3971_p10, %p5335_p11  ;;  %p3979_p1 = por %p3978_p9, %p3977_p5 }
 0x6a6   : > { %p3973_p13 = pneg %p3972_p0 }
 0x6a8   : > { %p3980_p3 = pnand %p3979_p1, %p3973_p13 }
 0x6e0   : > { %v3518_v18 = vpop.permute.xlu1 %3517 }
 0x6e1   : > { %v3520_v25 = vunpack.i.h.bf16 %v3518_v18  ;;  %v3519_v53 = vunpack.i.l.bf16 %v3518_v18 }
 0x6e3   : > { %v2248_v40 = vsel %vm1092_vm1, %v2120_v50, %v3520_v25  ;;  %v2247_v48 = vsel %vm1092_vm1, %v2119_v49, %v3519_v53 }
 0x6e7   : > { %v3523_v59 = vpop.permute.xlu0 %3522 }
 0x6e8   : > { %v3525_v21 = vunpack.i.h.bf16 %v3523_v59  ;;  %v3524_v27 = vunpack.i.l.bf16 %v3523_v59 }
 0x6e9   : > { %v3533_v44 = vpop.permute.xlu1 %3532 }
 0x6ea   : > { %v3535_v10 = vunpack.i.h.bf16 %v3533_v44  ;;  %v3534_v39 = vunpack.i.l.bf16 %v3533_v44  ;;  %v2257_v1 = vsel %vm2253_vm2, %v2248_v40, %v3525_v21  ;;  %v2256_v12 = vsel %vm2253_vm2, %v2247_v48, %v3524_v27  ;;  %v3805_v48 = vld [vmem:[%s4335_s28 + $0x18] sm:$0xff] }
 0x6eb   : > { %v3528_v36 = vpop.permute.xlu0 %3527 }
 0x6ec   : > { %v3530_v51 = vunpack.i.h.bf16 %v3528_v36  ;;  %v3529_v42 = vunpack.i.l.bf16 %v3528_v36 }
 0x6ee   : > { %v2246_v8 = vsel %vm1092_vm1, %v2118_v57, %v3530_v51  ;;  %v2245_v28 = vsel %vm1092_vm1, %v2117_v37, %v3529_v42 }
 0x6ef   : > { %v2254_v38 = vsel %vm2253_vm2, %v2245_v28, %v3534_v39  ;;  %v2255_v11 = vsel %vm2253_vm2, %v2246_v8, %v3535_v10  ;;  %v3804_v8 = vld [vmem:[%s4335_s28] sm:$0xff] }
 0x704   : > { %v3543_v23 = vpop.permute.xlu0 %3542 }
 0x705   : > { %v3545_v47 = vunpack.i.h.bf16 %v3543_v23  ;;  %v3544_v35 = vunpack.i.l.bf16 %v3543_v23 }
 0x706   : > { %v3538_v41 = vpop.permute.xlu1 %3537 }
 0x707   : > { %v3540_v19 = vunpack.i.h.bf16 %v3538_v41  ;;  %v3539_v52 = vunpack.i.l.bf16 %v3538_v41  ;;  %v2265_v4 = vsel %vm2262_vm3, %v2256_v12, %v3544_v35  ;;  %v2266_v54 = vsel %vm2262_vm3, %v2257_v1, %v3545_v47  ;;  %v3099_v47 = vld [vmem:[%s5287_s10] ss:$0 sm:$0xff]  ;;  %v3806_v41 = vld [vmem:[%s4335_s28 + $0x10] sm:$0xff] }
 0x708   : > { %v3553_v56 = vpop.permute.xlu0 %3552  ;;  %v2272_v26 = vpack.c.bf16 %v2266_v54, %v2265_v4 }
 0x709   : > { %v2263_v20 = vsel %vm2262_vm3, %v2254_v38, %v3539_v52  ;;  %v2264_v15 = vsel %vm2262_vm3, %v2255_v11, %v3540_v19  ;;  %v3555_v46 = vunpack.i.h.bf16 %v3553_v56  ;;  %v3554_v24 = vunpack.i.l.bf16 %v3553_v56  ;;  %v3807_v19 = vld [vmem:[%s4335_s28 + $0x8] sm:$0xff] }
 0x70a   : > { %v2271_v6 = vpack.c.bf16 %v2264_v15, %v2263_v20  ;;  %v3548_v61 = vpop.permute.xlu1 %3547 }
 0x70b   : > { %v3550_v5 = vunpack.i.h.bf16 %v3548_v61  ;;  %v3549_v30 = vunpack.i.l.bf16 %v3548_v61  ;;  %v2252_v22 = vsel %vm1092_vm1, %v2124_v32, %v3555_v46  ;;  %v2251_v45 = vsel %vm1092_vm1, %v2123_v31, %v3554_v24  ;;  %v3809_v61 = vld [vmem:[%s4335_s28 + $0x20] sm:$0xff]  ;;  %v3810_v24 = vld [vmem:[%s4335_s28 + $0x38] sm:$0xff] }
 0x70c   : > { %v3563_v60 = vpop.permute.xlu0 %3562  ;;  %3357 = vmatprep.mubr.msk.bf16.mxu1 %vm597_vm0, %v2271_v6 }
 0x70d   : > { %3358 = vmatmul.mubr.msk.bf16.vlgmr.msra.gmra.mxu1 %vm597_vm0, %v2272_v26  ;;  %v3565_v14 = vunpack.i.h.bf16 %v3563_v60  ;;  %v3564_v43 = vunpack.i.l.bf16 %v3563_v60  ;;  %v2250_v0 = vsel %vm1092_vm1, %v2122_v13, %v3550_v5  ;;  %v2249_v9 = vsel %vm1092_vm1, %v2121_v2, %v3549_v30  ;;  %v3811_v30 = vld [vmem:[%s4335_s28 + $0x28] sm:$0xff]  ;;  %s5334_s28 = sld [smem:[#allocation27_spill]] }
 0x70e   : > { %v3558_v17 = vpop.permute.xlu1 %3557 }
 0x70f   : > { %v3560_v59 = vunpack.i.h.bf16 %v3558_v17  ;;  %v3559_v62 = vunpack.i.l.bf16 %v3558_v17  ;;  %v2260_v51 = vsel %vm2253_vm2, %v2251_v45, %v3564_v43  ;;  %v2261_v34 = vsel %vm2253_vm2, %v2252_v22, %v3565_v14 }
 0x710   : > { %v3573_v7 = vpop.permute.xlu0 %3572 }
 0x711   : > { %v3575_v18 = vunpack.i.h.bf16 %v3573_v7  ;;  %v3574_v36 = vunpack.i.l.bf16 %v3573_v7  ;;  %v2259_v25 = vsel %vm2253_vm2, %v2250_v0, %v3560_v59  ;;  %v2258_v53 = vsel %vm2253_vm2, %v2249_v9, %v3559_v62 }
 0x712   : > { %v3568_v3 = vpop.permute.xlu1 %3567 }
 0x713   : > { %v3570_v33 = vunpack.i.h.bf16 %v3568_v3  ;;  %v3569_v42 = vunpack.i.l.bf16 %v3568_v3  ;;  %v2269_v44 = vsel %vm2262_vm3, %v2260_v51, %v3574_v36  ;;  %v2270_v21 = vsel %vm2262_vm3, %v2261_v34, %v3575_v18  ;;  %s5229_s6 = scalar_lea.hbm %s5334_s28, %s3136_s20 }
 0x714   : > { %v2274_v50 = vpack.c.bf16 %v2270_v21, %v2269_v44 }
 0x715   : > { %v2268_v27 = vsel %vm2262_vm3, %v2259_v25, %v3570_v33  ;;  %v2267_v37 = vsel %vm2262_vm3, %v2258_v53, %v3569_v42 }
 0x716   : > { %v2273_v57 = vpack.c.bf16 %v2268_v27, %v2267_v37 }
 0x718   : > { %3361 = vmatprep.mubr.msk.bf16.mxu1 %vm597_vm0, %v2273_v57 }
 0x719   : > { %3362 = vmatmul.mubr.msk.bf16.gmra.mxu1 %vm597_vm0, %v2274_v50 }
 0x7cd   : > { %v3359_v49 = vpop.f32.mrf.mxu1 }
 0x7ce   : > { %v2386_v1 = vadd.f32 %v3806_v41, %v3359_v49 }
 0x7cf   : > { %v2353_v23 = vpop.f32.mrf.mxu1 }
 0x7d0   : > { %v2384_v28 = vadd.f32 %v3804_v8, %v2353_v23  ;;  %v5089_v38 = vadd.f32 %v3099_v47, %v2386_v1 }
 0x7d1   : > { %v3360_v35 = vpop.f32.mrf.mxu1 }
 0x7d2   : > { %v5078_v40 = vadd.f32 %v3099_v47, %v2384_v28  ;;  %v2387_v10 = vadd.f32 %v3805_v48, %v3360_v35  ;;  %v2415_v26 = vsel %vm597_vm0, %v5089_v38, 0.0 }
 0x7d3   : > { %v2356_v39 = vpop.f32.mrf.mxu1 }
 0x7d4   : > { %v5082_v12 = vadd.f32 %v3099_v47, %v2387_v10  ;;  %v2385_v52 = vadd.f32 %v3807_v19, %v2356_v39  ;;  %v2409_v4 = vsel %vm597_vm0, %v5078_v40, 0.0 }
 0x7d5   : > { %2410 = vadd.xlane.f32.xlu1 %v2409_v4 }
 0x7d6   : > { %v5087_v54 = vadd.f32 %v3099_v47, %v2385_v52  ;;  %v2418_v11 = vsel %vm597_vm0, %v5082_v12, 0.0 }
 0x7d8   : > { %v2412_v56 = vsel %vm597_vm0, %v5087_v54, 0.0 }
 0x7d9   : > { %2419 = vadd.xlane.f32.xlu1 %v2418_v11  ;;  %2413 = vadd.xlane.f32.xlu0 %v2412_v56  ;;  %v3363_v20 = vpop.f32.mrf.mxu1 }
 0x7da   : > { %v2390_v6 = vadd.f32 %v3808_v29, %v3363_v20  ;;  %v3594_v29 = vld [vmem:[#allocation11 + $0x34] ss:$8 sps:$4 sm:$0xff]  }
 0x7db   : > { %v2369_v15 = vpop.f32.mrf.mxu1  ;;  %2613 = vmatprep.subr.bf16.mxu0 %v3594_v29 }
 0x7dc   : > { %v2388_v55 = vadd.f32 %v3809_v61, %v2369_v15  ;;  %v5101_v46 = vadd.f32 %v3099_v47, %v2390_v6  ;;  %v3592_v6 = vld [vmem:[#allocation11 + $0x30] ss:$8 sps:$4 sm:$0xff]   ;;  %v3597_v61 = vld [vmem:[#allocation11 + $0x24] ss:$8 sps:$4 sm:$0xff]  }
 0x7dd   : > { %2416 = vadd.xlane.f32.xlu0 %v2415_v26  ;;  %v3364_v58 = vpop.f32.mrf.mxu1  ;;  %2614 = vmatpush1.bf16.msra.mxu0 %v3592_v6  ;;  %v3600_v26 = vld [vmem:[#allocation11 + $0x14] ss:$8 sps:$4 sm:$0xff]  }
 0x7de   : > { %v5099_v60 = vadd.f32 %v3099_v47, %v2388_v55  ;;  %v2391_v5 = vadd.f32 %v3810_v24, %v3364_v58  ;;  %v2427_v43 = vsel %vm597_vm0, %v5101_v46, 0.0  ;;  %v3595_v55 = vld [vmem:[#allocation11 + $0x20] ss:$8 sps:$4 sm:$0xff]   ;;  %2615 = vmatprep.subr.bf16.mxu0 %v3597_v61  ;;  %v3598_v58 = vld [vmem:[#allocation11 + $0x10] ss:$8 sps:$4 sm:$0xff]  }
 0x7df   : > { %v2372_v16 = vpop.f32.mrf.mxu1  ;;  %v3601_v24 = vld [vmem:[#allocation11] ss:$8 sps:$4 sm:$0xff]  }
 0x7e0   : > { %v2389_v17 = vadd.f32 %v3811_v30, %v2372_v16  ;;  %v2421_v13 = vsel %vm597_vm0, %v5099_v60, 0.0  ;;  %v5109_v14 = vadd.f32 %v3099_v47, %v2391_v5  ;;  %v3603_v16 = vld [vmem:[#allocation11 + $0x4] ss:$8 sps:$4 sm:$0xff]  }
 0x7e1   : > { %2422 = vadd.xlane.f32.xlu0 %v2421_v13  ;;  %2616 = vmatpush1.bf16.msra.mxu0 %v3595_v55 }
 0x7e2   : > { %v5107_v2 = vadd.f32 %v3099_v47, %v2389_v17  ;;  %v2430_v32 = vsel %vm597_vm0, %v5109_v14, 0.0  ;;  %2617 = vmatprep.subr.bf16.mxu0 %v3600_v26 }
 0x7e4   : > { %v2424_v31 = vsel %vm597_vm0, %v5107_v2, 0.0 }
 0x7e5   : > { %2428 = vadd.xlane.f32.xlu0 %v2427_v43  ;;  %2425 = vadd.xlane.f32.xlu1 %v2424_v31 }
 0x7e6   : > { %2618 = vmatpush1.bf16.msra.mxu0 %v3598_v58 }
 0x7e7   : > { %2619 = vmatprep.subr.bf16.mxu0 %v3603_v16 }
 0x7e9   : > { %2431 = vadd.xlane.f32.xlu1 %v2430_v32 }
 0x7ea   : > { %2620 = vmatpush1.bf16.msra.mxu0 %v3601_v24 }
 0x85e   : > { %v2411_v59 = vpop.xlane.xlu1 %2410 }
 0x85f   : > { %v2433_v62 = vmul.f32 0.015625, %v2411_v59 }
 0x861   : > { %v5118_v7 = vsub.f32 %v5078_v40, %v2433_v62 }
 0x862   : > { %v2420_v18 = vpop.xlane.xlu1 %2419  ;;  %v2414_v36 = vpop.xlane.xlu0 %2413 }
 0x863   : > { %v2436_v22 = vmul.f32 0.015625, %v2420_v18  ;;  %v2434_v45 = vmul.f32 0.015625, %v2414_v36  ;;  %v2449_v0 = vmul.f32 %v5118_v7, %v5118_v7 }
 0x865   : > { %v5123_v9 = vsub.f32 %v5082_v12, %v2436_v22  ;;  %v5126_v3 = vsub.f32 %v5087_v54, %v2434_v45  ;;  %v2457_v51 = vsel %vm597_vm0, %v2449_v0, 0.0 }
 0x866   : > { %v2417_v34 = vpop.xlane.xlu0 %2416  ;;  %2458 = vadd.xlane.f32.xlu0 %v2457_v51 }
 0x867   : > { %v2435_v33 = vmul.f32 0.015625, %v2417_v34  ;;  %v2450_v42 = vmul.f32 %v5126_v3, %v5126_v3  ;;  %v2452_v44 = vmul.f32 %v5123_v9, %v5123_v9 }
 0x869   : > { %v5132_v25 = vsub.f32 %v5089_v38, %v2435_v33  ;;  %v2460_v53 = vsel %vm597_vm0, %v2450_v42, 0.0  ;;  %v2466_v49 = vsel %vm597_vm0, %v2452_v44, 0.0 }
 0x86a   : > { %v2423_v21 = vpop.xlane.xlu0 %2422  ;;  %2461 = vadd.xlane.f32.xlu1 %v2460_v53 }
 0x86b   : > { %v2437_v27 = vmul.f32 0.015625, %v2423_v21  ;;  %v2451_v37 = vmul.f32 %v5132_v25, %v5132_v25 }
 0x86d   : > { %v5140_v57 = vsub.f32 %v5099_v60, %v2437_v27  ;;  %v2463_v50 = vsel %vm597_vm0, %v2451_v37, 0.0  ;;  %v3100_v37 = vld [vmem:[%s5288_s11] ss:$0 sm:$0xff] }
 0x86e   : > { %2464 = vadd.xlane.f32.xlu0 %v2463_v50  ;;  %v2429_v23 = vpop.xlane.xlu0 %2428  ;;  %2467 = vadd.xlane.f32.xlu1 %v2466_v49  ;;  %v2426_v8 = vpop.xlane.xlu1 %2425 }
 0x86f   : > { %v2439_v28 = vmul.f32 0.015625, %v2429_v23  ;;  %v2438_v47 = vmul.f32 0.015625, %v2426_v8  ;;  %v2453_v35 = vmul.f32 %v5140_v57, %v5140_v57 }
 0x871   : > { %v5147_v48 = vsub.f32 %v5101_v46, %v2439_v28  ;;  %v5150_v10 = vsub.f32 %v5107_v2, %v2438_v47  ;;  %v2469_v39 = vsel %vm597_vm0, %v2453_v35, 0.0 }
 0x872   : > { %2470 = vadd.xlane.f32.xlu0 %v2469_v39  ;;  %v2432_v41 = vpop.xlane.xlu1 %2431 }
 0x873   : > { %v2440_v1 = vmul.f32 0.015625, %v2432_v41  ;;  %v2455_v19 = vmul.f32 %v5147_v48, %v5147_v48  ;;  %v2454_v52 = vmul.f32 %v5150_v10, %v5150_v10 }
 0x875   : > { %v5158_v4 = vsub.f32 %v5109_v14, %v2440_v1  ;;  %v2475_v11 = vsel %vm597_vm0, %v2455_v19, 0.0  ;;  %v2472_v56 = vsel %vm597_vm0, %v2454_v52, 0.0 }
 0x876   : > { %2476 = vadd.xlane.f32.xlu0 %v2475_v11  ;;  %2473 = vadd.xlane.f32.xlu1 %v2472_v56 }
 0x877   : > { %v2456_v20 = vmul.f32 %v5158_v4, %v5158_v4 }
 0x879   : > { %v2478_v15 = vsel %vm597_vm0, %v2456_v20, 0.0 }
 0x87a   : > { %2479 = vadd.xlane.f32.xlu1 %v2478_v15 }
 0x8ef   : > { %v2459_v5 = vpop.xlane.xlu0 %2458 }
 0x8f0   : > { %v2481_v30 = vmul.f32 0.015625, %v2459_v5 }
 0x8f2   : > { %v2489_v17 = vadd.f32 1e-05, %v2481_v30 }
 0x8f3   : > { %v2462_v13 = vpop.xlane.xlu1 %2461 }
 0x8f4   : > { %3756 = vrsqrt.f32 %v2489_v17  ;;  %v2482_v43 = vmul.f32 0.015625, %v2462_v13 }
 0x8f6   : > { %v2490_v31 = vadd.f32 1e-05, %v2482_v43 }
 0x8f7   : > { %v2465_v32 = vpop.xlane.xlu0 %2464  ;;  %v2468_v59 = vpop.xlane.xlu1 %2467 }
 0x8f8   : > { %3758 = vrsqrt.f32 %v2490_v31  ;;  %v2483_v62 = vmul.f32 0.015625, %v2465_v32  ;;  %v2484_v18 = vmul.f32 0.015625, %v2468_v59 }
 0x8fa   : > { %v2491_v36 = vadd.f32 1e-05, %v2483_v62  ;;  %v2492_v22 = vadd.f32 1e-05, %v2484_v18  ;;  %v3604_v18 = vld [vmem:[%s5333_s17 + $0x38] sm:$0xff]  }
 0x8fb   : > { %v2471_v45 = vpop.xlane.xlu0 %2470  ;;  %3365 = vmatprep.subr.bf16.mxu1 %v3604_v18 }
 0x8fc   : > { %3760 = vrsqrt.f32 %v2491_v36  ;;  %v2485_v0 = vmul.f32 0.015625, %v2471_v45  ;;  %3366 = vmatpush3.bf16.msra.mxu1 %v3604_v18  ;;  %v3608_v36 = vld [vmem:[%s5333_s17 + $0x18] sm:$0xff]   ;;  %v3610_v45 = vld [vmem:[%s5333_s17 + $0x8] sm:$0xff]  }
 0x8fd   : > { %3762 = vrsqrt.f32 %v2492_v22  ;;  %v3609_v22 = vld [vmem:[%s5333_s17 + $0x10] sm:$0xff]  }
 0x8fe   : > { %v2493_v51 = vadd.f32 1e-05, %v2485_v0  ;;  %v3611_v0 = vld [vmem:[%s5333_s17] sm:$0xff]  }
 0x8ff   : > { %v2477_v34 = vpop.xlane.xlu0 %2476  ;;  %v2474_v33 = vpop.xlane.xlu1 %2473 }
 0x900   : > { %v2486_v42 = vmul.f32 0.015625, %v2474_v33  ;;  %3764 = vrsqrt.f32 %v2493_v51  ;;  %v2487_v21 = vmul.f32 0.015625, %v2477_v34 }
 0x901   : > { %v3757_v53 = vpop.eup %3756 }
 0x902   : > { %v2505_v44 = vmul.f32 %v3757_v53, %v5118_v7  ;;  %v2494_v27 = vadd.f32 1e-05, %v2486_v42  ;;  %v2495_v47 = vadd.f32 1e-05, %v2487_v21  ;;  %v3101_v7 = vld [vmem:[%s5289_s12] ss:$0 sm:$0xff] }
 0x903   : > { %v2480_v50 = vpop.xlane.xlu1 %2479 }
 0x904   : > { %v2488_v49 = vmul.f32 0.015625, %v2480_v50  ;;  %3766 = vrsqrt.f32 %v2494_v27  ;;  %v2519_v8 = vmul.f32 %v3100_v37, %v2505_v44 }
 0x905   : > { %v3759_v23 = vpop.eup %3758 }
 0x906   : > { %v2506_v28 = vmul.f32 %v3759_v23, %v5126_v3  ;;  %v2496_v35 = vadd.f32 1e-05, %v2488_v49  ;;  %v2533_v19 = vadd.f32 %v3101_v7, %v2519_v8 }
 0x908   : > { %v2520_v39 = vmul.f32 %v3100_v37, %v2506_v28  ;;  %3768 = vrsqrt.f32 %v2496_v35 }
 0x909   : > { %v3761_v41 = vpop.eup %3760  ;;  %3770 = vrsqrt.f32 %v2495_v47 }
 0x90a   : > { %v3763_v1 = vpop.eup %3762  ;;  %v2534_v52 = vadd.f32 %v3101_v7, %v2520_v39  ;;  %v2507_v11 = vmul.f32 %v3761_v41, %v5132_v25 }
 0x90b   : > { %v2508_v56 = vmul.f32 %v3763_v1, %v5123_v9 }
 0x90c   : > { %v2541_v20 = vpack.c.bf16 %v2534_v52, %v2533_v19  ;;  %v2521_v15 = vmul.f32 %v3100_v37, %v2507_v11 }
 0x90d   : > { %v2522_v3 = vmul.f32 %v3100_v37, %v2508_v56  ;;  %v3765_v29 = vpop.eup %3764 }
 0x90e   : > { %3110 = vmatmul.mubr.msk.bf16.vlgmr.msra.gmra.mxu0 %vm597_vm0, %v2541_v20  ;;  %v2535_v6 = vadd.f32 %v3101_v7, %v2521_v15  ;;  %v2509_v26 = vmul.f32 %v3765_v29, %v5140_v57 }
 0x90f   : > { %2647 = vmatprep.mubr.bf16.mxu0 %v4056_v63  ;;  %v2536_v61 = vadd.f32 %v3101_v7, %v2522_v3 }
 0x910   : > { %v2523_v9 = vmul.f32 %v3100_v37, %v2509_v26 }
 0x911   : > { %v3767_v55 = vpop.eup %3766  ;;  %v2542_v16 = vpack.c.bf16 %v2536_v61, %v2535_v6 }
 0x912   : > { %v2510_v58 = vmul.f32 %v3767_v55, %v5150_v10  ;;  %v2537_v13 = vadd.f32 %v3101_v7, %v2523_v9 }
 0x914   : > { %v2524_v25 = vmul.f32 %v3100_v37, %v2510_v58 }
 0x915   : > { %v3769_v24 = vpop.eup %3768 }
 0x916   : > { %3111 = vmatmul.mubr.msk.bf16.gmra.mxu0 %vm597_vm0, %v2542_v16  ;;  %v3771_v5 = vpop.eup %3770  ;;  %v2538_v30 = vadd.f32 %v3101_v7, %v2524_v25  ;;  %v2512_v17 = vmul.f32 %v3769_v24, %v5158_v4  ;;  %v3607_v4 = vld [vmem:[%s5333_s17 + $0x20] sm:$0xff]  }
 0x917   : > { %2657 = vmatprep.mubr.bf16.mxu0 %v4056_v63  ;;  %v2511_v43 = vmul.f32 %v3771_v5, %v5147_v48  ;;  %v3605_v48 = vld [vmem:[%s5333_s17 + $0x30] sm:$0xff]  }
 0x918   : > { %v2543_v31 = vpack.c.bf16 %v2538_v30, %v2537_v13  ;;  %v2526_v32 = vmul.f32 %v3100_v37, %v2512_v17  ;;  %3367 = vmatprep.subr.bf16.mxu1 %v3605_v48 }
 0x919   : > { %v2525_v57 = vmul.f32 %v3100_v37, %v2511_v43  ;;  %3368 = vmatpush3.bf16.msra.mxu1 %v3605_v48 }
 0x91a   : > { %v2540_v10 = vadd.f32 %v3101_v7, %v2526_v32 }
 0x91b   : > { %v2539_v59 = vadd.f32 %v3101_v7, %v2525_v57 }
 0x91d   : > { %v2544_v62 = vpack.c.bf16 %v2540_v10, %v2539_v59 }
 0x91e   : > { %3112 = vmatmul.mubr.msk.bf16.gmra.mxu0 %vm597_vm0, %v2543_v31 }
 0x91f   : > { %2667 = vmatprep.mubr.bf16.mxu0 %v4056_v63  ;;  %v3606_v63 = vld [vmem:[%s5333_s17 + $0x28] sm:$0xff]  }
 0x920   : > { %3369 = vmatprep.subr.bf16.mxu1 %v3606_v63 }
 0x921   : > { %3370 = vmatpush3.bf16.msra.mxu1 %v3606_v63 }
 0x922   : > { %3371 = vmatprep.subr.bf16.mxu1 %v3607_v4 }
 0x925   : > { %3372 = vmatpush3.bf16.msra.mxu1 %v3607_v4 }
 0x926   : > { %3113 = vmatmul.mubr.msk.bf16.gmra.mxu0 %vm597_vm0, %v2544_v62  ;;  %3373 = vmatprep.subr.bf16.mxu1 %v3608_v36 }
 0x929   : > { %3374 = vmatpush3.bf16.msra.mxu1 %v3608_v36 }
 0x92a   : > { %3375 = vmatprep.subr.bf16.mxu1 %v3609_v22 }
 0x92d   : > { %3376 = vmatpush3.bf16.msra.mxu1 %v3609_v22 }
 0x92e   : > { %3377 = vmatprep.subr.bf16.mxu1 %v3610_v45 }
 0x931   : > { %3378 = vmatpush3.bf16.msra.mxu1 %v3610_v45 }
 0x932   : > { %3379 = vmatprep.subr.bf16.mxu1 %v3611_v0 }
 0x935   : > { %3380 = vmatpush3.bf16.msra.mxu1 %v3611_v0 }
 0x9ce   : > { %v2639_v51 = vpop.f32.mrf.mxu0 }
 0x9d0   : > { %v2641_v34 = vpop.f32.mrf.mxu0 }
 0x9d1   : > { %v3114_v33 = vmul.f32 -1.442695, %v2641_v34 }
 0x9d2   : > { %v2643_v42 = vpop.f32.mrf.mxu0 }
 0x9d3   : > { %3772 = vpow2.f32 %v3114_v33 }
 0x9d4   : > { %v2645_v53 = vpop.f32.mrf.mxu0 }
 0x9d5   : > { %v3115_v44 = vmul.f32 -1.442695, %v2645_v53 }
 0x9d6   : > { %v2649_v21 = vpop.f32.mrf.mxu0 }
 0x9d7   : > { %3774 = vpow2.f32 %v3115_v44 }
 0x9d8   : > { %v2651_v27 = vpop.f32.mrf.mxu0 }
 0x9d9   : > { %v3116_v37 = vmul.f32 -1.442695, %v2651_v27 }
 0x9da   : > { %v2653_v50 = vpop.f32.mrf.mxu0 }
 0x9db   : > { %3776 = vpow2.f32 %v3116_v37 }
 0x9dc   : > { %v2655_v49 = vpop.f32.mrf.mxu0 }
 0x9dd   : > { %v3117_v23 = vmul.f32 -1.442695, %v2655_v49 }
 0x9de   : > { %v2659_v8 = vpop.f32.mrf.mxu0 }
 0x9df   : > { %3778 = vpow2.f32 %v3117_v23 }
 0x9e0   : > { %v3773_v28 = vpop.eup %3772  ;;  %v2661_v47 = vpop.f32.mrf.mxu0 }
 0x9e1   : > { %v2702_v35 = vadd.f32 1.0, %v3773_v28  ;;  %v3118_v7 = vmul.f32 -1.442695, %v2661_v47 }
 0x9e2   : > { %v2663_v39 = vpop.f32.mrf.mxu0 }
 0x9e3   : > { %3780 = vrcp.f32 %v2702_v35 }
 0x9e4   : > { %v3775_v41 = vpop.eup %3774  ;;  %3782 = vpow2.f32 %v3118_v7  ;;  %v2665_v1 = vpop.f32.mrf.mxu0 }
 0x9e5   : > { %v2703_v19 = vadd.f32 1.0, %v3775_v41  ;;  %v3119_v52 = vmul.f32 -1.442695, %v2665_v1 }
 0x9e6   : > { %v2669_v11 = vpop.f32.mrf.mxu0 }
 0x9e7   : > { %3784 = vrcp.f32 %v2703_v19 }
 0x9e8   : > { %v3777_v56 = vpop.eup %3776  ;;  %3786 = vpow2.f32 %v3119_v52  ;;  %v2671_v20 = vpop.f32.mrf.mxu0 }
 0x9e9   : > { %v2704_v15 = vadd.f32 1.0, %v3777_v56  ;;  %v3120_v3 = vmul.f32 -1.442695, %v2671_v20 }
 0x9ea   : > { %v2673_v29 = vpop.f32.mrf.mxu0 }
 0x9eb   : > { %3788 = vrcp.f32 %v2704_v15 }
 0x9ec   : > { %v3779_v6 = vpop.eup %3778  ;;  %3790 = vpow2.f32 %v3120_v3  ;;  %v2675_v61 = vpop.f32.mrf.mxu0 }
 0x9ed   : > { %v2705_v55 = vadd.f32 1.0, %v3779_v6  ;;  %v3121_v26 = vmul.f32 -1.442695, %v2675_v61 }
 0x9ef   : > { %3792 = vrcp.f32 %v2705_v55 }
 0x9f0   : > { %v3781_v58 = vpop.eup %3780  ;;  %3794 = vpow2.f32 %v3121_v26 }
 0x9f1   : > { %v3783_v16 = vpop.eup %3782  ;;  %v2726_v25 = vmul.f32 %v3781_v58, %v2641_v34 }
 0x9f2   : > { %v2706_v24 = vadd.f32 1.0, %v3783_v16 }
 0x9f3   : > { %v2734_v13 = vmul.f32 %v2726_v25, %v2639_v51 }
 0x9f4   : > { %v3785_v9 = vpop.eup %3784  ;;  %3796 = vrcp.f32 %v2706_v24 }
 0x9f5   : > { %v3787_v5 = vpop.eup %3786  ;;  %v2727_v30 = vmul.f32 %v3785_v9, %v2645_v53 }
 0x9f6   : > { %v2707_v17 = vadd.f32 1.0, %v3787_v5 }
 0x9f7   : > { %v2735_v43 = vmul.f32 %v2727_v30, %v2643_v42 }
 0x9f8   : > { %v3789_v31 = vpop.eup %3788  ;;  %3798 = vrcp.f32 %v2707_v17 }
 0x9f9   : > { %v3791_v32 = vpop.eup %3790  ;;  %v2742_v57 = vpack.c.bf16 %v2735_v43, %v2734_v13  ;;  %v2728_v59 = vmul.f32 %v3789_v31, %v2651_v27 }
 0x9fa   : > { %v2708_v10 = vadd.f32 1.0, %v3791_v32 }
 0x9fb   : > { %3381 = vmatprep.mubr.bf16.mxu1 %v2742_v57  ;;  %v2736_v4 = vmul.f32 %v2728_v59, %v2649_v21 }
 0x9fc   : > { %v3793_v62 = vpop.eup %3792  ;;  %3800 = vrcp.f32 %v2708_v10 }
 0x9fd   : > { %v3795_v18 = vpop.eup %3794  ;;  %v2729_v48 = vmul.f32 %v3793_v62, %v2655_v49 }
 0x9fe   : > { %v2709_v63 = vadd.f32 1.0, %v3795_v18 }
 0x9ff   : > { %v2737_v36 = vmul.f32 %v2729_v48, %v2653_v50 }
 0xa00   : > { %3802 = vrcp.f32 %v2709_v63 }
 0xa01   : > { %v3797_v22 = vpop.eup %3796  ;;  %v2743_v45 = vpack.c.bf16 %v2737_v36, %v2736_v4 }
 0xa02   : > { %v2730_v0 = vmul.f32 %v3797_v22, %v2661_v47 }
 0xa03   : > { %3382 = vmatmul.mubr.bf16.vlgmr.msra.gmra.mxu1 %v2743_v45 }
 0xa04   : > { %v2738_v33 = vmul.f32 %v2730_v0, %v2659_v8 }
 0xa05   : > { %v3799_v51 = vpop.eup %3798 }
 0xa06   : > { %v2731_v34 = vmul.f32 %v3799_v51, %v2665_v1 }
 0xa08   : > { %v2739_v42 = vmul.f32 %v2731_v34, %v2663_v39 }
 0xa09   : > { %v3801_v53 = vpop.eup %3800 }
 0xa0a   : > { %v2744_v44 = vpack.c.bf16 %v2739_v42, %v2738_v33  ;;  %v2732_v27 = vmul.f32 %v3801_v53, %v2671_v20 }
 0xa0c   : > { %3385 = vmatprep.mubr.bf16.mxu1 %v2744_v44  ;;  %v2740_v49 = vmul.f32 %v2732_v27, %v2669_v11 }
 0xa0d   : > { %v3803_v37 = vpop.eup %3802 }
 0xa0e   : > { %v2733_v23 = vmul.f32 %v3803_v37, %v2675_v61 }
 0xa10   : > { %v2741_v28 = vmul.f32 %v2733_v23, %v2673_v29 }
 0xa12   : > { %v2745_v21 = vpack.c.bf16 %v2741_v28, %v2740_v49 }
 0xa14   : > { %3386 = vmatmul.mubr.bf16.gmra.mxu1 %v2745_v21 }
 0xac3   : > { %v3383_v50 = vpop.f32.mrf.mxu1 }
 0xac4   : > { %v2877_v35 = vadd.f32 %v3383_v50, %v5089_v38 }
 0xac5   : > { %v2844_v7 = vpop.f32.mrf.mxu1 }
 0xac6   : > { %2885 = vst.msk [vmem:[%s585_s8 + $0x10] sm:$0xff] %vm597_vm0, %v2877_v35  ;;  %v2875_v8 = vadd.f32 %v2844_v7, %v5078_v40 }
 0xac7   : > { %v3384_v47 = vpop.f32.mrf.mxu1 }
 0xac8   : > { %2883 = vst.msk [vmem:[%s585_s8] sm:$0xff] %vm597_vm0, %v2875_v8  ;;  %v2878_v39 = vadd.f32 %v3384_v47, %v5082_v12 }
 0xac9   : > { %v2847_v41 = vpop.f32.mrf.mxu1 }
 0xaca   : > { %2886 = vst.msk [vmem:[%s585_s8 + $0x18] sm:$0xff] %vm597_vm0, %v2878_v39  ;;  %v2876_v1 = vadd.f32 %v2847_v41, %v5087_v54 }
 0xacc   : > { %2884 = vst.msk [vmem:[%s585_s8 + $0x8] sm:$0xff] %vm597_vm0, %v2876_v1 }
 0xad4   : > { %v3387_v38 = vpop.f32.mrf.mxu1 }
 0xad5   : > { %v2881_v19 = vadd.f32 %v3387_v38, %v5101_v46 }
 0xad6   : > { %v2860_v52 = vpop.f32.mrf.mxu1 }
 0xad7   : > { %2889 = vst.msk [vmem:[%s585_s8 + $0x30] sm:$0xff] %vm597_vm0, %v2881_v19  ;;  %v2879_v40 = vadd.f32 %v2860_v52, %v5099_v60 }
 0xad8   : > { %v3388_v12 = vpop.f32.mrf.mxu1 }
 0xad9   : > { %2887 = vst.msk [vmem:[%s585_s8 + $0x20] sm:$0xff] %vm597_vm0, %v2879_v40  ;;  %v2882_v11 = vadd.f32 %v3388_v12, %v5109_v14 }
 0xada   : > { %v2863_v54 = vpop.f32.mrf.mxu1 }
 0xadb   : > { %2890 = vst.msk [vmem:[%s585_s8 + $0x38] sm:$0xff] %vm597_vm0, %v2882_v11  ;;  %v2880_v60 = vadd.f32 %v2863_v54, %v5107_v2 }
 0xadd   : > { %2888 = vst.msk [vmem:[%s585_s8 + $0x28] sm:$0xff] %vm597_vm0, %v2880_v60 }
 0xade   : > { %3983 = shalt.err (!%p3980_p3)
}
 0xadf   : > { %s3984_s15 = scalar_lea.hbm %s5229_s6, 1024  ;;  %s3988_s20 = scalar_lea.hbm %s5334_s28, 2048 }
 0xae0   : > { %p3985_p4 = scmp.ne.s32.totalorder %s5229_s6, %s3984_s15  ;;  %p3989_p2 = scmp.lt.s32.totalorder %s5229_s6, %s5334_s28 }
 0xae1   : > { %p3990_p7 = scmp.lt.s32.totalorder %s3988_s20, %s3984_s15 }
 0xae2   : > { %p3986_p12 = pnand %p3985_p4, %p5335_p11 }
 0xae3   : > { %p3991_p8 = por %p3990_p7, %p3989_p2 }
 0xae4   : > { %p3987_p6 = pneg %p3986_p12 }
 0xae6   : > { %p3992_p10 = pnand %p3991_p8, %p3987_p6 }
 0xae8   : > { %3995 = shalt.err (!%p3992_p10)
}
 0xae9   : > { %s4067_s23 = smov 128   ;;  %s4068_s29 = smov 8  }
 0xaea   : > { %3427 = dma.vmem_to_hbm [thread:$0]  (%p5335_p11), %s5231_s25, 1024, %s5229_s6, %s2892_s24, %s4067_s23, %s4067_s23, %s4068_s29  }
 0xaeb PF: > { %s2920_s22 = sand.u32 1, %s4034_s18   ;;  %p5336_p0 = scmp.ne.s32.totalorder %s5321_s27, 0 }
 0xaec   : > { %p5337_p13 = scmp.ge.s32.totalorder %s4046_s21, 2  ;;  %s2921_s13 = scalar_lea.sflag [#allocation4], %s2920_s22 }
 0xaee   : > { %p3450_p5 = pnand %p5337_p13, %p5336_p0 }
 0xaf0   : > { %p3451_p9 = pneg %p3450_p5 }
 0xaf2   : > { %4029 = dma.done.wait (%p3451_p9), %s2921_s13, 1024  }
 0xaf3   : > { %4031 = vsyncadd (%p3451_p9), %s2921_s13, 4294966272  ;;  %s5338_s15 = sld [smem:[#allocation19_spill]]  ;;  %p31_p1 = scmp.ge.s32.totalorder %s4260_s16, 4  }
 0xaf4   : > { %s5339_s20 = sld [smem:[#allocation20_spill]]  ;;  %s5340_s18 = smov %s4038_s19 }
 0xaf5   : > { %s5342_s21 = smov %s4260_s16  ;;  %33 = sbr.rel (!%p31_p1) target bundleno = 16 (0x10), region = 145 }
 0xaf9   : > { %s5341_s19 = smov %s5338_s15 }
 0xafa   :  { %2926 = vsyncpa [#allocation3], 1 }
 0xafb   :  { %2928 = vsyncpa [#allocation3 + $0x1], 1 }
 0xafc   :  { %2929 = vsyncpa [#allocation6], 1 }
 0xafd   :  { %2930 = vsyncpa [#allocation9], 1 }
 0xafe   :  { %2931 = vsyncpa [#allocation12], 1 }
 0xaff   :  { %2932 = vsyncpa [#allocation4], 1 }
 0xb00   :  { %2934 = vsyncpa [#allocation4 + $0x1], 1 }

</bundles_post_ra>
